<compile_context>
chip_gen: v5e
topology: v5e:2x2
jax: 0.10.0
libtpu: 0.0.40
codegen_flags: <defaults>
</compile_context>

<pallas_src>
import functools

import jax
import jax.numpy as jnp
from jax.experimental import pallas as pl
from jax.experimental.pallas import tpu as pltpu

MID = 32   # hidden width of the two inner conv layers (fixed by the module)


def _fused_kernel(x_ref, w1_ref, b1_ref, w2_ref, b2_ref, w3_ref, b3_ref,
                  mask_ref, out_ref, act_ref,
                  *, offsets, cin, cout, lp, margin):
    """One grid step = one image (all lanes of its padded Hp*Wp plane)."""
    f32 = jnp.float32

    # Zero only the two margin strips of the shared act buffer (the interior is
    # always fully overwritten before it is read).  Must be redone every grid
    # step because scratch persists across iterations.
    act_ref[:, 0:margin] = jnp.zeros((MID, margin), f32)
    act_ref[:, margin + lp:margin + 2 * margin + lp - margin + margin] = \
        jnp.zeros((MID, margin), f32)

    mask = mask_ref[...]                       # (1, lp): 1.0 at interior pixels
    xv = x_ref[...]                            # (cin, lp) zero-padded image

    def conv_taps(w_ref, nrows):
        """Accumulate 9 per-tap matmuls over lane-shifted slices of act."""
        h = None
        for k, off in enumerate(offsets):
            tap = act_ref[0:nrows, margin + off:margin + off + lp]
            t = jnp.dot(w_ref[k], tap, preferred_element_type=f32)
            h = t if h is None else h + t
        return h

    # ---------- layer 1: taps read rows 0:cin of the shared buffer ----------
    act_ref[0:cin, margin:margin + lp] = xv
    h = conv_taps(w1_ref, cin)
    h = jnp.maximum(h + b1_ref[...], 0.0) * mask               # (MID, lp)

    # ---------- layer 2 ----------
    act_ref[:, margin:margin + lp] = h
    h = conv_taps(w2_ref, MID)
    h = jnp.maximum(h + b2_ref[...], 0.0) * mask               # (MID, lp)

    # ---------- layer 3 ----------
    act_ref[:, margin:margin + lp] = h
    h = conv_taps(w3_ref, MID)
    h = jnp.maximum(h + b3_ref[...], 0.0)       # border / lane pad cropped later

    # ---------- fused concat([x, feature], channel axis) ----------
    out_ref[0:cin, :] = xv
    out_ref[cin:cin + cout, :] = h


def _round_up(v, m):
    return (v + m - 1) // m * m


@jax.jit
def feature_extraction_forward(x_nchw, params):
    """Matches FeatureExtraction.forward: y = cat([x, f_e_net(x)], dim=1)."""
    (w1, b1), (w2, b2), (w3, b3) = params
    N, Cin, H, W = x_nchw.shape
    Cout = w3.shape[-1]
    Hp, Wp = H + 2, W + 2
    HW = Hp * Wp
    Lp = _round_up(HW, 128)                    # lanes per image
    margin = _round_up(Wp + 1, 128)            # >= Wp+1, lane-aligned
    assert margin >= Wp + 1
    Ctot = Cin + Cout

    # Per-image zero-padded, flattened layout: x_flat[n, c, y*Wp + x], lane-pad.
    xp = jnp.pad(x_nchw, ((0, 0), (0, 0), (1, 1), (1, 1)))
    x_flat = jnp.pad(xp.reshape(N, Cin, HW), ((0, 0), (0, 0), (0, Lp - HW)))

    # Flat-index offsets of the 9 taps (dy, dx row-major) — matches weight order.
    offsets = tuple((dy - 1) * Wp + (dx - 1) for dy in range(3) for dx in range(3))

    def pack_w(w):   # HWIO (3, 3, Ci, Co) -> (9, Co, Ci), tap-major
        return jnp.transpose(w, (0, 1, 3, 2)).reshape(9, w.shape[3], w.shape[2])

    w1m, w2m, w3m = pack_w(w1), pack_w(w2), pack_w(w3)
    b1c, b2c, b3c = b1.reshape(-1, 1), b2.reshape(-1, 1), b3.reshape(-1, 1)

    # Interior-pixel mask along the lane axis (zero at border + lane padding).
    idx = jnp.arange(Lp)
    yy, xx = idx // Wp, idx % Wp
    valid = (idx < HW) & (yy >= 1) & (yy <= H) & (xx >= 1) & (xx <= W)
    mask = valid.astype(jnp.float32).reshape(1, Lp)

    kernel = functools.partial(_fused_kernel, offsets=offsets, cin=Cin,
                               cout=Cout, lp=Lp, margin=margin)

    def const_spec(shape):
        nd = len(shape)
        return pl.BlockSpec(shape, lambda n, _nd=nd: (0,) * _nd)

    # Explicit VMEM budget from actual block/scratch sizes (+ headroom for the
    # live h tiles and double buffers); clamped well below v7x's 64 MiB.
    est = 4 * (2 * (Cin + Ctot + 1) * Lp            # x, out, mask (dbl-buffered)
               + MID * (Lp + 2 * margin)            # shared act scratch
               + 4 * MID * Lp) + (2 << 20)          # live h / tap temporaries
    vmem_limit = int(min(max(est, 8 << 20), 48 << 20))

    out_slab = pl.pallas_call(
        kernel,
        out_shape=jax.ShapeDtypeStruct((N, Ctot, Lp), jnp.float32),
        grid=(N,),
        in_specs=[
            pl.BlockSpec((None, Cin, Lp), lambda n: (n, 0, 0)),   # per-image x
            const_spec(w1m.shape), const_spec(b1c.shape),
            const_spec(w2m.shape), const_spec(b2c.shape),
            const_spec(w3m.shape), const_spec(b3c.shape),
            const_spec(mask.shape),
        ],
        out_specs=pl.BlockSpec((None, Ctot, Lp), lambda n: (n, 0, 0)),
        scratch_shapes=[
            pltpu.VMEM((MID, Lp + 2 * margin), jnp.float32),      # shared act
        ],
        compiler_params=pltpu.CompilerParams(
            dimension_semantics=("parallel",),
            vmem_limit_bytes=vmem_limit),
    )(x_flat, w1m, b1c, w2m, b2c, w3m, b3c, mask)

    # Crop the 1-pixel conv border and the lane padding; batch/channel already
    # lead, so no transpose is needed.
    # TODO(synk): if downstream consumers accept the (N, Ctot, Lp) slab, skip
    # this crop/reshape entirely.
    out = out_slab[:, :, :HW].reshape(N, Ctot, Hp, Wp)[:, :, 1:H + 1, 1:W + 1]
    return out


def init_params(key, in_channels, out_channels):
    """Deterministic synthetic parameters (shapes match the nn.Module)."""
    ks = jax.random.split(key, 6)

    def conv_init(kw, kb, cin, cout):
        fan_in = 3 * 3 * cin
        w = jax.random.normal(kw, (3, 3, cin, cout), jnp.float32) / jnp.sqrt(fan_in)
        b = 0.01 * jax.random.normal(kb, (cout,), jnp.float32)
        return w, b

    w1, b1 = conv_init(ks[0], ks[1], in_channels, 32)
    w2, b2 = conv_init(ks[2], ks[3], 32, 32)
    w3, b3 = conv_init(ks[4], ks[5], 32, out_channels)
    return (w1, b1), (w2, b2), (w3, b3)


def _reference_forward(x_nchw, params):
    """Pure-JAX reference (lax conv) for correctness checking."""
    (w1, b1), (w2, b2), (w3, b3) = params
    h = jnp.transpose(x_nchw, (0, 2, 3, 1))
    for w, b in ((w1, b1), (w2, b2), (w3, b3)):
        h = jax.lax.conv_general_dilated(
            h, w, window_strides=(1, 1), padding="SAME",
            dimension_numbers=("NHWC", "HWIO", "NHWC"))
        h = jnp.maximum(h + b, 0.0)
    feature_nchw = jnp.transpose(h, (0, 3, 1, 2))
    return jnp.concatenate([x_nchw, feature_nchw], axis=1)


if __name__ == "__main__":
    key = jax.random.PRNGKey(0)
    k_x, k_p = jax.random.split(key)

    in_channels, out_channels = 4, 8
    N, H, W = 2, 16, 16

    x = jax.random.normal(k_x, (N, in_channels, H, W), jnp.float32)
    params = init_params(k_p, in_channels, out_channels)

    y = jax.block_until_ready(feature_extraction_forward(x, params))
    assert y.shape == (N, in_channels + out_channels, H, W), y.shape

    y_ref = jax.block_until_ready(_reference_forward(x, params))
    assert jnp.allclose(y, y_ref, atol=1e-4, rtol=1e-4), \
        float(jnp.max(jnp.abs(y - y_ref)))

    print("KERNEL_OK")
</pallas_src>

<mosaic_0001>
module attributes {stable_mosaic.version = 11 : i64} {
  func.func @_fused_kernel(%arg0: i32, %arg1: memref<1x4x384xf32, #tpu.memory_space<vmem>>, %arg2: memref<9x32x4xf32, #tpu.memory_space<vmem>>, %arg3: memref<32x1xf32, #tpu.memory_space<vmem>>, %arg4: memref<9x32x32xf32, #tpu.memory_space<vmem>>, %arg5: memref<32x1xf32, #tpu.memory_space<vmem>>, %arg6: memref<9x8x32xf32, #tpu.memory_space<vmem>>, %arg7: memref<8x1xf32, #tpu.memory_space<vmem>>, %arg8: memref<1x384xf32, #tpu.memory_space<vmem>>, %arg9: memref<1x12x384xf32, #tpu.memory_space<vmem>>, %arg10: memref<32x640xf32, #tpu.memory_space<vmem>>) attributes {dimension_semantics = [#tpu.dimension_semantics<parallel>], iteration_bounds = array<i64: 2>, scalar_prefetch = 0 : i64, scratch_operands = 1 : i64, tpu.core_type = #tpu.core_type<tc>, window_params = [{transform_indices = @transform_0, window_bounds = array<i64: 1, 4, 384>}, {pipeline_mode = #tpu.pipeline_mode<synchronous>, transform_indices = @transform_1, window_bounds = array<i64: 9, 32, 4>}, {pipeline_mode = #tpu.pipeline_mode<synchronous>, transform_indices = @transform_2, window_bounds = array<i64: 32, 1>}, {pipeline_mode = #tpu.pipeline_mode<synchronous>, transform_indices = @transform_3, window_bounds = array<i64: 9, 32, 32>}, {pipeline_mode = #tpu.pipeline_mode<synchronous>, transform_indices = @transform_4, window_bounds = array<i64: 32, 1>}, {pipeline_mode = #tpu.pipeline_mode<synchronous>, transform_indices = @transform_5, window_bounds = array<i64: 9, 8, 32>}, {pipeline_mode = #tpu.pipeline_mode<synchronous>, transform_indices = @transform_6, window_bounds = array<i64: 8, 1>}, {pipeline_mode = #tpu.pipeline_mode<synchronous>, transform_indices = @transform_7, window_bounds = array<i64: 1, 384>}, {transform_indices = @transform_8, window_bounds = array<i64: 1, 12, 384>}]} {
    %cst = arith.constant 0.000000e+00 : f32
    %0 = vector.broadcast %cst : f32 to vector<32x128xf32>
    %c0 = arith.constant 0 : index
    %c0_0 = arith.constant 0 : index
    %1 = vector.load %arg10[%c0, %c0_0] : memref<32x640xf32, #tpu.memory_space<vmem>>, vector<32x128xf32>
    tpu.vector_store %arg10[%c0, %c0_0], %0 {strides = array<i32>} : memref<32x640xf32, #tpu.memory_space<vmem>>, vector<32x128xf32>,
    %cst_1 = arith.constant 0.000000e+00 : f32
    %2 = vector.broadcast %cst_1 : f32 to vector<32x128xf32>
    %c0_2 = arith.constant 0 : index
    %c512 = arith.constant 512 : index
    %3 = vector.load %arg10[%c0_2, %c512] : memref<32x640xf32, #tpu.memory_space<vmem>>, vector<32x128xf32>
    tpu.vector_store %arg10[%c0_2, %c512], %2 {strides = array<i32>} : memref<32x640xf32, #tpu.memory_space<vmem>>, vector<32x128xf32>,
    %c0_3 = arith.constant 0 : index
    %c0_4 = arith.constant 0 : index
    %4 = vector.load %arg8[%c0_3, %c0_4] : memref<1x384xf32, #tpu.memory_space<vmem>>, vector<1x384xf32>
    %c0_5 = arith.constant 0 : index
    %c0_6 = arith.constant 0 : index
    %c0_7 = arith.constant 0 : index
    %5 = vector.load %arg1[%c0_5, %c0_6, %c0_7] : memref<1x4x384xf32, #tpu.memory_space<vmem>>, vector<1x4x384xf32>
    %6 = vector.shape_cast %5 : vector<1x4x384xf32> to vector<4x384xf32>
    %c0_8 = arith.constant 0 : index
    %c128 = arith.constant 128 : index
    %7 = vector.load %arg10[%c0_8, %c128] : memref<32x640xf32, #tpu.memory_space<vmem>>, vector<4x384xf32>
    tpu.vector_store %arg10[%c0_8, %c128], %6 {strides = array<i32>} : memref<32x640xf32, #tpu.memory_space<vmem>>, vector<4x384xf32>,
    %c0_9 = arith.constant 0 : index
    %c109 = arith.constant 109 : index
    %8 = vector.load %arg10[%c0_9, %c109] : memref<32x640xf32, #tpu.memory_space<vmem>>, vector<4x384xf32>
    %c0_10 = arith.constant 0 : index
    %c0_11 = arith.constant 0 : index
    %c0_12 = arith.constant 0 : index
    %9 = vector.load %arg2[%c0_10, %c0_11, %c0_12] : memref<9x32x4xf32, #tpu.memory_space<vmem>>, vector<1x32x4xf32>
    %10 = vector.shape_cast %9 : vector<1x32x4xf32> to vector<32x4xf32>
    %cst_13 = arith.constant dense<0.000000e+00> : vector<32x384xf32>
    %11 = tpu.matmul %10, %8, %cst_13 {dimension_numbers = #tpu.dot_dimension_numbers<[1], [0], [0], [1], [0, 0, 1, 1], [], []>} : vector<32x4xf32>, vector<4x384xf32>, vector<32x384xf32> -> vector<32x384xf32>
    %c0_14 = arith.constant 0 : index
    %c110 = arith.constant 110 : index
    %12 = vector.load %arg10[%c0_14, %c110] : memref<32x640xf32, #tpu.memory_space<vmem>>, vector<4x384xf32>
    %c1 = arith.constant 1 : index
    %c0_15 = arith.constant 0 : index
    %c0_16 = arith.constant 0 : index
    %13 = vector.load %arg2[%c1, %c0_15, %c0_16] : memref<9x32x4xf32, #tpu.memory_space<vmem>>, vector<1x32x4xf32>
    %14 = vector.shape_cast %13 : vector<1x32x4xf32> to vector<32x4xf32>
    %cst_17 = arith.constant dense<0.000000e+00> : vector<32x384xf32>
    %15 = tpu.matmul %14, %12, %cst_17 {dimension_numbers = #tpu.dot_dimension_numbers<[1], [0], [0], [1], [0, 0, 1, 1], [], []>} : vector<32x4xf32>, vector<4x384xf32>, vector<32x384xf32> -> vector<32x384xf32>
    %16 = arith.addf %11, %15 : vector<32x384xf32>
    %c0_18 = arith.constant 0 : index
    %c111 = arith.constant 111 : index
    %17 = vector.load %arg10[%c0_18, %c111] : memref<32x640xf32, #tpu.memory_space<vmem>>, vector<4x384xf32>
    %c2 = arith.constant 2 : index
    %c0_19 = arith.constant 0 : index
    %c0_20 = arith.constant 0 : index
    %18 = vector.load %arg2[%c2, %c0_19, %c0_20] : memref<9x32x4xf32, #tpu.memory_space<vmem>>, vector<1x32x4xf32>
    %19 = vector.shape_cast %18 : vector<1x32x4xf32> to vector<32x4xf32>
    %cst_21 = arith.constant dense<0.000000e+00> : vector<32x384xf32>
    %20 = tpu.matmul %19, %17, %cst_21 {dimension_numbers = #tpu.dot_dimension_numbers<[1], [0], [0], [1], [0, 0, 1, 1], [], []>} : vector<32x4xf32>, vector<4x384xf32>, vector<32x384xf32> -> vector<32x384xf32>
    %21 = arith.addf %16, %20 : vector<32x384xf32>
    %c0_22 = arith.constant 0 : index
    %c127 = arith.constant 127 : index
    %22 = vector.load %arg10[%c0_22, %c127] : memref<32x640xf32, #tpu.memory_space<vmem>>, vector<4x384xf32>
    %c3 = arith.constant 3 : index
    %c0_23 = arith.constant 0 : index
    %c0_24 = arith.constant 0 : index
    %23 = vector.load %arg2[%c3, %c0_23, %c0_24] : memref<9x32x4xf32, #tpu.memory_space<vmem>>, vector<1x32x4xf32>
    %24 = vector.shape_cast %23 : vector<1x32x4xf32> to vector<32x4xf32>
    %cst_25 = arith.constant dense<0.000000e+00> : vector<32x384xf32>
    %25 = tpu.matmul %24, %22, %cst_25 {dimension_numbers = #tpu.dot_dimension_numbers<[1], [0], [0], [1], [0, 0, 1, 1], [], []>} : vector<32x4xf32>, vector<4x384xf32>, vector<32x384xf32> -> vector<32x384xf32>
    %26 = arith.addf %21, %25 : vector<32x384xf32>
    %c0_26 = arith.constant 0 : index
    %c128_27 = arith.constant 128 : index
    %27 = vector.load %arg10[%c0_26, %c128_27] : memref<32x640xf32, #tpu.memory_space<vmem>>, vector<4x384xf32>
    %c4 = arith.constant 4 : index
    %c0_28 = arith.constant 0 : index
    %c0_29 = arith.constant 0 : index
    %28 = vector.load %arg2[%c4, %c0_28, %c0_29] : memref<9x32x4xf32, #tpu.memory_space<vmem>>, vector<1x32x4xf32>
    %29 = vector.shape_cast %28 : vector<1x32x4xf32> to vector<32x4xf32>
    %cst_30 = arith.constant dense<0.000000e+00> : vector<32x384xf32>
    %30 = tpu.matmul %29, %27, %cst_30 {dimension_numbers = #tpu.dot_dimension_numbers<[1], [0], [0], [1], [0, 0, 1, 1], [], []>} : vector<32x4xf32>, vector<4x384xf32>, vector<32x384xf32> -> vector<32x384xf32>
    %31 = arith.addf %26, %30 : vector<32x384xf32>
    %c0_31 = arith.constant 0 : index
    %c129 = arith.constant 129 : index
    %32 = vector.load %arg10[%c0_31, %c129] : memref<32x640xf32, #tpu.memory_space<vmem>>, vector<4x384xf32>
    %c5 = arith.constant 5 : index
    %c0_32 = arith.constant 0 : index
    %c0_33 = arith.constant 0 : index
    %33 = vector.load %arg2[%c5, %c0_32, %c0_33] : memref<9x32x4xf32, #tpu.memory_space<vmem>>, vector<1x32x4xf32>
    %34 = vector.shape_cast %33 : vector<1x32x4xf32> to vector<32x4xf32>
    %cst_34 = arith.constant dense<0.000000e+00> : vector<32x384xf32>
    %35 = tpu.matmul %34, %32, %cst_34 {dimension_numbers = #tpu.dot_dimension_numbers<[1], [0], [0], [1], [0, 0, 1, 1], [], []>} : vector<32x4xf32>, vector<4x384xf32>, vector<32x384xf32> -> vector<32x384xf32>
    %36 = arith.addf %31, %35 : vector<32x384xf32>
    %c0_35 = arith.constant 0 : index
    %c145 = arith.constant 145 : index
    %37 = vector.load %arg10[%c0_35, %c145] : memref<32x640xf32, #tpu.memory_space<vmem>>, vector<4x384xf32>
    %c6 = arith.constant 6 : index
    %c0_36 = arith.constant 0 : index
    %c0_37 = arith.constant 0 : index
    %38 = vector.load %arg2[%c6, %c0_36, %c0_37] : memref<9x32x4xf32, #tpu.memory_space<vmem>>, vector<1x32x4xf32>
    %39 = vector.shape_cast %38 : vector<1x32x4xf32> to vector<32x4xf32>
    %cst_38 = arith.constant dense<0.000000e+00> : vector<32x384xf32>
    %40 = tpu.matmul %39, %37, %cst_38 {dimension_numbers = #tpu.dot_dimension_numbers<[1], [0], [0], [1], [0, 0, 1, 1], [], []>} : vector<32x4xf32>, vector<4x384xf32>, vector<32x384xf32> -> vector<32x384xf32>
    %41 = arith.addf %36, %40 : vector<32x384xf32>
    %c0_39 = arith.constant 0 : index
    %c146 = arith.constant 146 : index
    %42 = vector.load %arg10[%c0_39, %c146] : memref<32x640xf32, #tpu.memory_space<vmem>>, vector<4x384xf32>
    %c7 = arith.constant 7 : index
    %c0_40 = arith.constant 0 : index
    %c0_41 = arith.constant 0 : index
    %43 = vector.load %arg2[%c7, %c0_40, %c0_41] : memref<9x32x4xf32, #tpu.memory_space<vmem>>, vector<1x32x4xf32>
    %44 = vector.shape_cast %43 : vector<1x32x4xf32> to vector<32x4xf32>
    %cst_42 = arith.constant dense<0.000000e+00> : vector<32x384xf32>
    %45 = tpu.matmul %44, %42, %cst_42 {dimension_numbers = #tpu.dot_dimension_numbers<[1], [0], [0], [1], [0, 0, 1, 1], [], []>} : vector<32x4xf32>, vector<4x384xf32>, vector<32x384xf32> -> vector<32x384xf32>
    %46 = arith.addf %41, %45 : vector<32x384xf32>
    %c0_43 = arith.constant 0 : index
    %c147 = arith.constant 147 : index
    %47 = vector.load %arg10[%c0_43, %c147] : memref<32x640xf32, #tpu.memory_space<vmem>>, vector<4x384xf32>
    %c8 = arith.constant 8 : index
    %c0_44 = arith.constant 0 : index
    %c0_45 = arith.constant 0 : index
    %48 = vector.load %arg2[%c8, %c0_44, %c0_45] : memref<9x32x4xf32, #tpu.memory_space<vmem>>, vector<1x32x4xf32>
    %49 = vector.shape_cast %48 : vector<1x32x4xf32> to vector<32x4xf32>
    %cst_46 = arith.constant dense<0.000000e+00> : vector<32x384xf32>
    %50 = tpu.matmul %49, %47, %cst_46 {dimension_numbers = #tpu.dot_dimension_numbers<[1], [0], [0], [1], [0, 0, 1, 1], [], []>} : vector<32x4xf32>, vector<4x384xf32>, vector<32x384xf32> -> vector<32x384xf32>
    %51 = arith.addf %46, %50 : vector<32x384xf32>
    %c0_47 = arith.constant 0 : index
    %c0_48 = arith.constant 0 : index
    %52 = vector.load %arg3[%c0_47, %c0_48] : memref<32x1xf32, #tpu.memory_space<vmem>>, vector<32x1xf32>
    %53 = vector.broadcast %52 : vector<32x1xf32> to vector<32x384xf32>
    %54 = arith.addf %51, %53 : vector<32x384xf32>
    %cst_49 = arith.constant 0.000000e+00 : f32
    %55 = vector.broadcast %cst_49 : f32 to vector<32x384xf32>
    %56 = arith.maximumf %54, %55 : vector<32x384xf32>
    %57 = vector.broadcast %4 : vector<1x384xf32> to vector<32x384xf32>
    %58 = arith.mulf %56, %57 : vector<32x384xf32>
    %c0_50 = arith.constant 0 : index
    %c128_51 = arith.constant 128 : index
    %59 = vector.load %arg10[%c0_50, %c128_51] : memref<32x640xf32, #tpu.memory_space<vmem>>, vector<32x384xf32>
    tpu.vector_store %arg10[%c0_50, %c128_51], %58 {strides = array<i32>} : memref<32x640xf32, #tpu.memory_space<vmem>>, vector<32x384xf32>,
    %c0_52 = arith.constant 0 : index
    %c109_53 = arith.constant 109 : index
    %60 = vector.load %arg10[%c0_52, %c109_53] : memref<32x640xf32, #tpu.memory_space<vmem>>, vector<32x384xf32>
    %c0_54 = arith.constant 0 : index
    %c0_55 = arith.constant 0 : index
    %c0_56 = arith.constant 0 : index
    %61 = vector.load %arg4[%c0_54, %c0_55, %c0_56] : memref<9x32x32xf32, #tpu.memory_space<vmem>>, vector<1x32x32xf32>
    %62 = vector.shape_cast %61 : vector<1x32x32xf32> to vector<32x32xf32>
    %cst_57 = arith.constant dense<0.000000e+00> : vector<32x384xf32>
    %63 = tpu.matmul %62, %60, %cst_57 {dimension_numbers = #tpu.dot_dimension_numbers<[1], [0], [0], [1], [0, 0, 1, 1], [], []>} : vector<32x32xf32>, vector<32x384xf32>, vector<32x384xf32> -> vector<32x384xf32>
    %c0_58 = arith.constant 0 : index
    %c110_59 = arith.constant 110 : index
    %64 = vector.load %arg10[%c0_58, %c110_59] : memref<32x640xf32, #tpu.memory_space<vmem>>, vector<32x384xf32>
    %c1_60 = arith.constant 1 : index
    %c0_61 = arith.constant 0 : index
    %c0_62 = arith.constant 0 : index
    %65 = vector.load %arg4[%c1_60, %c0_61, %c0_62] : memref<9x32x32xf32, #tpu.memory_space<vmem>>, vector<1x32x32xf32>
    %66 = vector.shape_cast %65 : vector<1x32x32xf32> to vector<32x32xf32>
    %cst_63 = arith.constant dense<0.000000e+00> : vector<32x384xf32>
    %67 = tpu.matmul %66, %64, %cst_63 {dimension_numbers = #tpu.dot_dimension_numbers<[1], [0], [0], [1], [0, 0, 1, 1], [], []>} : vector<32x32xf32>, vector<32x384xf32>, vector<32x384xf32> -> vector<32x384xf32>
    %68 = arith.addf %63, %67 : vector<32x384xf32>
    %c0_64 = arith.constant 0 : index
    %c111_65 = arith.constant 111 : index
    %69 = vector.load %arg10[%c0_64, %c111_65] : memref<32x640xf32, #tpu.memory_space<vmem>>, vector<32x384xf32>
    %c2_66 = arith.constant 2 : index
    %c0_67 = arith.constant 0 : index
    %c0_68 = arith.constant 0 : index
    %70 = vector.load %arg4[%c2_66, %c0_67, %c0_68] : memref<9x32x32xf32, #tpu.memory_space<vmem>>, vector<1x32x32xf32>
    %71 = vector.shape_cast %70 : vector<1x32x32xf32> to vector<32x32xf32>
    %cst_69 = arith.constant dense<0.000000e+00> : vector<32x384xf32>
    %72 = tpu.matmul %71, %69, %cst_69 {dimension_numbers = #tpu.dot_dimension_numbers<[1], [0], [0], [1], [0, 0, 1, 1], [], []>} : vector<32x32xf32>, vector<32x384xf32>, vector<32x384xf32> -> vector<32x384xf32>
    %73 = arith.addf %68, %72 : vector<32x384xf32>
    %c0_70 = arith.constant 0 : index
    %c127_71 = arith.constant 127 : index
    %74 = vector.load %arg10[%c0_70, %c127_71] : memref<32x640xf32, #tpu.memory_space<vmem>>, vector<32x384xf32>
    %c3_72 = arith.constant 3 : index
    %c0_73 = arith.constant 0 : index
    %c0_74 = arith.constant 0 : index
    %75 = vector.load %arg4[%c3_72, %c0_73, %c0_74] : memref<9x32x32xf32, #tpu.memory_space<vmem>>, vector<1x32x32xf32>
    %76 = vector.shape_cast %75 : vector<1x32x32xf32> to vector<32x32xf32>
    %cst_75 = arith.constant dense<0.000000e+00> : vector<32x384xf32>
    %77 = tpu.matmul %76, %74, %cst_75 {dimension_numbers = #tpu.dot_dimension_numbers<[1], [0], [0], [1], [0, 0, 1, 1], [], []>} : vector<32x32xf32>, vector<32x384xf32>, vector<32x384xf32> -> vector<32x384xf32>
    %78 = arith.addf %73, %77 : vector<32x384xf32>
    %c0_76 = arith.constant 0 : index
    %c128_77 = arith.constant 128 : index
    %79 = vector.load %arg10[%c0_76, %c128_77] : memref<32x640xf32, #tpu.memory_space<vmem>>, vector<32x384xf32>
    %c4_78 = arith.constant 4 : index
    %c0_79 = arith.constant 0 : index
    %c0_80 = arith.constant 0 : index
    %80 = vector.load %arg4[%c4_78, %c0_79, %c0_80] : memref<9x32x32xf32, #tpu.memory_space<vmem>>, vector<1x32x32xf32>
    %81 = vector.shape_cast %80 : vector<1x32x32xf32> to vector<32x32xf32>
    %cst_81 = arith.constant dense<0.000000e+00> : vector<32x384xf32>
    %82 = tpu.matmul %81, %79, %cst_81 {dimension_numbers = #tpu.dot_dimension_numbers<[1], [0], [0], [1], [0, 0, 1, 1], [], []>} : vector<32x32xf32>, vector<32x384xf32>, vector<32x384xf32> -> vector<32x384xf32>
    %83 = arith.addf %78, %82 : vector<32x384xf32>
    %c0_82 = arith.constant 0 : index
    %c129_83 = arith.constant 129 : index
    %84 = vector.load %arg10[%c0_82, %c129_83] : memref<32x640xf32, #tpu.memory_space<vmem>>, vector<32x384xf32>
    %c5_84 = arith.constant 5 : index
    %c0_85 = arith.constant 0 : index
    %c0_86 = arith.constant 0 : index
    %85 = vector.load %arg4[%c5_84, %c0_85, %c0_86] : memref<9x32x32xf32, #tpu.memory_space<vmem>>, vector<1x32x32xf32>
    %86 = vector.shape_cast %85 : vector<1x32x32xf32> to vector<32x32xf32>
    %cst_87 = arith.constant dense<0.000000e+00> : vector<32x384xf32>
    %87 = tpu.matmul %86, %84, %cst_87 {dimension_numbers = #tpu.dot_dimension_numbers<[1], [0], [0], [1], [0, 0, 1, 1], [], []>} : vector<32x32xf32>, vector<32x384xf32>, vector<32x384xf32> -> vector<32x384xf32>
    %88 = arith.addf %83, %87 : vector<32x384xf32>
    %c0_88 = arith.constant 0 : index
    %c145_89 = arith.constant 145 : index
    %89 = vector.load %arg10[%c0_88, %c145_89] : memref<32x640xf32, #tpu.memory_space<vmem>>, vector<32x384xf32>
    %c6_90 = arith.constant 6 : index
    %c0_91 = arith.constant 0 : index
    %c0_92 = arith.constant 0 : index
    %90 = vector.load %arg4[%c6_90, %c0_91, %c0_92] : memref<9x32x32xf32, #tpu.memory_space<vmem>>, vector<1x32x32xf32>
    %91 = vector.shape_cast %90 : vector<1x32x32xf32> to vector<32x32xf32>
    %cst_93 = arith.constant dense<0.000000e+00> : vector<32x384xf32>
    %92 = tpu.matmul %91, %89, %cst_93 {dimension_numbers = #tpu.dot_dimension_numbers<[1], [0], [0], [1], [0, 0, 1, 1], [], []>} : vector<32x32xf32>, vector<32x384xf32>, vector<32x384xf32> -> vector<32x384xf32>
    %93 = arith.addf %88, %92 : vector<32x384xf32>
    %c0_94 = arith.constant 0 : index
    %c146_95 = arith.constant 146 : index
    %94 = vector.load %arg10[%c0_94, %c146_95] : memref<32x640xf32, #tpu.memory_space<vmem>>, vector<32x384xf32>
    %c7_96 = arith.constant 7 : index
    %c0_97 = arith.constant 0 : index
    %c0_98 = arith.constant 0 : index
    %95 = vector.load %arg4[%c7_96, %c0_97, %c0_98] : memref<9x32x32xf32, #tpu.memory_space<vmem>>, vector<1x32x32xf32>
    %96 = vector.shape_cast %95 : vector<1x32x32xf32> to vector<32x32xf32>
    %cst_99 = arith.constant dense<0.000000e+00> : vector<32x384xf32>
    %97 = tpu.matmul %96, %94, %cst_99 {dimension_numbers = #tpu.dot_dimension_numbers<[1], [0], [0], [1], [0, 0, 1, 1], [], []>} : vector<32x32xf32>, vector<32x384xf32>, vector<32x384xf32> -> vector<32x384xf32>
    %98 = arith.addf %93, %97 : vector<32x384xf32>
    %c0_100 = arith.constant 0 : index
    %c147_101 = arith.constant 147 : index
    %99 = vector.load %arg10[%c0_100, %c147_101] : memref<32x640xf32, #tpu.memory_space<vmem>>, vector<32x384xf32>
    %c8_102 = arith.constant 8 : index
    %c0_103 = arith.constant 0 : index
    %c0_104 = arith.constant 0 : index
    %100 = vector.load %arg4[%c8_102, %c0_103, %c0_104] : memref<9x32x32xf32, #tpu.memory_space<vmem>>, vector<1x32x32xf32>
    %101 = vector.shape_cast %100 : vector<1x32x32xf32> to vector<32x32xf32>
    %cst_105 = arith.constant dense<0.000000e+00> : vector<32x384xf32>
    %102 = tpu.matmul %101, %99, %cst_105 {dimension_numbers = #tpu.dot_dimension_numbers<[1], [0], [0], [1], [0, 0, 1, 1], [], []>} : vector<32x32xf32>, vector<32x384xf32>, vector<32x384xf32> -> vector<32x384xf32>
    %103 = arith.addf %98, %102 : vector<32x384xf32>
    %c0_106 = arith.constant 0 : index
    %c0_107 = arith.constant 0 : index
    %104 = vector.load %arg5[%c0_106, %c0_107] : memref<32x1xf32, #tpu.memory_space<vmem>>, vector<32x1xf32>
    %105 = vector.broadcast %104 : vector<32x1xf32> to vector<32x384xf32>
    %106 = arith.addf %103, %105 : vector<32x384xf32>
    %cst_108 = arith.constant 0.000000e+00 : f32
    %107 = vector.broadcast %cst_108 : f32 to vector<32x384xf32>
    %108 = arith.maximumf %106, %107 : vector<32x384xf32>
    %109 = vector.broadcast %4 : vector<1x384xf32> to vector<32x384xf32>
    %110 = arith.mulf %108, %109 : vector<32x384xf32>
    %c0_109 = arith.constant 0 : index
    %c128_110 = arith.constant 128 : index
    %111 = vector.load %arg10[%c0_109, %c128_110] : memref<32x640xf32, #tpu.memory_space<vmem>>, vector<32x384xf32>
    tpu.vector_store %arg10[%c0_109, %c128_110], %110 {strides = array<i32>} : memref<32x640xf32, #tpu.memory_space<vmem>>, vector<32x384xf32>,
    %c0_111 = arith.constant 0 : index
    %c109_112 = arith.constant 109 : index
    %112 = vector.load %arg10[%c0_111, %c109_112] : memref<32x640xf32, #tpu.memory_space<vmem>>, vector<32x384xf32>
    %c0_113 = arith.constant 0 : index
    %c0_114 = arith.constant 0 : index
    %c0_115 = arith.constant 0 : index
    %113 = vector.load %arg6[%c0_113, %c0_114, %c0_115] : memref<9x8x32xf32, #tpu.memory_space<vmem>>, vector<1x8x32xf32>
    %114 = vector.shape_cast %113 : vector<1x8x32xf32> to vector<8x32xf32>
    %cst_116 = arith.constant dense<0.000000e+00> : vector<8x384xf32>
    %115 = tpu.matmul %114, %112, %cst_116 {dimension_numbers = #tpu.dot_dimension_numbers<[1], [0], [0], [1], [0, 0, 1, 1], [], []>} : vector<8x32xf32>, vector<32x384xf32>, vector<8x384xf32> -> vector<8x384xf32>
    %c0_117 = arith.constant 0 : index
    %c110_118 = arith.constant 110 : index
    %116 = vector.load %arg10[%c0_117, %c110_118] : memref<32x640xf32, #tpu.memory_space<vmem>>, vector<32x384xf32>
    %c1_119 = arith.constant 1 : index
    %c0_120 = arith.constant 0 : index
    %c0_121 = arith.constant 0 : index
    %117 = vector.load %arg6[%c1_119, %c0_120, %c0_121] : memref<9x8x32xf32, #tpu.memory_space<vmem>>, vector<1x8x32xf32>
    %118 = vector.shape_cast %117 : vector<1x8x32xf32> to vector<8x32xf32>
    %cst_122 = arith.constant dense<0.000000e+00> : vector<8x384xf32>
    %119 = tpu.matmul %118, %116, %cst_122 {dimension_numbers = #tpu.dot_dimension_numbers<[1], [0], [0], [1], [0, 0, 1, 1], [], []>} : vector<8x32xf32>, vector<32x384xf32>, vector<8x384xf32> -> vector<8x384xf32>
    %120 = arith.addf %115, %119 : vector<8x384xf32>
    %c0_123 = arith.constant 0 : index
    %c111_124 = arith.constant 111 : index
    %121 = vector.load %arg10[%c0_123, %c111_124] : memref<32x640xf32, #tpu.memory_space<vmem>>, vector<32x384xf32>
    %c2_125 = arith.constant 2 : index
    %c0_126 = arith.constant 0 : index
    %c0_127 = arith.constant 0 : index
    %122 = vector.load %arg6[%c2_125, %c0_126, %c0_127] : memref<9x8x32xf32, #tpu.memory_space<vmem>>, vector<1x8x32xf32>
    %123 = vector.shape_cast %122 : vector<1x8x32xf32> to vector<8x32xf32>
    %cst_128 = arith.constant dense<0.000000e+00> : vector<8x384xf32>
    %124 = tpu.matmul %123, %121, %cst_128 {dimension_numbers = #tpu.dot_dimension_numbers<[1], [0], [0], [1], [0, 0, 1, 1], [], []>} : vector<8x32xf32>, vector<32x384xf32>, vector<8x384xf32> -> vector<8x384xf32>
    %125 = arith.addf %120, %124 : vector<8x384xf32>
    %c0_129 = arith.constant 0 : index
    %c127_130 = arith.constant 127 : index
    %126 = vector.load %arg10[%c0_129, %c127_130] : memref<32x640xf32, #tpu.memory_space<vmem>>, vector<32x384xf32>
    %c3_131 = arith.constant 3 : index
    %c0_132 = arith.constant 0 : index
    %c0_133 = arith.constant 0 : index
    %127 = vector.load %arg6[%c3_131, %c0_132, %c0_133] : memref<9x8x32xf32, #tpu.memory_space<vmem>>, vector<1x8x32xf32>
    %128 = vector.shape_cast %127 : vector<1x8x32xf32> to vector<8x32xf32>
    %cst_134 = arith.constant dense<0.000000e+00> : vector<8x384xf32>
    %129 = tpu.matmul %128, %126, %cst_134 {dimension_numbers = #tpu.dot_dimension_numbers<[1], [0], [0], [1], [0, 0, 1, 1], [], []>} : vector<8x32xf32>, vector<32x384xf32>, vector<8x384xf32> -> vector<8x384xf32>
    %130 = arith.addf %125, %129 : vector<8x384xf32>
    %c0_135 = arith.constant 0 : index
    %c128_136 = arith.constant 128 : index
    %131 = vector.load %arg10[%c0_135, %c128_136] : memref<32x640xf32, #tpu.memory_space<vmem>>, vector<32x384xf32>
    %c4_137 = arith.constant 4 : index
    %c0_138 = arith.constant 0 : index
    %c0_139 = arith.constant 0 : index
    %132 = vector.load %arg6[%c4_137, %c0_138, %c0_139] : memref<9x8x32xf32, #tpu.memory_space<vmem>>, vector<1x8x32xf32>
    %133 = vector.shape_cast %132 : vector<1x8x32xf32> to vector<8x32xf32>
    %cst_140 = arith.constant dense<0.000000e+00> : vector<8x384xf32>
    %134 = tpu.matmul %133, %131, %cst_140 {dimension_numbers = #tpu.dot_dimension_numbers<[1], [0], [0], [1], [0, 0, 1, 1], [], []>} : vector<8x32xf32>, vector<32x384xf32>, vector<8x384xf32> -> vector<8x384xf32>
    %135 = arith.addf %130, %134 : vector<8x384xf32>
    %c0_141 = arith.constant 0 : index
    %c129_142 = arith.constant 129 : index
    %136 = vector.load %arg10[%c0_141, %c129_142] : memref<32x640xf32, #tpu.memory_space<vmem>>, vector<32x384xf32>
    %c5_143 = arith.constant 5 : index
    %c0_144 = arith.constant 0 : index
    %c0_145 = arith.constant 0 : index
    %137 = vector.load %arg6[%c5_143, %c0_144, %c0_145] : memref<9x8x32xf32, #tpu.memory_space<vmem>>, vector<1x8x32xf32>
    %138 = vector.shape_cast %137 : vector<1x8x32xf32> to vector<8x32xf32>
    %cst_146 = arith.constant dense<0.000000e+00> : vector<8x384xf32>
    %139 = tpu.matmul %138, %136, %cst_146 {dimension_numbers = #tpu.dot_dimension_numbers<[1], [0], [0], [1], [0, 0, 1, 1], [], []>} : vector<8x32xf32>, vector<32x384xf32>, vector<8x384xf32> -> vector<8x384xf32>
    %140 = arith.addf %135, %139 : vector<8x384xf32>
    %c0_147 = arith.constant 0 : index
    %c145_148 = arith.constant 145 : index
    %141 = vector.load %arg10[%c0_147, %c145_148] : memref<32x640xf32, #tpu.memory_space<vmem>>, vector<32x384xf32>
    %c6_149 = arith.constant 6 : index
    %c0_150 = arith.constant 0 : index
    %c0_151 = arith.constant 0 : index
    %142 = vector.load %arg6[%c6_149, %c0_150, %c0_151] : memref<9x8x32xf32, #tpu.memory_space<vmem>>, vector<1x8x32xf32>
    %143 = vector.shape_cast %142 : vector<1x8x32xf32> to vector<8x32xf32>
    %cst_152 = arith.constant dense<0.000000e+00> : vector<8x384xf32>
    %144 = tpu.matmul %143, %141, %cst_152 {dimension_numbers = #tpu.dot_dimension_numbers<[1], [0], [0], [1], [0, 0, 1, 1], [], []>} : vector<8x32xf32>, vector<32x384xf32>, vector<8x384xf32> -> vector<8x384xf32>
    %145 = arith.addf %140, %144 : vector<8x384xf32>
    %c0_153 = arith.constant 0 : index
    %c146_154 = arith.constant 146 : index
    %146 = vector.load %arg10[%c0_153, %c146_154] : memref<32x640xf32, #tpu.memory_space<vmem>>, vector<32x384xf32>
    %c7_155 = arith.constant 7 : index
    %c0_156 = arith.constant 0 : index
    %c0_157 = arith.constant 0 : index
    %147 = vector.load %arg6[%c7_155, %c0_156, %c0_157] : memref<9x8x32xf32, #tpu.memory_space<vmem>>, vector<1x8x32xf32>
    %148 = vector.shape_cast %147 : vector<1x8x32xf32> to vector<8x32xf32>
    %cst_158 = arith.constant dense<0.000000e+00> : vector<8x384xf32>
    %149 = tpu.matmul %148, %146, %cst_158 {dimension_numbers = #tpu.dot_dimension_numbers<[1], [0], [0], [1], [0, 0, 1, 1], [], []>} : vector<8x32xf32>, vector<32x384xf32>, vector<8x384xf32> -> vector<8x384xf32>
    %150 = arith.addf %145, %149 : vector<8x384xf32>
    %c0_159 = arith.constant 0 : index
    %c147_160 = arith.constant 147 : index
    %151 = vector.load %arg10[%c0_159, %c147_160] : memref<32x640xf32, #tpu.memory_space<vmem>>, vector<32x384xf32>
    %c8_161 = arith.constant 8 : index
    %c0_162 = arith.constant 0 : index
    %c0_163 = arith.constant 0 : index
    %152 = vector.load %arg6[%c8_161, %c0_162, %c0_163] : memref<9x8x32xf32, #tpu.memory_space<vmem>>, vector<1x8x32xf32>
    %153 = vector.shape_cast %152 : vector<1x8x32xf32> to vector<8x32xf32>
    %cst_164 = arith.constant dense<0.000000e+00> : vector<8x384xf32>
    %154 = tpu.matmul %153, %151, %cst_164 {dimension_numbers = #tpu.dot_dimension_numbers<[1], [0], [0], [1], [0, 0, 1, 1], [], []>} : vector<8x32xf32>, vector<32x384xf32>, vector<8x384xf32> -> vector<8x384xf32>
    %155 = arith.addf %150, %154 : vector<8x384xf32>
    %c0_165 = arith.constant 0 : index
    %c0_166 = arith.constant 0 : index
    %156 = vector.load %arg7[%c0_165, %c0_166] : memref<8x1xf32, #tpu.memory_space<vmem>>, vector<8x1xf32>
    %157 = vector.broadcast %156 : vector<8x1xf32> to vector<8x384xf32>
    %158 = arith.addf %155, %157 : vector<8x384xf32>
    %cst_167 = arith.constant 0.000000e+00 : f32
    %159 = vector.broadcast %cst_167 : f32 to vector<8x384xf32>
    %160 = arith.maximumf %158, %159 : vector<8x384xf32>
    %c0_168 = arith.constant 0 : index
    %c0_169 = arith.constant 0 : index
    %c0_170 = arith.constant 0 : index
    %161 = vector.load %arg9[%c0_168, %c0_169, %c0_170] : memref<1x12x384xf32, #tpu.memory_space<vmem>>, vector<1x4x384xf32>
    %162 = vector.shape_cast %161 : vector<1x4x384xf32> to vector<4x384xf32>
    %163 = vector.shape_cast %6 : vector<4x384xf32> to vector<1x4x384xf32>
    tpu.vector_store %arg9[%c0_168, %c0_169, %c0_170], %163 {strides = array<i32>} : memref<1x12x384xf32, #tpu.memory_space<vmem>>, vector<1x4x384xf32>,
    %c0_171 = arith.constant 0 : index
    %c4_172 = arith.constant 4 : index
    %c0_173 = arith.constant 0 : index
    %164 = vector.load %arg9[%c0_171, %c4_172, %c0_173] : memref<1x12x384xf32, #tpu.memory_space<vmem>>, vector<1x8x384xf32>
    %165 = vector.shape_cast %164 : vector<1x8x384xf32> to vector<8x384xf32>
    %166 = vector.shape_cast %160 : vector<8x384xf32> to vector<1x8x384xf32>
    tpu.vector_store %arg9[%c0_171, %c4_172, %c0_173], %166 {strides = array<i32>} : memref<1x12x384xf32, #tpu.memory_space<vmem>>, vector<1x8x384xf32>,
    return
  }
  func.func @transform_0(%arg0: i32) -> (i32, i32, i32) {
    %c0_i32 = arith.constant 0 : i32
    %c0_i32_0 = arith.constant 0 : i32
    %c0_i32_1 = arith.constant 0 : i32
    return %arg0, %c0_i32, %c0_i32_0 : i32, i32, i32
  }
  func.func @transform_1(%arg0: i32) -> (i32, i32, i32) {
    %c0_i32 = arith.constant 0 : i32
    %c0_i32_0 = arith.constant 0 : i32
    %c0_i32_1 = arith.constant 0 : i32
    %c0_i32_2 = arith.constant 0 : i32
    return %c0_i32, %c0_i32_0, %c0_i32_1 : i32, i32, i32
  }
  func.func @transform_2(%arg0: i32) -> (i32, i32) {
    %c0_i32 = arith.constant 0 : i32
    %c0_i32_0 = arith.constant 0 : i32
    %c0_i32_1 = arith.constant 0 : i32
    return %c0_i32, %c0_i32_0 : i32, i32
  }
  func.func @transform_3(%arg0: i32) -> (i32, i32, i32) {
    %c0_i32 = arith.constant 0 : i32
    %c0_i32_0 = arith.constant 0 : i32
    %c0_i32_1 = arith.constant 0 : i32
    %c0_i32_2 = arith.constant 0 : i32
    return %c0_i32, %c0_i32_0, %c0_i32_1 : i32, i32, i32
  }
  func.func @transform_4(%arg0: i32) -> (i32, i32) {
    %c0_i32 = arith.constant 0 : i32
    %c0_i32_0 = arith.constant 0 : i32
    %c0_i32_1 = arith.constant 0 : i32
    return %c0_i32, %c0_i32_0 : i32, i32
  }
  func.func @transform_5(%arg0: i32) -> (i32, i32, i32) {
    %c0_i32 = arith.constant 0 : i32
    %c0_i32_0 = arith.constant 0 : i32
    %c0_i32_1 = arith.constant 0 : i32
    %c0_i32_2 = arith.constant 0 : i32
    return %c0_i32, %c0_i32_0, %c0_i32_1 : i32, i32, i32
  }
  func.func @transform_6(%arg0: i32) -> (i32, i32) {
    %c0_i32 = arith.constant 0 : i32
    %c0_i32_0 = arith.constant 0 : i32
    %c0_i32_1 = arith.constant 0 : i32
    return %c0_i32, %c0_i32_0 : i32, i32
  }
  func.func @transform_7(%arg0: i32) -> (i32, i32) {
    %c0_i32 = arith.constant 0 : i32
    %c0_i32_0 = arith.constant 0 : i32
    %c0_i32_1 = arith.constant 0 : i32
    return %c0_i32, %c0_i32_0 : i32, i32
  }
  func.func @transform_8(%arg0: i32) -> (i32, i32, i32) {
    %c0_i32 = arith.constant 0 : i32
    %c0_i32_0 = arith.constant 0 : i32
    %c0_i32_1 = arith.constant 0 : i32
    return %arg0, %c0_i32, %c0_i32_0 : i32, i32, i32
  }
}

</mosaic_0001>

<bundles_post_ra>
// kernel: feature_extraction_forward.1
= control target key start
LH: loop header
LB: loop body
LE: loop exit
PB: predicated region body
PF: predicated region fallthrough
CT: control target
= control target key end

     0   :  { %s5491_s27 = smov 0   ;;  %s7722_s0 = inlined_call_operand.vmem [shape: f32[2,4,384], index: 0, kind: input, shape index: {}]   ;;  %s7723_s1 = inlined_call_operand.vmem [shape: f32[9,32,4], index: 1, kind: input, shape index: {}]   ;;  %s7724_s2 = inlined_call_operand.vmem [shape: f32[32,1], index: 2, kind: input, shape index: {}]   ;;  %s7725_s3 = inlined_call_operand.vmem [shape: f32[9,32,32], index: 3, kind: input, shape index: {}]   ;;  %s7726_s4 = inlined_call_operand.vmem [shape: f32[32,1], index: 4, kind: input, shape index: {}]   ;;  %s7727_s5 = inlined_call_operand.vmem [shape: f32[9,8,32], index: 5, kind: input, shape index: {}]   ;;  %s7728_s6 = inlined_call_operand.vmem [shape: f32[8,1], index: 6, kind: input, shape index: {}]   ;;  %s7729_s7 = inlined_call_operand.vmem [shape: f32[1,384], index: 7, kind: input, shape index: {}]   ;;  %s7730_s8 = inlined_call_operand.vmem [shape: f32[2,12,384], index: 8, kind: output, shape index: {}]  }
   0x1 LB: > { %s4412_s28 = sadd.s32 4294967295, %s5434_s27   ;;  %p4416_p0 = scmp.ge.s32.totalorder %s5434_s27, 1  ;;  %s5434_s27 = sphi %s5491_s27, %s18_s27  }
   0x2   : > { %p262_p1 = scmp.lt.s32.totalorder %s5434_s27, 3 }
   0x4   : > { %p263_p2 = pnand %p4416_p0, %p262_p1 }
   0x6   : > { %266 = sbr.rel (%p263_p2) target bundleno = 1400 (0x578), region = 52 }
   0xb   : > { %p296_p3 = scmp.lt.s32.totalorder %s4412_s28, 1  ;;  %v7731_v0 = vmov 0.0   ;;  %s5437_s11 = smov 18   ;;  %vm356_vm0 = vcmask 146432   ;;  %vm373_vm1 = vcmask 1043456   ;;  %v4419_v19 = vld [vmem:[%s7723_s1 + $0x20] sm:$0xff] }
   0xc   : > { %306 = vst [vmem:[#allocation2] sm:$0xff] %v7731_v0  ;;  %s5438_s12 = smov 19   ;;  %s5439_s13 = smov 17   ;;  %vm360_vm2 = vcmask 31744   ;;  %vm475_vm3 = vcmask 154624   ;;  %v4420_v26 = vld [vmem:[%s7723_s1 + $0x28] sm:$0xff] }
   0xd   : > { %s7879_s28 = smov (!%p296_p3, %s4412_s28), 1  ;;  %310 = vst [vmem:[#allocation2 + $0x70] sm:$0xff] %v7731_v0  ;;  %s5440_s14 = smov 1   ;;  %v335_v28 = vld [vmem:[%s7723_s1] sm:$0xff]  ;;  %vm597_vm4 = vcmask 138240   ;;  %v4421_v31 = vld [vmem:[%s7723_s1 + $0x30] sm:$0xff] }
   0xe   : > { %s4763_s29 = smul.u32 12, %s7879_s28  ;;  %s5441_s15 = smov 127   ;;  %v336_v34 = vld [vmem:[%s7723_s1 + $0x8] sm:$0xff]  ;;  %v4422_v38 = vld [vmem:[%s7723_s1 + $0x38] sm:$0xff]  ;;  %v337_v42 = vld [vmem:[%s7723_s1 + $0x10] sm:$0xff]  ;;  %vm731_vm5 = vcmask 7168  }
   0xf   : > { %s5442_s16 = smov 111   ;;  %s5443_s17 = smov 110   ;;  %v338_v48 = vld [vmem:[%s7723_s1 + $0x18] sm:$0xff]  ;;  %v4453_v50 = vld [vmem:[%s7723_s1 + $0x40] sm:$0xff]  ;;  %v4454_v51 = vld [vmem:[%s7723_s1 + $0x48] sm:$0xff]  ;;  %vm995_vm6 = vcmask 1039360  }
  0x10   : > { %s300_s10 = scalar_lea.vmem %s7722_s0, %s4763_s29  ;;  %s5444_s18 = smov 109   ;;  %v4455_v52 = vld [vmem:[%s7723_s1 + $0x50] sm:$0xff]  ;;  %v4456_v53 = vld [vmem:[%s7723_s1 + $0x58] sm:$0xff]  ;;  %v4472_v54 = vld [vmem:[%s7723_s1 + $0x60] sm:$0xff]  ;;  %vm1129_vm7 = vcmask 908288   ;;  %vm1263_vm8 = vcmask 900096  }
  0x11   : > { %v315_v1 = vld [vmem:[%s300_s10] sm:$0xff]  ;;  %v316_v2 = vld [vmem:[%s300_s10 + $0x8] sm:$0xf]  ;;  %v4474_v59 = vld [vmem:[%s7723_s1 + $0x70] sm:$0xff]  ;;  %vm1397_vm9 = vcmask 891904   ;;  %vm1694_vm10 = vcmask 261120  }
  0x12   : > { %319 = vst [vmem:[#allocation1] ss:$2 sm:$0xff] %v315_v1  ;;  %v4473_v58 = vld [vmem:[%s7723_s1 + $0x68] sm:$0xff]  ;;  %v4475_v63 = vld [vmem:[%s7723_s1 + $0x78] sm:$0xff] }
  0x13   : > { %v331_v3 = vld [vmem:[#allocation2] sm:$0xf]  ;;  %321 = vst [vmem:[#allocation1 + $0x10] ss:$2 sm:$0xff] %v316_v2 }
  0x14   : > { %348 = vrot.lane.b32.xlu0 %v331_v3, %s5437_s11  ;;  %v977_v12 = vld [vmem:[#allocation2 + $0x70] sm:$0xf] }
  0x19   : > { %v323_v4 = vld.sshfl [vmem:[#allocation1 + $0x8] sm:$0xff pattern:$0x75316420]  ;;  %v322_v5 = vld.sshfl [vmem:[#allocation1] sm:$0xff pattern:$0x75316420] }
  0x1a   : > { %329 = vst [vmem:[#allocation2 + $0x80] sm:$0xf] %v323_v4  ;;  %v324_v6 = vld.sshfl [vmem:[#allocation1 + $0x10] sm:$0xff pattern:$0x75316420] }
  0x1b   : > { %328 = vst [vmem:[#allocation2 + $0x28] sm:$0xf] %v322_v5 }
  0x1c   : > { %4330 = vst [vmem:[#allocation1] ss:$2 sm:$0xff] %v315_v1 }
  0x1d   : > { %330 = vst [vmem:[#allocation2 + $0x48] sm:$0xf] %v324_v6 }
  0x1e   : > { %4332 = vst [vmem:[#allocation1 + $0x10] ss:$2 sm:$0xff] %v316_v2 }
  0x21   : > { %v5508_v7 = vld [vmem:[#allocation2 + $0x80] sm:$0xf] }
  0x22   : > { %352 = vrot.lane.b32.xlu1 %v5508_v7, %s5437_s11  ;;  %v5512_v8 = vld [vmem:[#allocation2 + $0x28] sm:$0xf]  ;;  %v975_v10 = vld [vmem:[#allocation2 + $0x80] sm:$0xf] }
  0x23   : > { %350 = vrot.lane.b32.xlu0 %v5512_v8, %s5437_s11  ;;  %469 = vrot.lane.b32.xlu2 %v5512_v8, %s5438_s12  ;;  %v974_v11 = vld [vmem:[#allocation2 + $0x28] sm:$0xf] }
  0x24   : > { %v5518_v9 = vld [vmem:[#allocation2 + $0x48] sm:$0xf] }
  0x25   : > { %v976_v13 = vld [vmem:[#allocation2 + $0x48] sm:$0xf] }
  0x2a   : > { %354 = vrot.lane.b32.xlu1 %v5518_v9, %s5437_s11 }
  0x2b   : > { %467 = vrot.lane.b32.xlu0 %v331_v3, %s5438_s12  ;;  %471 = vrot.lane.b32.xlu2 %v5508_v7, %s5438_s12 }
  0x32   : > { %589 = vrot.lane.b32.xlu1 %v331_v3, %s5439_s13 }
  0x33   : > { %473 = vrot.lane.b32.xlu0 %v5518_v9, %s5438_s12  ;;  %591 = vrot.lane.b32.xlu2 %v5512_v8, %s5439_s13 }
  0x3a   : > { %593 = vrot.lane.b32.xlu1 %v5508_v7, %s5439_s13 }
  0x3b   : > { %725 = vrot.lane.b32.xlu0 %v5512_v8, %s5440_s14  ;;  %595 = vrot.lane.b32.xlu2 %v5518_v9, %s5439_s13 }
  0x42   : > { %727 = vrot.lane.b32.xlu1 %v5508_v7, %s5440_s14 }
  0x43   : > { %729 = vrot.lane.b32.xlu0 %v5518_v9, %s5440_s14  ;;  %723 = vrot.lane.b32.xlu2 %v331_v3, %s5440_s14  ;;  %v4491_v3 = vld [vmem:[%s7723_s1 + $0x80] sm:$0xff] }
  0x4a   : > { %989 = vrot.lane.b32.xlu1 %v975_v10, %s5441_s15 }
  0x4b   : > { %987 = vrot.lane.b32.xlu0 %v974_v11, %s5441_s15  ;;  %991 = vrot.lane.b32.xlu2 %v976_v13, %s5441_s15 }
  0x52   : > { %1121 = vrot.lane.b32.xlu1 %v974_v11, %s5442_s16 }
  0x53   : > { %993 = vrot.lane.b32.xlu0 %v977_v12, %s5441_s15  ;;  %1123 = vrot.lane.b32.xlu2 %v975_v10, %s5442_s16 }
  0x5a   : > { %1125 = vrot.lane.b32.xlu1 %v976_v13, %s5442_s16 }
  0x5b   : > { %1257 = vrot.lane.b32.xlu0 %v975_v10, %s5443_s17  ;;  %1127 = vrot.lane.b32.xlu2 %v977_v12, %s5442_s16 }
  0x62   : > { %1259 = vrot.lane.b32.xlu1 %v976_v13, %s5443_s17 }
  0x63   : > { %1389 = vrot.lane.b32.xlu0 %v974_v11, %s5444_s18  ;;  %1255 = vrot.lane.b32.xlu2 %v974_v11, %s5443_s17 }
  0x6a   : > { %1391 = vrot.lane.b32.xlu1 %v975_v10, %s5444_s18  ;;  %v4493_v10 = vld [vmem:[%s7723_s1 + $0x90] sm:$0xff] }
  0x6b   : > { %1393 = vrot.lane.b32.xlu0 %v976_v13, %s5444_s18  ;;  %1261 = vrot.lane.b32.xlu2 %v977_v12, %s5443_s17 }
  0x72   : > { %1395 = vrot.lane.b32.xlu1 %v977_v12, %s5444_s18  ;;  %v4511_v12 = vld [vmem:[%s7723_s1 + $0xa8] sm:$0xff] }
  0x7d   : > { %v470_v15 = vpop.permute.xlu2 %469 }
  0x85   : > { %v472_v16 = vpop.permute.xlu2 %471 }
  0x86   : > { %v349_v14 = vpop.permute.xlu0 %348  ;;  %v477_v22 = vsel %vm475_vm3, %v470_v15, %v472_v16 }
  0x8d   : > { %v592_v29 = vpop.permute.xlu2 %591 }
  0x94   : > { %v353_v17 = vpop.permute.xlu1 %352 }
  0x95   : > { %v351_v18 = vpop.permute.xlu0 %350  ;;  %v596_v36 = vpop.permute.xlu2 %595 }
  0x96   : > { %v357_v20 = vsel %vm356_vm0, %v349_v14, %v351_v18  ;;  %v358_v21 = vsel %vm356_vm0, %v351_v18, %v353_v17  ;;  %v4494_v14 = vld [vmem:[%s7723_s1 + $0x98] sm:$0xff] }
  0x97   : > { %4423 = vmatpush.msk.msra.mxu0 %vm373_vm1, %v357_v20  ;;  %4428 = vmatpush.msk.msra.mxu1 %vm373_vm1, %v358_v21 }
  0x98   : > { %4424 = vmatmul.msk.f32.vlgmr.msra.gmra.mxu0 %vm360_vm2, %v4419_v19  ;;  %4429 = vmatmul.msk.f32.vlgmr.msra.gmra.mxu1 %vm360_vm2, %v4419_v19 }
  0x99   : > { %4443 = vmatpush.msk.msrb.mxu0 %vm373_vm1, %v477_v22 }
  0x9c   : > { %v355_v23 = vpop.permute.xlu1 %354 }
  0x9d   : > { %v468_v24 = vpop.permute.xlu0 %467  ;;  %v359_v25 = vsel %vm356_vm0, %v353_v17, %v355_v23  ;;  %v724_v43 = vpop.permute.xlu2 %723 }
  0x9e   : > { %4433 = vmatpush.msk.msra.mxu2 %vm373_vm1, %v359_v25  ;;  %v476_v27 = vsel %vm475_vm3, %v468_v24, %v470_v15 }
  0x9f   : > { %4438 = vmatpush.msk.msra.mxu3 %vm373_vm1, %v476_v27  ;;  %4434 = vmatmul.msk.f32.vlgmr.msra.gmra.mxu2 %vm360_vm2, %v4419_v19  ;;  %v4513_v19 = vld [vmem:[%s7723_s1 + $0xb8] sm:$0xff] }
  0xa0   : > { %4425 = vmatmul.msk.f32.gmra.mxu0 %vm360_vm2, %v4420_v26  ;;  %4430 = vmatmul.msk.f32.gmra.mxu1 %vm360_vm2, %v4420_v26 }
  0xa1   : > { %4439 = vmatmul.msk.f32.vlgmr.msra.gmra.mxu3 %vm360_vm2, %v335_v28 }
  0xa4   : > { %v590_v30 = vpop.permute.xlu1 %589 }
  0xa5   : > { %v474_v32 = vpop.permute.xlu0 %473  ;;  %v598_v33 = vsel %vm597_vm4, %v590_v30, %v592_v29  ;;  %v992_v60 = vpop.permute.xlu2 %991 }
  0xa6   : > { %v478_v35 = vsel %vm475_vm3, %v472_v16, %v474_v32  ;;  %4457 = vmatpush.msk.msrb.mxu2 %vm373_vm1, %v598_v33  ;;  %v4512_v16 = vld [vmem:[%s7723_s1 + $0xb0] sm:$0xff] }
  0xa7   : > { %4435 = vmatmul.msk.f32.gmra.mxu2 %vm360_vm2, %v4420_v26  ;;  %4448 = vmatpush.msk.msrb.mxu1 %vm373_vm1, %v478_v35  ;;  %v4529_v26 = vld [vmem:[%s7723_s1 + $0xc0] sm:$0xff] }
  0xa8   : > { %4426 = vmatmul.msk.f32.gmra.mxu0 %vm360_vm2, %v4421_v31  ;;  %4431 = vmatmul.msk.f32.gmra.mxu1 %vm360_vm2, %v4421_v31 }
  0xa9   : > { %4440 = vmatmul.msk.f32.gmra.mxu3 %vm360_vm2, %v336_v34 }
  0xac   : > { %v594_v37 = vpop.permute.xlu1 %593 }
  0xad   : > { %v599_v39 = vsel %vm597_vm4, %v592_v29, %v594_v37  ;;  %v600_v40 = vsel %vm597_vm4, %v594_v37, %v596_v36  ;;  %v726_v41 = vpop.permute.xlu0 %725  ;;  %v1124_v5 = vpop.permute.xlu2 %1123  ;;  %v4531_v37 = vld [vmem:[%s7723_s1 + $0xd0] sm:$0xff] }
  0xae   : > { %4462 = vmatpush.msk.msrb.mxu3 %vm373_vm1, %v599_v39  ;;  %4467 = vmatpush.msk.msra.mxu0 %vm373_vm1, %v600_v40  ;;  %v732_v44 = vsel %vm731_vm5, %v724_v43, %v726_v41 }
  0xaf   : > { %4436 = vmatmul.msk.f32.gmra.mxu2 %vm360_vm2, %v4421_v31  ;;  %4476 = vmatpush.msk.msra.mxu1 %vm373_vm1, %v732_v44  ;;  %v4530_v31 = vld [vmem:[%s7723_s1 + $0xc8] sm:$0xff] }
  0xb0   : > { %4427 = vmatmul.msk.f32.gmra.mxu0 %vm360_vm2, %v4422_v38  ;;  %4432 = vmatmul.msk.f32.gmra.mxu1 %vm360_vm2, %v4422_v38 }
  0xb1   : > { %4441 = vmatmul.msk.f32.gmra.mxu3 %vm360_vm2, %v337_v42 }
  0xb4   : > { %v728_v45 = vpop.permute.xlu1 %727 }
  0xb5   : > { %v733_v46 = vsel %vm731_vm5, %v726_v41, %v728_v45  ;;  %v730_v47 = vpop.permute.xlu0 %729  ;;  %v1128_v11 = vpop.permute.xlu2 %1127 }
  0xb6   : > { %v734_v49 = vsel %vm731_vm5, %v728_v45, %v730_v47  ;;  %4481 = vmatpush.msk.msra.mxu2 %vm373_vm1, %v733_v46  ;;  %v4532_v46 = vld [vmem:[%s7723_s1 + $0xd8] sm:$0xff] }
  0xb7   : > { %4437 = vmatmul.msk.f32.gmra.mxu2 %vm360_vm2, %v4422_v38  ;;  %4486 = vmatpush.msk.msra.mxu3 %vm373_vm1, %v734_v49  ;;  %v4548_v49 = vld [vmem:[%s7723_s1 + $0xe0] sm:$0xff] }
  0xb8   : > { %4444 = vmatmul.msk.f32.vlgmr.msrb.gmra.mxu0 %vm360_vm2, %v335_v28  ;;  %4449 = vmatmul.msk.f32.vlgmr.msrb.gmra.mxu1 %vm360_vm2, %v335_v28 }
  0xb9   : > { %4442 = vmatmul.msk.f32.gmra.mxu3 %vm360_vm2, %v338_v48  ;;  %4495 = vmatpush.msk.msrb.mxu0 %vm373_vm1, %v5512_v8  ;;  %v4492_v8 = vld [vmem:[%s7723_s1 + $0x88] sm:$0xff] }
  0xba   : > { %4500 = vmatpush.msk.msrb.mxu1 %vm373_vm1, %v5508_v7 }
  0xbc   : > { %v990_v55 = vpop.permute.xlu1 %989 }
  0xbd   : > { %v988_v56 = vpop.permute.xlu0 %987  ;;  %v997_v61 = vsel %vm995_vm6, %v990_v55, %v992_v60  ;;  %v1256_v15 = vpop.permute.xlu2 %1255 }
  0xbe   : > { %v996_v57 = vsel %vm995_vm6, %v988_v56, %v990_v55  ;;  %v4549_v56 = vld [vmem:[%s7723_s1 + $0xe8] sm:$0xff] }
  0xbf   : > { %4458 = vmatmul.msk.f32.vlgmr.msrb.gmra.mxu2 %vm360_vm2, %v4453_v50 }
  0xc0   : > { %4445 = vmatmul.msk.f32.gmra.mxu0 %vm360_vm2, %v336_v34  ;;  %4450 = vmatmul.msk.f32.gmra.mxu1 %vm360_vm2, %v336_v34 }
  0xc1   : > { %4463 = vmatmul.msk.f32.vlgmr.msrb.gmra.mxu3 %vm360_vm2, %v4453_v50  ;;  %4505 = vmatpush.msk.msrb.mxu2 %vm373_vm1, %v5518_v9  ;;  %v4510_v9 = vld [vmem:[%s7723_s1 + $0xa0] sm:$0xff] }
  0xc2   : > { %4514 = vmatpush.msk.msrb.mxu3 %vm373_vm1, %v996_v57 }
  0xc4   : > { %v1122_v62 = vpop.permute.xlu1 %1121 }
  0xc5   : > { %v994_v1 = vpop.permute.xlu0 %993  ;;  %v1130_v6 = vsel %vm1129_vm7, %v1122_v62, %v1124_v5  ;;  %v1262_v24 = vpop.permute.xlu2 %1261 }
  0xc6   : > { %v998_v2 = vsel %vm995_vm6, %v992_v60, %v994_v1 }
  0xc7   : > { %4459 = vmatmul.msk.f32.gmra.mxu2 %vm360_vm2, %v4454_v51 }
  0xc8   : > { %4446 = vmatmul.msk.f32.gmra.mxu0 %vm360_vm2, %v337_v42  ;;  %4451 = vmatmul.msk.f32.gmra.mxu1 %vm360_vm2, %v337_v42 }
  0xc9   : > { %4464 = vmatmul.msk.f32.gmra.mxu3 %vm360_vm2, %v4454_v51 }
  0xcc   : > { %v1126_v4 = vpop.permute.xlu1 %1125 }
  0xcd   : > { %v1131_v7 = vsel %vm1129_vm7, %v1124_v5, %v1126_v4  ;;  %v1132_v13 = vsel %vm1129_vm7, %v1126_v4, %v1128_v11  ;;  %v1258_v20 = vpop.permute.xlu0 %1257  ;;  %v5445_v4 = vmov 0   ;;  %v1519_v5 = vld [vmem:[%s7724_s2 + $0x8] sm:$0xff]  ;;  %v1520_v11 = vld [vmem:[%s7724_s2 + $0x10] sm:$0xff] }
  0xce   : > { %v1264_v22 = vsel %vm1263_vm8, %v1256_v15, %v1258_v20  ;;  %4784 = vset.pattern.permute.xlu0 %v5445_v4  ;;  %4785 = vset.pattern.permute.xlu1 %v5445_v4 }
  0xcf   : > { %4460 = vmatmul.msk.f32.gmra.mxu2 %vm360_vm2, %v4455_v52  ;;  %1529 = vperm.xlu0 %4784, %v1519_v5  }
  0xd0   : > { %4447 = vmatmul.msk.f32.gmra.mxu0 %vm360_vm2, %v338_v48  ;;  %4452 = vmatmul.msk.f32.gmra.mxu1 %vm360_vm2, %v338_v48 }
  0xd1   : > { %4465 = vmatmul.msk.f32.gmra.mxu3 %vm360_vm2, %v4455_v52  ;;  %4783 = vset.pattern.permute.xlu2 %v5445_v4 }
  0xd2   : > { %1534 = vperm.xlu1 %4785, %v1520_v11  }
  0xd4   : > { %v1260_v21 = vpop.permute.xlu1 %1259 }
  0xd5   : > { %v1265_v23 = vsel %vm1263_vm8, %v1258_v20, %v1260_v21  ;;  %v1266_v25 = vsel %vm1263_vm8, %v1260_v21, %v1262_v24  ;;  %v1390_v34 = vpop.permute.xlu0 %1389  ;;  %v4569_v24 = vld [vmem:[%s7723_s1 + $0x110] sm:$0xff] }
  0xd7   : > { %4461 = vmatmul.msk.f32.gmra.mxu2 %vm360_vm2, %v4456_v53 }
  0xd8   : > { %4468 = vmatmul.msk.f32.vlgmr.msra.gmra.mxu0 %vm360_vm2, %v4453_v50  ;;  %4477 = vmatmul.msk.f32.vlgmr.msra.gmra.mxu1 %vm360_vm2, %v4472_v54 }
  0xd9   : > { %4466 = vmatmul.msk.f32.gmra.mxu3 %vm360_vm2, %v4456_v53  ;;  %4519 = vmatpush.msk.msra.mxu0 %vm373_vm1, %v997_v61  ;;  %v4550_v61 = vld [vmem:[%s7723_s1 + $0xf0] sm:$0xff] }
  0xda   : > { %4524 = vmatpush.msk.msra.mxu1 %vm373_vm1, %v998_v2 }
  0xdc   : > { %v1392_v40 = vpop.permute.xlu1 %1391 }
  0xdd   : > { %v1394_v41 = vpop.permute.xlu0 %1393  ;;  %v1398_v42 = vsel %vm1397_vm9, %v1390_v34, %v1392_v40 }
  0xde   : > { %v1399_v43 = vsel %vm1397_vm9, %v1392_v40, %v1394_v41  ;;  %v4570_v40 = vld [vmem:[%s7723_s1 + $0x118] sm:$0xff] }
  0xdf   : > { %4482 = vmatmul.msk.f32.vlgmr.msra.gmra.mxu2 %vm360_vm2, %v4472_v54 }
  0xe0   : > { %4469 = vmatmul.msk.f32.gmra.mxu0 %vm360_vm2, %v4454_v51  ;;  %4478 = vmatmul.msk.f32.gmra.mxu1 %vm360_vm2, %v4473_v58 }
  0xe1   : > { %4487 = vmatmul.msk.f32.vlgmr.msra.gmra.mxu3 %vm360_vm2, %v4472_v54  ;;  %4533 = vmatpush.msk.msra.mxu2 %vm373_vm1, %v1130_v6 }
  0xe2   : > { %4538 = vmatpush.msk.msra.mxu3 %vm373_vm1, %v1131_v7 }
  0xe4   : > { %v1396_v50 = vpop.permute.xlu1 %1395 }
  0xe5   : > { %v1400_v51 = vsel %vm1397_vm9, %v1394_v41, %v1396_v50 }
  0xe7   : > { %4483 = vmatmul.msk.f32.gmra.mxu2 %vm360_vm2, %v4473_v58 }
  0xe8   : > { %4470 = vmatmul.msk.f32.gmra.mxu0 %vm360_vm2, %v4455_v52  ;;  %4479 = vmatmul.msk.f32.gmra.mxu1 %vm360_vm2, %v4474_v59 }
  0xe9   : > { %4488 = vmatmul.msk.f32.gmra.mxu3 %vm360_vm2, %v4473_v58 }
  0xef   : > { %4484 = vmatmul.msk.f32.gmra.mxu2 %vm360_vm2, %v4474_v59 }
  0xf0   : > { %4471 = vmatmul.msk.f32.gmra.mxu0 %vm360_vm2, %v4456_v53  ;;  %4480 = vmatmul.msk.f32.gmra.mxu1 %vm360_vm2, %v4475_v63 }
  0xf1   : > { %4489 = vmatmul.msk.f32.gmra.mxu3 %vm360_vm2, %v4474_v59 }
  0xf7   : > { %4485 = vmatmul.msk.f32.gmra.mxu2 %vm360_vm2, %v4475_v63 }
  0xf8   : > { %4496 = vmatmul.msk.f32.vlgmr.msrb.gmra.mxu0 %vm360_vm2, %v4491_v3  ;;  %4501 = vmatmul.msk.f32.vlgmr.msrb.gmra.mxu1 %vm360_vm2, %v4491_v3 }
  0xf9   : > { %4490 = vmatmul.msk.f32.gmra.mxu3 %vm360_vm2, %v4475_v63  ;;  %4543 = vmatpush.msk.msrb.mxu0 %vm373_vm1, %v1132_v13 }
  0xfa   : > { %4552 = vmatpush.msk.msrb.mxu1 %vm373_vm1, %v1264_v22 }
  0xff   : > { %4506 = vmatmul.msk.f32.vlgmr.msrb.gmra.mxu2 %vm360_vm2, %v4491_v3  ;;  %v4551_v3 = vld [vmem:[%s7723_s1 + $0xf8] sm:$0xff] }
 0x100   : > { %4497 = vmatmul.msk.f32.gmra.mxu0 %vm360_vm2, %v4492_v8  ;;  %4502 = vmatmul.msk.f32.gmra.mxu1 %vm360_vm2, %v4492_v8 }
 0x101   : > { %4515 = vmatmul.msk.f32.vlgmr.msrb.gmra.mxu3 %vm360_vm2, %v4510_v9  ;;  %4557 = vmatpush.msk.msrb.mxu2 %vm373_vm1, %v1265_v23 }
 0x102   : > { %4562 = vmatpush.msk.msrb.mxu3 %vm373_vm1, %v1266_v25  ;;  %v1521_v25 = vld [vmem:[%s7724_s2 + $0x18] sm:$0xff] }
 0x107   : > { %4507 = vmatmul.msk.f32.gmra.mxu2 %vm360_vm2, %v4492_v8 }
 0x108   : > { %4498 = vmatmul.msk.f32.gmra.mxu0 %vm360_vm2, %v4493_v10  ;;  %4503 = vmatmul.msk.f32.gmra.mxu1 %vm360_vm2, %v4493_v10 }
 0x109   : > { %4516 = vmatmul.msk.f32.gmra.mxu3 %vm360_vm2, %v4511_v12 }
 0x10f   : > { %4508 = vmatmul.msk.f32.gmra.mxu2 %vm360_vm2, %v4493_v10  ;;  %v4567_v10 = vld [vmem:[%s7723_s1 + $0x100] sm:$0xff] }
 0x110   : > { %4499 = vmatmul.msk.f32.gmra.mxu0 %vm360_vm2, %v4494_v14  ;;  %4504 = vmatmul.msk.f32.gmra.mxu1 %vm360_vm2, %v4494_v14 }
 0x111   : > { %4517 = vmatmul.msk.f32.gmra.mxu3 %vm360_vm2, %v4512_v16 }
 0x115   : > { %v5730_v17 = vpop.f32.mrf.mxu0  ;;  %v5732_v18 = vpop.f32.mrf.mxu1 }
 0x117   : > { %4509 = vmatmul.msk.f32.gmra.mxu2 %vm360_vm2, %v4494_v14 }
 0x118   : > { %4520 = vmatmul.msk.f32.vlgmr.msra.gmra.mxu0 %vm360_vm2, %v4510_v9  ;;  %4525 = vmatmul.msk.f32.vlgmr.msra.gmra.mxu1 %vm360_vm2, %v4510_v9 }
 0x119   : > { %4518 = vmatmul.msk.f32.gmra.mxu3 %vm360_vm2, %v4513_v19  ;;  %4571 = vmatpush.msk.msra.mxu0 %vm373_vm1, %v1398_v42 }
 0x11a   : > { %4576 = vmatpush.msk.msra.mxu1 %vm373_vm1, %v1399_v43 }
 0x11d   : > { %v5750_v27 = vpop.f32.mrf.mxu0  ;;  %v5752_v28 = vpop.f32.mrf.mxu1 }
 0x11f   : > { %4534 = vmatmul.msk.f32.vlgmr.msra.gmra.mxu2 %vm360_vm2, %v4529_v26 }
 0x120   : > { %4521 = vmatmul.msk.f32.gmra.mxu0 %vm360_vm2, %v4511_v12  ;;  %4526 = vmatmul.msk.f32.gmra.mxu1 %vm360_vm2, %v4511_v12 }
 0x121   : > { %4539 = vmatmul.msk.f32.vlgmr.msra.gmra.mxu3 %vm360_vm2, %v4529_v26  ;;  %4581 = vmatpush.msk.msra.mxu2 %vm373_vm1, %v1400_v51 }
 0x122   : > { %v5758_v29 = vpop.f32.mrf.mxu2 }
 0x124   : > { %v5760_v30 = vpop.f32.mrf.mxu3 }
 0x125   : > { %v5765_v32 = vpop.f32.mrf.mxu0  ;;  %v5767_v33 = vpop.f32.mrf.mxu1 }
 0x127   : > { %4535 = vmatmul.msk.f32.gmra.mxu2 %vm360_vm2, %v4530_v31 }
 0x128   : > { %4522 = vmatmul.msk.f32.gmra.mxu0 %vm360_vm2, %v4512_v16  ;;  %4527 = vmatmul.msk.f32.gmra.mxu1 %vm360_vm2, %v4512_v16  ;;  %v4568_v16 = vld [vmem:[%s7723_s1 + $0x108] sm:$0xff] }
 0x129   : > { %4540 = vmatmul.msk.f32.gmra.mxu3 %vm360_vm2, %v4530_v31 }
 0x12a   : > { %v5773_v35 = vpop.f32.mrf.mxu2 }
 0x12c   : > { %v5775_v36 = vpop.f32.mrf.mxu3 }
 0x12d   : > { %v5780_v38 = vpop.f32.mrf.mxu0  ;;  %v5782_v39 = vpop.f32.mrf.mxu1 }
 0x12f   : > { %4536 = vmatmul.msk.f32.gmra.mxu2 %vm360_vm2, %v4531_v37 }
 0x130   : > { %4523 = vmatmul.msk.f32.gmra.mxu0 %vm360_vm2, %v4513_v19  ;;  %4528 = vmatmul.msk.f32.gmra.mxu1 %vm360_vm2, %v4513_v19  ;;  %v1518_v19 = vld [vmem:[%s7724_s2] sm:$0xff] }
 0x131   : > { %4541 = vmatmul.msk.f32.gmra.mxu3 %vm360_vm2, %v4531_v37  ;;  %1524 = vperm.xlu2 %4783, %v1518_v19  }
 0x132   : > { %v5791_v44 = vpop.f32.mrf.mxu2 }
 0x134   : > { %v5794_v45 = vpop.f32.mrf.mxu3 }
 0x135   : > { %v5799_v47 = vpop.f32.mrf.mxu0  ;;  %v5801_v48 = vpop.f32.mrf.mxu1 }
 0x137   : > { %4537 = vmatmul.msk.f32.gmra.mxu2 %vm360_vm2, %v4532_v46 }
 0x138   : > { %4544 = vmatmul.msk.f32.vlgmr.msrb.gmra.mxu0 %vm360_vm2, %v4529_v26  ;;  %4553 = vmatmul.msk.f32.vlgmr.msrb.gmra.mxu1 %vm360_vm2, %v4548_v49 }
 0x139   : > { %4542 = vmatmul.msk.f32.gmra.mxu3 %vm360_vm2, %v4532_v46  ;;  %1539 = vperm.xlu2 %4783, %v1521_v25  }
 0x13a   : > { %v5812_v52 = vpop.f32.mrf.mxu2 }
 0x13b   : > { %7764 = vst [vmem:[#allocation3_spill] sm:$0xff] %v5812_v52 }
 0x13c   : > { %v5814_v53 = vpop.f32.mrf.mxu3 }
 0x13d   : > { %v5816_v54 = vpop.f32.mrf.mxu0  ;;  %v5818_v55 = vpop.f32.mrf.mxu1 }
 0x13f   : > { %4558 = vmatmul.msk.f32.vlgmr.msrb.gmra.mxu2 %vm360_vm2, %v4548_v49 }
 0x140   : > { %4545 = vmatmul.msk.f32.gmra.mxu0 %vm360_vm2, %v4530_v31  ;;  %4554 = vmatmul.msk.f32.gmra.mxu1 %vm360_vm2, %v4549_v56 }
 0x141   : > { %4563 = vmatmul.msk.f32.vlgmr.msrb.gmra.mxu3 %vm360_vm2, %v4548_v49 }
 0x142   : > { %v5827_v57 = vpop.f32.mrf.mxu2 }
 0x144   : > { %v5829_v58 = vpop.f32.mrf.mxu3 }
 0x145   : > { %v5831_v59 = vpop.f32.mrf.mxu0  ;;  %v5833_v60 = vpop.f32.mrf.mxu1 }
 0x147   : > { %4559 = vmatmul.msk.f32.gmra.mxu2 %vm360_vm2, %v4549_v56 }
 0x148   : > { %4546 = vmatmul.msk.f32.gmra.mxu0 %vm360_vm2, %v4531_v37  ;;  %4555 = vmatmul.msk.f32.gmra.mxu1 %vm360_vm2, %v4550_v61 }
 0x149   : > { %4564 = vmatmul.msk.f32.gmra.mxu3 %vm360_vm2, %v4549_v56 }
 0x14a   : > { %v5842_v62 = vpop.f32.mrf.mxu2 }
 0x14c   : > { %v5844_v63 = vpop.f32.mrf.mxu3 }
 0x14d   : > { %v5846_v1 = vpop.f32.mrf.mxu0  ;;  %v5848_v2 = vpop.f32.mrf.mxu1 }
 0x14e   : > { %7765 = vst [vmem:[#allocation4_spill] sm:$0xff] %v5848_v2 }
 0x14f   : > { %4560 = vmatmul.msk.f32.gmra.mxu2 %vm360_vm2, %v4550_v61 }
 0x150   : > { %4547 = vmatmul.msk.f32.gmra.mxu0 %vm360_vm2, %v4532_v46  ;;  %4556 = vmatmul.msk.f32.gmra.mxu1 %vm360_vm2, %v4551_v3 }
 0x151   : > { %4565 = vmatmul.msk.f32.gmra.mxu3 %vm360_vm2, %v4550_v61 }
 0x152   : > { %v5860_v6 = vpop.f32.mrf.mxu2 }
 0x154   : > { %v5862_v7 = vpop.f32.mrf.mxu3 }
 0x155   : > { %v5864_v8 = vpop.f32.mrf.mxu0  ;;  %v5866_v9 = vpop.f32.mrf.mxu1 }
 0x157   : > { %4561 = vmatmul.msk.f32.gmra.mxu2 %vm360_vm2, %v4551_v3 }
 0x158   : > { %4572 = vmatmul.msk.f32.vlgmr.msra.gmra.mxu0 %vm360_vm2, %v4567_v10  ;;  %4577 = vmatmul.msk.f32.vlgmr.msra.gmra.mxu1 %vm360_vm2, %v4567_v10 }
 0x159   : > { %4566 = vmatmul.msk.f32.gmra.mxu3 %vm360_vm2, %v4551_v3 }
 0x15a   : > { %v5878_v12 = vpop.f32.mrf.mxu2 }
 0x15b   : > { %7766 = vst [vmem:[#allocation5_spill] sm:$0xff] %v5878_v12 }
 0x15c   : > { %v5880_v13 = vpop.f32.mrf.mxu3 }
 0x15d   : > { %7767 = vst [vmem:[#allocation6_spill] sm:$0xff] %v5880_v13  ;;  %v5882_v14 = vpop.f32.mrf.mxu0  ;;  %v5884_v15 = vpop.f32.mrf.mxu1 }
 0x15f   : > { %4582 = vmatmul.msk.f32.vlgmr.msra.gmra.mxu2 %vm360_vm2, %v4567_v10 }
 0x160   : > { %4573 = vmatmul.msk.f32.gmra.mxu0 %vm360_vm2, %v4568_v16  ;;  %4578 = vmatmul.msk.f32.gmra.mxu1 %vm360_vm2, %v4568_v16 }
 0x162   : > { %v5895_v20 = vpop.f32.mrf.mxu2 }
 0x164   : > { %v5897_v21 = vpop.f32.mrf.mxu3 }
 0x165   : > { %v5899_v22 = vpop.f32.mrf.mxu0  ;;  %v5901_v23 = vpop.f32.mrf.mxu1 }
 0x166   : > { %7768 = vst [vmem:[#allocation7_spill] sm:$0xff] %v5899_v22 }
 0x167   : > { %4583 = vmatmul.msk.f32.gmra.mxu2 %vm360_vm2, %v4568_v16 }
 0x168   : > { %4574 = vmatmul.msk.f32.gmra.mxu0 %vm360_vm2, %v4569_v24  ;;  %4579 = vmatmul.msk.f32.gmra.mxu1 %vm360_vm2, %v4569_v24 }
 0x16a   : > { %v5912_v26 = vpop.f32.mrf.mxu2 }
 0x16c   : > { %v5914_v31 = vpop.f32.mrf.mxu3 }
 0x16d   : > { %7769 = vst [vmem:[#allocation8_spill] sm:$0xff] %v5914_v31  ;;  %v5916_v34 = vpop.f32.mrf.mxu0  ;;  %v5918_v37 = vpop.f32.mrf.mxu1 }
 0x16e   : > { %7770 = vst [vmem:[#allocation9_spill] sm:$0xff] %v5916_v34 }
 0x16f   : > { %7771 = vst [vmem:[#allocation10_spill] sm:$0xff] %v5918_v37  ;;  %4584 = vmatmul.msk.f32.gmra.mxu2 %vm360_vm2, %v4569_v24 }
 0x170   : > { %4575 = vmatmul.msk.f32.gmra.mxu0 %vm360_vm2, %v4570_v40  ;;  %4580 = vmatmul.msk.f32.gmra.mxu1 %vm360_vm2, %v4570_v40 }
 0x172   : > { %v5926_v41 = vpop.f32.mrf.mxu2 }
 0x173   : > { %7772 = vst [vmem:[#allocation11_spill] sm:$0xff] %v5926_v41 }
 0x174   : > { %v5928_v42 = vpop.f32.mrf.mxu3 }
 0x175   : > { %7773 = vst [vmem:[#allocation12_spill] sm:$0xff] %v5928_v42  ;;  %v892_v43 = vpop.f32.mrf.mxu0  ;;  %v921_v46 = vpop.f32.mrf.mxu1 }
 0x177   : > { %4585 = vmatmul.msk.f32.gmra.mxu2 %vm360_vm2, %v4570_v40 }
 0x17a   : > { %v5931_v49 = vpop.f32.mrf.mxu2 }
 0x17b   : > { %7774 = vst [vmem:[#allocation13_spill] sm:$0xff] %v5931_v49 }
 0x17c   : > { %v5935_v56 = vpop.f32.mrf.mxu3 }
 0x17d   : > { %v895_v50 = vpop.f32.mrf.mxu0  ;;  %v5933_v51 = vpop.f32.mrf.mxu1  ;;  %7775 = vst [vmem:[#allocation14_spill] sm:$0xff] %v5935_v56 }
 0x182   : > { %v5937_v61 = vpop.f32.mrf.mxu2 }
 0x184   : > { %v1034_v5 = vpop.f32.mrf.mxu3 }
 0x185   : > { %v5939_v3 = vpop.f32.mrf.mxu0  ;;  %v5941_v4 = vpop.f32.mrf.mxu1 }
 0x186   : > { %7776 = vst [vmem:[#allocation15_spill] sm:$0xff] %v5941_v4 }
 0x18a   : > { %v5943_v10 = vpop.f32.mrf.mxu2 }
 0x18b   : > { %7777 = vst [vmem:[#allocation16_spill] sm:$0xff] %v5943_v10 }
 0x18c   : > { %v1037_v19 = vpop.f32.mrf.mxu3 }
 0x18d   : > { %v5945_v11 = vpop.f32.mrf.mxu0  ;;  %v5947_v16 = vpop.f32.mrf.mxu1 }
 0x18e   : > { %7778 = vst [vmem:[#allocation17_spill] sm:$0xff] %v5945_v11 }
 0x18f   : > { %7779 = vst [vmem:[#allocation18_spill] sm:$0xff] %v5947_v16 }
 0x192   : > { %v5949_v24 = vpop.f32.mrf.mxu2 }
 0x193   : > { %7780 = vst [vmem:[#allocation19_spill] sm:$0xff] %v5949_v24 }
 0x194   : > { %v5955_v56 = vpop.f32.mrf.mxu3 }
 0x195   : > { %v1063_v25 = vpop.f32.mrf.mxu0  ;;  %v5951_v40 = vpop.f32.mrf.mxu1  ;;  %7782 = vst [vmem:[#allocation21_spill] sm:$0xff] %v5955_v56 }
 0x19a   : > { %v5953_v0 = vpop.f32.mrf.mxu2 }
 0x19b   : > { %7781 = vst [vmem:[#allocation20_spill] sm:$0xff] %v5953_v0 }
 0x19c   : > { %v5965_v16 = vpop.f32.mrf.mxu3 }
 0x19d   : > { %v5957_v34 = vpop.f32.mrf.mxu0  ;;  %v5959_v2 = vpop.f32.mrf.mxu1  ;;  %7786 = vst [vmem:[#allocation25_spill] sm:$0xff] %v5965_v16 }
 0x19e   : > { %7783 = vst [vmem:[#allocation22_spill] sm:$0xff] %v5959_v2 }
 0x1a2   : > { %v1168_v52 = vpop.f32.mrf.mxu2 }
 0x1a4   : > { %v1197_v4 = vpop.f32.mrf.mxu3 }
 0x1a5   : > { %v5961_v49 = vpop.f32.mrf.mxu0  ;;  %v5963_v42 = vpop.f32.mrf.mxu1 }
 0x1a6   : > { %7784 = vst [vmem:[#allocation23_spill] sm:$0xff] %v5961_v49 }
 0x1a7   : > { %7785 = vst [vmem:[#allocation24_spill] sm:$0xff] %v5963_v42 }
 0x1aa   : > { %v1171_v13 = vpop.f32.mrf.mxu2 }
 0x1ac   : > { %v5975_v22 = vpop.f32.mrf.mxu3 }
 0x1ad   : > { %v5967_v24 = vpop.f32.mrf.mxu0  ;;  %v5969_v11 = vpop.f32.mrf.mxu1  ;;  %7791 = vst [vmem:[#allocation30_spill] sm:$0xff] %v5975_v22 }
 0x1ae   : > { %7787 = vst [vmem:[#allocation26_spill] sm:$0xff] %v5967_v24 }
 0x1af   : > { %7788 = vst [vmem:[#allocation27_spill] sm:$0xff] %v5969_v11  ;;  %v515_v11 = vadd.f32 %v5760_v30, %v5730_v17 }
 0x1b2   : > { %v5971_v0 = vpop.f32.mrf.mxu2 }
 0x1b3   : > { %7789 = vst [vmem:[#allocation28_spill] sm:$0xff] %v5971_v0  ;;  %v706_v0 = vadd.f32 %v5827_v57, %v515_v11 }
 0x1b4   : > { %v5981_v16 = vpop.f32.mrf.mxu3 }
 0x1b5   : > { %v5973_v37 = vpop.f32.mrf.mxu0  ;;  %v1302_v10 = vpop.f32.mrf.mxu1  ;;  %7794 = vst [vmem:[#allocation33_spill] sm:$0xff] %v5981_v16  ;;  %v840_v22 = vadd.f32 %v5866_v9, %v706_v0  ;;  %v518_v16 = vadd.f32 %v5775_v36, %v5750_v27 }
 0x1b6   : > { %7790 = vst [vmem:[#allocation29_spill] sm:$0xff] %v5973_v37 }
 0x1b7   : > { %v962_v12 = vadd.f32 %v892_v43, %v840_v22  ;;  %v709_v57 = vadd.f32 %v5842_v62, %v518_v16 }
 0x1b9   : > { %v1104_v17 = vadd.f32 %v1034_v5, %v962_v12  ;;  %v843_v22 = vadd.f32 %v5884_v15, %v709_v57  ;;  %v547_v12 = vadd.f32 %v5816_v54, %v5752_v28  ;;  %v524_v28 = vadd.f32 %v5814_v53, %v5780_v38 }
 0x1ba   : > { %v5977_v2 = vpop.f32.mrf.mxu2 }
 0x1bb   : > { %7792 = vst [vmem:[#allocation31_spill] sm:$0xff] %v5977_v2  ;;  %v1238_v11 = vadd.f32 %v1168_v52, %v1104_v17  ;;  %v965_v52 = vadd.f32 %v895_v50, %v843_v22 }
 0x1bc   : > { %v5997_v37 = vpop.f32.mrf.mxu3 }
 0x1bd   : > { %v5979_v49 = vpop.f32.mrf.mxu0  ;;  %v1305_v42 = vpop.f32.mrf.mxu1  ;;  %v1372_v43 = vadd.f32 %v1302_v10, %v1238_v11  ;;  %v710_v10 = vadd.f32 %v5844_v63, %v547_v12  ;;  %v7799_v11 = vld [vmem:[#allocation5_spill] sm:$0xff] }
 0x1be   : > { %7793 = vst [vmem:[#allocation32_spill] sm:$0xff] %v5979_v49 }
 0x1c2   : > { %v1331_v41 = vpop.f32.mrf.mxu2 }
 0x1c5   : > { %v5983_v56 = vpop.f32.mrf.mxu0  ;;  %v5985_v24 = vpop.f32.mrf.mxu1 }
 0x1c6   : > { %7795 = vst [vmem:[#allocation34_spill] sm:$0xff] %v5983_v56  ;;  %v544_v56 = vadd.f32 %v5799_v47, %v5732_v18  ;;  %v573_v18 = vadd.f32 %v5801_v48, %v5758_v29  ;;  %v1107_v29 = vadd.f32 %v1037_v19, %v965_v52  ;;  %v1360_v48 = vpop.f32.mrf.mxu3  ;;  %v844_v19 = vadd.f32 %v5912_v26, %v710_v10  ;;  %v7807_v10 = vld [vmem:[#allocation10_spill] sm:$0xff] }
 0x1c8   : > { %v707_v30 = vadd.f32 %v5829_v58, %v544_v56  ;;  %v6016_v58 = vld [vmem:[%s7729_s7] sm:$0x7]  ;;  %v708_v15 = vadd.f32 %v5864_v8, %v573_v18  ;;  %v521_v56 = vadd.f32 %v5794_v45, %v5765_v32  ;;  %v1241_v8 = vadd.f32 %v1171_v13, %v1107_v29 }
 0x1c9   : > { %v576_v45 = vadd.f32 %v5818_v55, %v5773_v35  ;;  %v966_v13 = vadd.f32 %v5933_v51, %v844_v19  ;;  %v6079_v19 = vperm.slane %v6016_v58, 1 }
 0x1ca   : > { %v5990_v31 = vpop.f32.mrf.mxu2  ;;  %v841_v9 = vadd.f32 %v5895_v20, %v707_v30  ;;  %v842_v50 = vadd.f32 %v5897_v21, %v708_v15  ;;  %v712_v54 = vadd.f32 %v5860_v6, %v521_v56  ;;  %v550_v21 = vadd.f32 %v5831_v59, %v5767_v33  ;;  %v7806_v15 = vld [vmem:[#allocation28_spill] sm:$0xff] }
 0x1cb   : > { %v1375_v38 = vadd.f32 %v1305_v42, %v1241_v8  ;;  %v579_v6 = vadd.f32 %v5833_v60, %v5791_v44  ;;  %v7797_v42 = vmov 0.0   ;;  %v553_v44 = vadd.f32 %v5846_v1, %v5782_v39  ;;  %v7803_v39 = vld [vmem:[#allocation30_spill] sm:$0xff] }
 0x1cc   : > { %v963_v47 = vadd.f32 %v921_v46, %v841_v9  ;;  %v6024_v46 = vperm.slane %v6016_v58, 0  ;;  %v964_v17 = vadd.f32 %v5937_v61, %v842_v50  ;;  %v6048_v61 = vpop.permute.xlu0 %1529  ;;  %v713_v60 = vadd.f32 %v5862_v7, %v550_v21 }
 0x1cd   : > { %v5993_v2 = vpop.f32.mrf.mxu0  ;;  %v5995_v49 = vpop.f32.mrf.mxu1  ;;  %v1108_v51 = vadd.f32 %v5957_v34, %v966_v13  ;;  %v715_v9 = vadd.f32 %v7799_v11, %v524_v28  ;;  %v7810_v13 = vld [vmem:[#allocation17_spill] sm:$0xff] }
 0x1ce   : > { %7796 = vst [vmem:[#allocation35_spill] sm:$0xff] %v5993_v2  ;;  %v6009_v2 = vpop.permute.xlu2 %1524  ;;  %v1105_v20 = vadd.f32 %v1063_v25, %v963_v47  ;;  %v1106_v35 = vadd.f32 %v5951_v40, %v964_v17  ;;  %v7798_v40 = vld [vmem:[#allocation29_spill] sm:$0xff]  ;;  %v7802_v47 = vld [vmem:[#allocation11_spill] sm:$0xff]  ;;  %v1363_v56 = vpop.f32.mrf.mxu3 }
 0x1cf   : > { %v1242_v1 = vadd.f32 %v7803_v39, %v1108_v51  ;;  %v849_v50 = vadd.f32 %v7807_v10, %v715_v9  ;;  %v7816_v11 = vld [vmem:[#allocation33_spill] sm:$0xff] }
 0x1d0   : > { %v1239_v16 = vadd.f32 %v1197_v4, %v1105_v20  ;;  %v846_v4 = vadd.f32 %v5901_v23, %v712_v54  ;;  %v1240_v57 = vadd.f32 %v7798_v40, %v1106_v35 }
 0x1d1   : > { %v1376_v54 = vadd.f32 %v5990_v31, %v1242_v1  ;;  %v1535_v31 = vpop.permute.xlu1 %1534  ;;  %v971_v35 = vadd.f32 %v7810_v13, %v849_v50  ;;  %v7819_v1 = vld [vmem:[#allocation31_spill] sm:$0xff] }
 0x1d2   : > { %v6005_v0 = vpop.f32.mrf.mxu2  ;;  %v1373_v63 = vadd.f32 %v1331_v41, %v1239_v16  ;;  %v711_v41 = vadd.f32 %v5882_v14, %v576_v45  ;;  %v968_v33 = vadd.f32 %v5939_v3, %v846_v4  ;;  %v7800_v14 = vld [vmem:[#allocation8_spill] sm:$0xff]  ;;  %v7801_v3 = vld [vmem:[#allocation21_spill] sm:$0xff]  ;;  %v1374_v7 = vadd.f32 %v1360_v48, %v1240_v57  ;;  %v7808_v16 = vld [vmem:[#allocation15_spill] sm:$0xff] }
 0x1d4   : > { %v845_v22 = vadd.f32 %v7800_v14, %v711_v41 }
 0x1d5   : > { %v1436_v27 = vpop.f32.mrf.mxu0  ;;  %v1465_v36 = vpop.f32.mrf.mxu1 }
 0x1d6   : > { %v1506_v62 = vadd.f32 %v1436_v27, %v1372_v43  ;;  %v1507_v55 = vadd.f32 %v1465_v36, %v1373_v63  ;;  %v1110_v43 = vadd.f32 %v7801_v3, %v968_v33  ;;  %v847_v27 = vadd.f32 %v7802_v47, %v713_v60  ;;  %v7804_v36 = vld [vmem:[#allocation7_spill] sm:$0xff]  ;;  %v7812_v33 = vld [vmem:[#allocation6_spill] sm:$0xff]  ;;  %v7813_v60 = vld [vmem:[#allocation32_spill] sm:$0xff]  ;;  %v1366_v50 = vpop.f32.mrf.mxu3 }
 0x1d7   : > { %v714_v52 = vadd.f32 %v7804_v36, %v579_v6 }
 0x1d8   : > { %v1542_v5 = vadd.f32 %v6009_v2, %v1506_v62  ;;  %v1543_v34 = vadd.f32 %v6009_v2, %v1507_v55  ;;  %v7805_v62 = vld [vmem:[#allocation16_spill] sm:$0xff]  ;;  %v1244_v20 = vadd.f32 %v7806_v15, %v1110_v43  ;;  %v969_v28 = vadd.f32 %v7808_v16, %v847_v27  ;;  %v7811_v55 = vld [vmem:[#allocation23_spill] sm:$0xff] }
 0x1d9   : > { %v967_v12 = vadd.f32 %v7805_v62, %v845_v22  ;;  %v7818_v27 = vld [vmem:[#allocation19_spill] sm:$0xff]  ;;  %v7823_v16 = vld [vmem:[#allocation24_spill] sm:$0xff] }
 0x1da   : > { %v1554_v25 = vmax.f32 %v1542_v5, 0.0  ;;  %v6032_v32 = vpop.f32.mrf.mxu2  ;;  %v1378_v45 = vadd.f32 %v5985_v24, %v1244_v20  ;;  %v1555_v63 = vmax.f32 %v1543_v34, 0.0  ;;  %v7820_v15 = vld [vmem:[#allocation3_spill] sm:$0xff]  ;;  %v7821_v20 = vld [vmem:[#allocation4_spill] sm:$0xff] }
 0x1dc   : > { %v6042_v53 = vmul.f32 %v6024_v46, %v1554_v25  ;;  %v7809_v25 = vld [vmem:[#allocation22_spill] sm:$0xff] }
 0x1dd   : > { %v1439_v26 = vpop.f32.mrf.mxu0  ;;  %v1468_v23 = vpop.f32.mrf.mxu1  ;;  %v1109_v48 = vadd.f32 %v7809_v25, %v967_v12 }
 0x1de   : > { %v1509_v59 = vadd.f32 %v1439_v26, %v1375_v38  ;;  %v6054_v30 = vpack.i.bf16 %v6042_v53, %v7797_v42  ;;  %v1510_v21 = vadd.f32 %v1468_v23, %v1376_v54  ;;  %v6086_v38 = vperm.slane %v6016_v58, 2  ;;  %v7815_v58 = vld [vmem:[#allocation25_spill] sm:$0xff] }
 0x1df   : > { %v1111_v26 = vadd.f32 %v7811_v55, %v969_v28  ;;  %v1243_v23 = vadd.f32 %v7813_v60, %v1109_v48  ;;  %v1113_v57 = vadd.f32 %v7815_v58, %v971_v35  ;;  %v7824_v48 = vld [vmem:[#allocation9_spill] sm:$0xff]  ;;  %v1540_v35 = vpop.permute.xlu2 %1539 }
 0x1e0   : > { %v1545_v18 = vadd.f32 %v6048_v61, %v1509_v59  ;;  %4787 = vrot.lane.b32.xlu1 %v6054_v30, %s5437_s11  ;;  %v716_v59 = vadd.f32 %v7812_v33, %v553_v44  ;;  %v1546_v44 = vadd.f32 %v6048_v61, %v1510_v21 }
 0x1e1   : > { %v1245_v9 = vadd.f32 %v7816_v11, %v1111_v26  ;;  %v1377_v3 = vadd.f32 %v1363_v56, %v1243_v23  ;;  %v582_v56 = vadd.f32 %v7821_v20, %v7820_v15  ;;  %v7827_v26 = vld [vmem:[#allocation14_spill] sm:$0xff] }
 0x1e2   : > { %v1557_v29 = vmax.f32 %v1545_v18, 0.0  ;;  %v1494_v5 = vpop.f32.mrf.mxu2  ;;  %v7817_v18 = vld [vmem:[#allocation13_spill] sm:$0xff]  ;;  %v1558_v54 = vmax.f32 %v1546_v44, 0.0  ;;  %v7829_v44 = vld [vmem:[#allocation27_spill] sm:$0xff] }
 0x1e3   : > { %v1508_v8 = vadd.f32 %v1494_v5, %v1374_v7  ;;  %v850_v47 = vadd.f32 %v7817_v18, %v716_v59  ;;  %v1247_v7 = vadd.f32 %v7819_v1, %v1113_v57  ;;  %v1379_v36 = vadd.f32 %v6005_v0, %v1245_v9  ;;  %v7830_v1 = vld [vmem:[#allocation35_spill] sm:$0xff] }
 0x1e4   : > { %v6082_v17 = vmul.f32 %v6024_v46, %v1557_v29  ;;  %v7822_v29 = vld [vmem:[#allocation18_spill] sm:$0xff]  ;;  %v6133_v60 = vmul.f32 %v6079_v19, %v1558_v54 }
 0x1e5   : > { %v1544_v4 = vadd.f32 %v6009_v2, %v1508_v8  ;;  %v1442_v6 = vpop.f32.mrf.mxu0  ;;  %v7814_v2 = vld [vmem:[#allocation12_spill] sm:$0xff]  ;;  %v1471_v14 = vpop.f32.mrf.mxu1  ;;  %v972_v5 = vadd.f32 %v7822_v29, %v850_v47  ;;  %v1381_v10 = vadd.f32 %v5995_v49, %v1247_v7 }
 0x1e6   : > { %v1512_v24 = vadd.f32 %v1442_v6, %v1378_v45  ;;  %v6092_v41 = vpack.i.bf16 %v6082_v17, %v7797_v42  ;;  %v848_v40 = vadd.f32 %v7814_v2, %v714_v52  ;;  %v6102_v42 = vmul.f32 %v6079_v19, %v1555_v63  ;;  %v7825_v63 = vld [vmem:[#allocation26_spill] sm:$0xff]  ;;  %v7828_v2 = vld [vmem:[#allocation20_spill] sm:$0xff] }
 0x1e7   : > { %v1556_v51 = vmax.f32 %v1544_v4, 0.0  ;;  %v1513_v8 = vadd.f32 %v1471_v14, %v1379_v36  ;;  %v717_v45 = vadd.f32 %v7824_v48, %v582_v56  ;;  %v1114_v21 = vadd.f32 %v7825_v63, %v972_v5  ;;  %v7826_v6 = vld [vmem:[#allocation34_spill] sm:$0xff] }
 0x1e8   : > { %v1548_v22 = vadd.f32 %v1535_v31, %v1512_v24  ;;  %4797 = vrot.lane.b32.xlu0 %v6092_v41, %s5437_s11  ;;  %v970_v39 = vadd.f32 %v7818_v27, %v848_v40 }
 0x1e9   : > { %v6106_v43 = vmul.f32 %v6086_v38, %v1556_v51  ;;  %v851_v24 = vadd.f32 %v7827_v26, %v717_v45  ;;  %v1549_v23 = vadd.f32 %v1535_v31, %v1513_v8 }
 0x1ea   : > { %v1497_v34 = vpop.f32.mrf.mxu2  ;;  %v1560_v52 = vmax.f32 %v1548_v22, 0.0  ;;  %v1112_v28 = vadd.f32 %v7823_v16, %v970_v39  ;;  %v6140_v22 = vld [vmem:[#allocation2] sm:$0xff] }
 0x1eb   : > { %v1511_v62 = vadd.f32 %v1497_v34, %v1377_v3  ;;  %v6114_v12 = vpack.i.bf16 %v6106_v43, %v6102_v42  ;;  %v973_v40 = vadd.f32 %v7828_v2, %v851_v24  ;;  %v1561_v47 = vmax.f32 %v1549_v23, 0.0 }
 0x1ec   : > { %v1246_v13 = vadd.f32 %v7826_v6, %v1112_v28  ;;  %v6128_v49 = vmul.f32 %v6024_v46, %v1560_v52 }
 0x1ed   : > { %v1547_v0 = vadd.f32 %v6048_v61, %v1511_v62  ;;  %v1445_v25 = vpop.f32.mrf.mxu0  ;;  %4792 = vrot.lane.b32.xlu2 %v6114_v12, %s5437_s11  ;;  %v1248_v61 = vadd.f32 %v5997_v37, %v1114_v21  ;;  %v1474_v57 = vpop.f32.mrf.mxu1  ;;  %v1115_v18 = vadd.f32 %v7829_v44, %v973_v40  ;;  %v6154_v62 = vmul.f32 %v6079_v19, %v1561_v47 }
 0x1ee   : > { %v1515_v4 = vadd.f32 %v1445_v25, %v1381_v10  ;;  %v1380_v59 = vadd.f32 %v1366_v50, %v1246_v13  ;;  %v4806_v37 = vpack.i.bf16 %v6128_v49, %v6140_v22 }
 0x1ef   : > { %v1559_v55 = vmax.f32 %v1547_v0, 0.0  ;;  %v1382_v58 = vadd.f32 %v6032_v32, %v1248_v61  ;;  %v1369_v32 = vpop.f32.mrf.mxu3  ;;  %v1249_v7 = vadd.f32 %v7830_v1, %v1115_v18  ;;  %v6212_v0 = vpack.i.bf16 %v6102_v42, %v6042_v53 }
 0x1f0   : > { %v1551_v33 = vadd.f32 %v1540_v35, %v1515_v4 }
 0x1f1   : > { %v6136_v51 = vmul.f32 %v6086_v38, %v1559_v55  ;;  %v1516_v27 = vadd.f32 %v1474_v57, %v1382_v58  ;;  %v1383_v52 = vadd.f32 %v1369_v32, %v1249_v7 }
 0x1f2   : > { %v1500_v11 = vpop.f32.mrf.mxu2  ;;  %v1563_v9 = vmax.f32 %v1551_v33, 0.0 }
 0x1f3   : > { %v1514_v14 = vadd.f32 %v1500_v11, %v1380_v59  ;;  %v4801_v3 = vpack.i.bf16 %v6136_v51, %v6133_v60  ;;  %v1552_v15 = vadd.f32 %v1540_v35, %v1516_v27  ;;  %v4961_v25 = vpack.i.bf16 %v6140_v22, %v6136_v51 }
 0x1f4   : > { %v6151_v34 = vmul.f32 %v6024_v46, %v1563_v9 }
 0x1f5   : > { %v1550_v39 = vadd.f32 %v1535_v31, %v1514_v14  ;;  %4807 = vrot.lane.b32.xlu2 %v4806_v37, %s5437_s11  ;;  %4802 = vrot.lane.b32.xlu1 %v4801_v3, %s5437_s11  ;;  %v1564_v10 = vmax.f32 %v1552_v15, 0.0 }
 0x1f6   : > { %v4816_v29 = vpack.i.bf16 %v6151_v34, %v6140_v22  ;;  %v5041_v32 = vpack.i.bf16 %v6151_v34, %v6136_v51 }
 0x1f7   : > { %v1562_v36 = vmax.f32 %v1550_v39, 0.0  ;;  %v6166_v28 = vmul.f32 %v6079_v19, %v1564_v10 }
 0x1f9   : > { %v6157_v20 = vmul.f32 %v6086_v38, %v1562_v36  ;;  %v6244_v21 = vpack.i.bf16 %v6166_v28, %v6151_v34 }
 0x1fa   : > { %v1503_v31 = vpop.f32.mrf.mxu2 }
 0x1fb   : > { %v1517_v56 = vadd.f32 %v1503_v31, %v1383_v52  ;;  %v4811_v5 = vpack.i.bf16 %v6157_v20, %v6154_v62  ;;  %v6240_v63 = vpack.i.bf16 %v6140_v22, %v6157_v20 }
 0x1fd   : > { %v1553_v50 = vadd.f32 %v1540_v35, %v1517_v56  ;;  %4817 = vrot.lane.b32.xlu1 %v4816_v29, %s5437_s11  ;;  %4812 = vrot.lane.b32.xlu0 %v4811_v5, %s5437_s11 }
 0x1ff   : > { %v1565_v16 = vmax.f32 %v1553_v50, 0.0 }
 0x201   : > { %v6169_v54 = vmul.f32 %v6086_v38, %v1565_v16 }
 0x203   : > { %v4831_v8 = vpack.i.bf16 %v6169_v54, %v6166_v28  ;;  %v4981_v45 = vpack.i.bf16 %v6140_v22, %v6169_v54 }
 0x205   : > { %4832 = vrot.lane.b32.xlu2 %v4831_v8, %s5437_s11  ;;  %4827 = vrot.lane.b32.xlu1 %v6114_v12, %s5438_s12 }
 0x206   : > { %4822 = vrot.lane.b32.xlu0 %v6054_v30, %s5438_s12 }
 0x20d   : > { %4847 = vrot.lane.b32.xlu1 %v4806_v37, %s5438_s12  ;;  %4837 = vrot.lane.b32.xlu2 %v6092_v41, %s5438_s12 }
 0x20e   : > { %4842 = vrot.lane.b32.xlu0 %v4801_v3, %s5438_s12 }
 0x215   : > { %4862 = vrot.lane.b32.xlu1 %v4831_v8, %s5438_s12  ;;  %4852 = vrot.lane.b32.xlu2 %v4811_v5, %s5438_s12 }
 0x216   : > { %4857 = vrot.lane.b32.xlu0 %v4816_v29, %s5438_s12 }
 0x21d   : > { %4877 = vrot.lane.b32.xlu1 %v6092_v41, %s5439_s13  ;;  %4867 = vrot.lane.b32.xlu2 %v6054_v30, %s5439_s13 }
 0x21e   : > { %4872 = vrot.lane.b32.xlu0 %v6114_v12, %s5439_s13 }
 0x225   : > { %4892 = vrot.lane.b32.xlu1 %v4811_v5, %s5439_s13  ;;  %4882 = vrot.lane.b32.xlu2 %v4801_v3, %s5439_s13 }
 0x226   : > { %4887 = vrot.lane.b32.xlu0 %v4806_v37, %s5439_s13 }
 0x22d   : > { %4902 = vrot.lane.b32.xlu1 %v6054_v30, %s5440_s14  ;;  %4897 = vrot.lane.b32.xlu2 %v4816_v29, %s5439_s13  ;;  %v6208_v30 = vpack.i.bf16 %v6140_v22, %v6106_v43 }
 0x22e   : > { %4912 = vrot.lane.b32.xlu0 %v4831_v8, %s5439_s13 }
 0x235   : > { %4922 = vrot.lane.b32.xlu1 %v4801_v3, %s5440_s14  ;;  %4907 = vrot.lane.b32.xlu2 %v6114_v12, %s5440_s14  ;;  %v6225_v12 = vpack.i.bf16 %v6133_v60, %v6082_v17 }
 0x236   : > { %4917 = vrot.lane.b32.xlu0 %v6092_v41, %s5440_s14  ;;  %v6221_v41 = vpack.i.bf16 %v6154_v62, %v6128_v49 }
 0x23d   : > { %4937 = vrot.lane.b32.xlu1 %v4816_v29, %s5440_s14  ;;  %4927 = vrot.lane.b32.xlu2 %v4806_v37, %s5440_s14 }
 0x23e   : > { %4932 = vrot.lane.b32.xlu0 %v4811_v5, %s5440_s14 }
 0x245   : > { %4952 = vrot.lane.b32.xlu1 %v6208_v30, %s5441_s15  ;;  %4942 = vrot.lane.b32.xlu2 %v4831_v8, %s5440_s14 }
 0x246   : > { %4947 = vrot.lane.b32.xlu0 %v6212_v0, %s5441_s15 }
 0x247   : > { %v6229_v48 = vpop.permute.xlu2 %4792 }
 0x248   : > { %v4795_v1 = vunpack.i.h.bf16 %v6229_v48  ;;  %v4794_v7 = vunpack.i.l.bf16 %v6229_v48 }
 0x24a   : > { %v1672_v8 = vsel %vm356_vm0, %v4794_v7, %v4795_v1 }
 0x24d   : > { %4967 = vrot.lane.b32.xlu1 %v6221_v41, %s5441_s15  ;;  %4957 = vrot.lane.b32.xlu2 %v6225_v12, %s5441_s15 }
 0x24e   : > { %4962 = vrot.lane.b32.xlu0 %v4961_v25, %s5441_s15 }
 0x24f   : > { %v4808_v4 = vpop.permute.xlu2 %4807 }
 0x250   : > { %v4810_v2 = vunpack.i.h.bf16 %v4808_v4  ;;  %v4809_v40 = vunpack.i.l.bf16 %v4808_v4  ;;  %v5051_v4 = vpack.i.bf16 %v6169_v54, %v6154_v62 }
 0x252   : > { %v6257_v6 = vpop.permute.xlu1 %4787  ;;  %v1676_v36 = vsel %vm356_vm0, %v4809_v40, %v4810_v2 }
 0x253   : > { %v4790_v52 = vunpack.i.h.bf16 %v6257_v6  ;;  %v4789_v15 = vunpack.i.l.bf16 %v6257_v6 }
 0x255   : > { %4982 = vrot.lane.b32.xlu1 %v4981_v45, %s5441_s15  ;;  %4972 = vrot.lane.b32.xlu2 %v6240_v63, %s5441_s15  ;;  %v1671_v48 = vsel %vm356_vm0, %v4790_v52, %v4794_v7 }
 0x256   : > { %4977 = vrot.lane.b32.xlu0 %v6244_v21, %s5441_s15 }
 0x25a   : > { %v4798_v33 = vpop.permute.xlu0 %4797 }
 0x25b   : > { %v4800_v47 = vunpack.i.h.bf16 %v4798_v33  ;;  %v4799_v27 = vunpack.i.l.bf16 %v4798_v33 }
 0x25d   : > { %4997 = vrot.lane.b32.xlu1 %v6225_v12, %s5442_s16  ;;  %4987 = vrot.lane.b32.xlu2 %v6212_v0, %s5442_s16  ;;  %v1673_v10 = vsel %vm356_vm0, %v4799_v27, %v4800_v47 }
 0x25e   : > { %4992 = vrot.lane.b32.xlu0 %v6208_v30, %s5442_s16 }
 0x25f   : > { %v4833_v13 = vpop.permute.xlu2 %4832 }
 0x260   : > { %v4835_v35 = vunpack.i.h.bf16 %v4833_v13  ;;  %v4834_v55 = vunpack.i.l.bf16 %v4833_v13 }
 0x262   : > { %v1681_v26 = vsel %vm356_vm0, %v4834_v55, %v4835_v35 }
 0x263   : > { %1777 = vmatpush.msrb.mxu1 %v1681_v26 }
 0x265   : > { %5012 = vrot.lane.b32.xlu1 %v6240_v63, %s5442_s16  ;;  %5002 = vrot.lane.b32.xlu2 %v4961_v25, %s5442_s16  ;;  %v1670_v25 = vsel %vm356_vm0, %v4789_v15, %v4790_v52 }
 0x266   : > { %5007 = vrot.lane.b32.xlu0 %v6221_v41, %s5442_s16 }
 0x267   : > { %v4803_v24 = vpop.permute.xlu1 %4802  ;;  %v6265_v61 = vpop.permute.xlu2 %4837 }
 0x268   : > { %v4805_v37 = vunpack.i.h.bf16 %v4803_v24  ;;  %v4804_v3 = vunpack.i.l.bf16 %v4803_v24  ;;  %v4839_v27 = vunpack.i.l.bf16 %v6265_v61 }
 0x26a   : > { %v1675_v56 = vsel %vm356_vm0, %v4804_v3, %v4805_v37  ;;  %v1674_v16 = vsel %vm356_vm0, %v4800_v47, %v4804_v3  ;;  %v4840_v47 = vunpack.i.h.bf16 %v6265_v61 }
 0x26d   : > { %5022 = vrot.lane.b32.xlu1 %v6212_v0, %s5443_s17  ;;  %5017 = vrot.lane.b32.xlu2 %v6244_v21, %s5442_s16 }
 0x26e   : > { %5032 = vrot.lane.b32.xlu0 %v4981_v45, %s5442_s16  ;;  %v5046_v45 = vpack.i.bf16 %v6128_v49, %v6166_v28 }
 0x26f   : > { %v4818_v59 = vpop.permute.xlu1 %4817  ;;  %v6272_v23 = vpop.permute.xlu2 %4852 }
 0x270   : > { %v4820_v58 = vunpack.i.h.bf16 %v4818_v59  ;;  %v4819_v57 = vunpack.i.l.bf16 %v4818_v59  ;;  %v4813_v11 = vpop.permute.xlu0 %4812  ;;  %v4855_v37 = vunpack.i.h.bf16 %v6272_v23  ;;  %v4854_v3 = vunpack.i.l.bf16 %v6272_v23 }
 0x271   : > { %v4815_v9 = vunpack.i.h.bf16 %v4813_v11  ;;  %v4814_v14 = vunpack.i.l.bf16 %v4813_v11 }
 0x272   : > { %v1679_v44 = vsel %vm356_vm0, %v4819_v57, %v4820_v58  ;;  %v1680_v18 = vsel %vm356_vm0, %v4820_v58, %v4834_v55  ;;  %v4587_v55 = vld [vmem:[%s7725_s3 + $0x28] sm:$0xff] }
 0x273   : > { %1719 = vmatpush.msra.mxu3 %v1679_v44  ;;  %1748 = vmatpush.msrb.mxu0 %v1680_v18  ;;  %v1678_v39 = vsel %vm356_vm0, %v4814_v14, %v4815_v9  ;;  %v1677_v31 = vsel %vm356_vm0, %v4810_v2, %v4814_v14 }
 0x274   : > { %1778 = vmatpush.msrb.mxu1 %v1678_v39  ;;  %v5096_v39 = vpack.i.bf16 %v6157_v20, %v6169_v54 }
 0x275   : > { %1720 = vmatpush.msra.mxu3 %v1676_v36  ;;  %5042 = vrot.lane.b32.xlu1 %v5041_v32, %s5443_s17 }
 0x276   : > { %5027 = vrot.lane.b32.xlu2 %v6208_v30, %s5443_s17  ;;  %5037 = vrot.lane.b32.xlu0 %v6225_v12, %s5443_s17  ;;  %v4586_v30 = vld [vmem:[%s7725_s3 + $0x20] sm:$0xff] }
 0x277   : > { %1749 = vmatpush.msrb.mxu0 %v1677_v31  ;;  %1779 = vmatpush.msrb.mxu1 %v1675_v56  ;;  %v6291_v29 = vpop.permute.xlu1 %4827  ;;  %v6293_v5 = vpop.permute.xlu2 %4867  ;;  %v1834_v31 = vsel %vm475_vm3, %v4854_v3, %v4855_v37 }
 0x278   : > { %v6296_v50 = vpop.permute.xlu0 %4822  ;;  %1721 = vmatpush.msra.mxu3 %v1673_v10  ;;  %v4830_v36 = vunpack.i.h.bf16 %v6291_v29  ;;  %v4829_v52 = vunpack.i.l.bf16 %v6291_v29  ;;  %v4589_v29 = vld [vmem:[%s7725_s3 + $0x38] sm:$0xff] }
 0x279   : > { %1750 = vmatpush.msrb.mxu0 %v1674_v16  ;;  %1780 = vmatpush.msrb.mxu1 %v1672_v8  ;;  %v4825_v23 = vunpack.i.h.bf16 %v6296_v50  ;;  %v4824_v7 = vunpack.i.l.bf16 %v6296_v50  ;;  %v1829_v16 = vsel %vm475_vm3, %v4839_v27, %v4840_v47 }
 0x27a   : > { %1722 = vmatpush.msra.mxu3 %v1670_v25  ;;  %4598 = vmatmul.msk.f32.vlgmr.msrb.gmra.mxu1 %vm1694_vm10, %v4586_v30  ;;  %v1613_v25 = vld [vmem:[%s7725_s3] sm:$0xff] }
 0x27b   : > { %1751 = vmatpush.msrb.mxu0 %v1671_v48  ;;  %4590 = vmatmul.msk.f32.vlgmr.msra.gmra.mxu3 %vm1694_vm10, %v4586_v30  ;;  %v1827_v48 = vsel %vm475_vm3, %v4825_v23, %v4829_v52 }
 0x27c   : > { %4594 = vmatmul.msk.f32.vlgmr.msrb.gmra.mxu0 %vm1694_vm10, %v4586_v30  ;;  %v1826_v30 = vsel %vm475_vm3, %v4824_v7, %v4825_v23  ;;  %v3132_v7 = vld [vmem:[%s7726_s4 + $0x18] sm:$0xff] }
 0x27d   : > { %5057 = vrot.lane.b32.xlu1 %v6240_v63, %s5443_s17 }
 0x27e   : > { %5047 = vrot.lane.b32.xlu2 %v5046_v45, %s5443_s17  ;;  %5052 = vrot.lane.b32.xlu0 %v5051_v4, %s5443_s17  ;;  %v1828_v45 = vsel %vm475_vm3, %v4829_v52, %v4830_v36  ;;  %v5086_v4 = vpack.i.bf16 %v6136_v51, %v6140_v22 }
 0x27f   : > { %v4848_v6 = vpop.permute.xlu1 %4847  ;;  %v6316_v13 = vpop.permute.xlu2 %4882 }
 0x280   : > { %v4843_v35 = vpop.permute.xlu0 %4842  ;;  %v4849_v11 = vunpack.i.l.bf16 %v4848_v6  ;;  %v4884_v36 = vunpack.i.l.bf16 %v6316_v13 }
 0x281   : > { %v4845_v32 = vunpack.i.h.bf16 %v4843_v35  ;;  %v4844_v1 = vunpack.i.l.bf16 %v4843_v35 }
 0x282   : > { %4599 = vmatmul.msk.f32.gmra.mxu1 %vm1694_vm10, %v4587_v55 }
 0x283   : > { %4591 = vmatmul.msk.f32.gmra.mxu3 %vm1694_vm10, %v4587_v55  ;;  %v1831_v8 = vsel %vm475_vm3, %v4844_v1, %v4845_v32  ;;  %v1615_v32 = vld [vmem:[%s7725_s3 + $0x10] sm:$0xff] }
 0x284   : > { %4595 = vmatmul.msk.f32.gmra.mxu0 %vm1694_vm10, %v4587_v55 }
 0x285   : > { %5072 = vrot.lane.b32.xlu1 %v6225_v12, %s5444_s18  ;;  %v4588_v12 = vld [vmem:[%s7725_s3 + $0x30] sm:$0xff] }
 0x286   : > { %5062 = vrot.lane.b32.xlu2 %v6244_v21, %s5444_s18  ;;  %5067 = vrot.lane.b32.xlu0 %v6221_v41, %s5444_s18  ;;  %v5076_v21 = vpack.i.bf16 %v6140_v22, %v6140_v22  ;;  %v4850_v41 = vunpack.i.h.bf16 %v4848_v6  ;;  %v5091_v6 = vpack.i.bf16 %v6106_v43, %v6140_v22  ;;  %v1614_v22 = vld [vmem:[%s7725_s3 + $0x8] sm:$0xff] }
 0x287   : > { %v4863_v63 = vpop.permute.xlu1 %4862  ;;  %v6330_v26 = vpop.permute.xlu2 %4897 }
 0x288   : > { %v4865_v24 = vunpack.i.h.bf16 %v4863_v63  ;;  %v4864_v33 = vunpack.i.l.bf16 %v4863_v63  ;;  %v4900_v59 = vunpack.i.h.bf16 %v6330_v26  ;;  %v4899_v2 = vunpack.i.l.bf16 %v6330_v26  ;;  %v4858_v40 = vpop.permute.xlu0 %4857 }
 0x289   : > { %v4860_v58 = vunpack.i.h.bf16 %v4858_v40  ;;  %v4859_v57 = vunpack.i.l.bf16 %v4858_v40  ;;  %v1832_v61 = vsel %vm475_vm3, %v4849_v11, %v4850_v41  ;;  %v1833_v15 = vsel %vm475_vm3, %v4850_v41, %v4854_v3  ;;  %v3130_v11 = vld [vmem:[%s7726_s4 + $0x8] sm:$0xff] }
 0x28a   : > { %v1837_v9 = vsel %vm475_vm3, %v4864_v33, %v4865_v24  ;;  %v1995_v14 = vsel %vm597_vm4, %v4899_v2, %v4900_v59  ;;  %4600 = vmatmul.msk.f32.gmra.mxu1 %vm1694_vm10, %v4588_v12  ;;  %v4869_v41 = vunpack.i.l.bf16 %v6293_v5 }
 0x28b   : > { %4592 = vmatmul.msk.f32.gmra.mxu3 %vm1694_vm10, %v4588_v12  ;;  %v1835_v44 = vsel %vm475_vm3, %v4859_v57, %v4860_v58  ;;  %v1836_v18 = vsel %vm475_vm3, %v4860_v58, %v4864_v33  ;;  %1932 = vmatpush.msra.mxu0 %v1837_v9  ;;  %v3131_v58 = vld [vmem:[%s7726_s4 + $0x10] sm:$0xff]  ;;  %v3129_v57 = vld [vmem:[%s7726_s4] sm:$0xff] }
 0x28c   : > { %4596 = vmatmul.msk.f32.gmra.mxu0 %vm1694_vm10, %v4588_v12  ;;  %1874 = vmatpush.msrb.mxu2 %v1835_v44 }
 0x28d   : > { %1903 = vmatpush.msrb.mxu3 %v1836_v18  ;;  %2034 = vmatpush.msra.mxu1 %v1995_v14 }
 0x28e   : > { %5097 = vrot.lane.b32.xlu1 %v5096_v39, %s5444_s18  ;;  %5077 = vrot.lane.b32.xlu2 %v5076_v21, %s5443_s17 }
 0x28f   : > { %5082 = vrot.lane.b32.xlu0 %v6212_v0, %s5444_s18  ;;  %1875 = vmatpush.msrb.mxu2 %v1832_v61  ;;  %v6365_v56 = vpop.permute.xlu1 %4877  ;;  %v6367_v10 = vpop.permute.xlu2 %4907  ;;  %v1830_v0 = vsel %vm475_vm3, %v4840_v47, %v4844_v1  ;;  %v4885_v61 = vunpack.i.h.bf16 %v6316_v13 }
 0x290   : > { %1904 = vmatpush.msrb.mxu3 %v1833_v15  ;;  %1933 = vmatpush.msra.mxu0 %v1834_v31  ;;  %v6369_v50 = vpop.permute.xlu0 %4872  ;;  %v4880_v2 = vunpack.i.h.bf16 %v6365_v56  ;;  %v4879_v40 = vunpack.i.l.bf16 %v6365_v56 }
 0x291   : > { %1876 = vmatpush.msrb.mxu2 %v1829_v16  ;;  %v4874_v52 = vunpack.i.l.bf16 %v6369_v50 }
 0x292   : > { %1905 = vmatpush.msrb.mxu3 %v1830_v0  ;;  %1934 = vmatpush.msra.mxu0 %v1831_v8  ;;  %v1989_v9 = vsel %vm597_vm4, %v4879_v40, %v4880_v2  ;;  %v6458_v0 = vld [vmem:[%s7725_s3 + $0x48] sm:$0xff]  ;;  %v1991_v8 = vsel %vm597_vm4, %v4884_v36, %v4885_v61 }
 0x293   : > { %1877 = vmatpush.msrb.mxu2 %v1826_v30  ;;  %4593 = vmatmul.msk.f32.gmra.mxu3 %vm1694_vm10, %v4589_v29 }
 0x294   : > { %1906 = vmatpush.msrb.mxu3 %v1827_v48  ;;  %1935 = vmatpush.msra.mxu0 %v1828_v45  ;;  %v1616_v48 = vld [vmem:[%s7725_s3 + $0x18] sm:$0xff] }
 0x295   : > { %4597 = vmatmul.msk.f32.gmra.mxu0 %vm1694_vm10, %v4589_v29  ;;  %4602 = vmatmul.msk.f32.vlgmr.msrb.gmra.mxu2 %vm1694_vm10, %v1613_v25 }
 0x296   : > { %5102 = vrot.lane.b32.xlu1 %v5076_v21, %s5444_s18  ;;  %5087 = vrot.lane.b32.xlu2 %v5086_v4, %s5444_s18  ;;  %v4870_v21 = vunpack.i.h.bf16 %v6293_v5  ;;  %v6424_v5 = vld [vmem:[%s7725_s3 + $0x40] sm:$0xff] }
 0x297   : > { %5092 = vrot.lane.b32.xlu0 %v5091_v6, %s5444_s18  ;;  %v4893_v35 = vpop.permute.xlu1 %4892  ;;  %v6393_v55 = vpop.permute.xlu2 %4927  ;;  %4601 = vmatmul.msk.f32.gmra.mxu1 %vm1694_vm10, %v4589_v29  ;;  %v1990_v29 = vsel %vm597_vm4, %v4880_v2, %v4884_v36 }
 0x298   : > { %v4888_v63 = vpop.permute.xlu0 %4887  ;;  %v1986_v44 = vsel %vm597_vm4, %v4869_v41, %v4870_v21  ;;  %v4894_v18 = vunpack.i.l.bf16 %v4893_v35  ;;  %v4895_v39 = vunpack.i.h.bf16 %v4893_v35  ;;  %v1987_v30 = vsel %vm597_vm4, %v4870_v21, %v4874_v52  ;;  %v6478_v35 = vld [vmem:[%s7725_s3 + $0x50] sm:$0xff] }
 0x299   : > { %v4890_v24 = vunpack.i.h.bf16 %v4888_v63  ;;  %v4889_v33 = vunpack.i.l.bf16 %v4888_v63  ;;  %v4930_v2 = vunpack.i.h.bf16 %v6393_v55  ;;  %v4929_v40 = vunpack.i.l.bf16 %v6393_v55 }
 0x29a   : > { %v1994_v13 = vsel %vm597_vm4, %v4894_v18, %v4895_v39 }
 0x29b   : > { %4606 = vmatmul.msk.f32.vlgmr.msrb.gmra.mxu3 %vm1694_vm10, %v1613_v25  ;;  %v1992_v12 = vsel %vm597_vm4, %v4889_v33, %v4890_v24  ;;  %v1993_v26 = vsel %vm597_vm4, %v4890_v24, %v4894_v18 }
 0x29c   : > { %2035 = vmatpush.msra.mxu1 %v1992_v12 }
 0x29d   : > { %4603 = vmatmul.msk.f32.gmra.mxu2 %vm1694_vm10, %v1614_v22  ;;  %4610 = vmatmul.msk.f32.vlgmr.msra.gmra.mxu0 %vm1694_vm10, %v1613_v25 }
 0x29e   : > { %3145 = vperm.xlu1 %4785, %v3131_v58   ;;  %3135 = vperm.xlu2 %4783, %v3129_v57  }
 0x29f   : > { %3140 = vperm.xlu0 %4784, %v3130_v11   ;;  %2036 = vmatpush.msra.mxu1 %v1989_v9  ;;  %v6417_v14 = vpop.permute.xlu1 %4902  ;;  %v6419_v37 = vpop.permute.xlu2 %4942  ;;  %v4910_v11 = vunpack.i.h.bf16 %v6367_v10  ;;  %v4909_v9 = vunpack.i.l.bf16 %v6367_v10 }
 0x2a0   : > { %v4913_v3 = vpop.permute.xlu0 %4912  ;;  %v4945_v15 = vunpack.i.h.bf16 %v6419_v37  ;;  %v4944_v31 = vunpack.i.l.bf16 %v6419_v37  ;;  %v4904_v37 = vunpack.i.l.bf16 %v6417_v14 }
 0x2a1   : > { %v4915_v47 = vunpack.i.h.bf16 %v4913_v3  ;;  %v4914_v27 = vunpack.i.l.bf16 %v4913_v3  ;;  %2037 = vmatpush.msra.mxu1 %v1986_v44  ;;  %v2164_v3 = vsel %vm731_vm5, %v4929_v40, %v4930_v2 }
 0x2a2   : > { %4618 = vmatmul.msk.f32.vlgmr.msra.gmra.mxu1 %vm1694_vm10, %v6424_v5  ;;  %v2169_v45 = vsel %vm731_vm5, %v4944_v31, %v4945_v15 }
 0x2a3   : > { %4607 = vmatmul.msk.f32.gmra.mxu3 %vm1694_vm10, %v1614_v22  ;;  %v1996_v1 = vsel %vm597_vm4, %v4900_v59, %v4914_v27  ;;  %v1997_v23 = vsel %vm597_vm4, %v4914_v27, %v4915_v47  ;;  %v4875_v59 = vunpack.i.h.bf16 %v6369_v50  ;;  %v6511_v47 = vld [vmem:[%s7725_s3 + $0x58] sm:$0xff] }
 0x2a4   : > { %2063 = vmatpush.msra.mxu2 %v1996_v1  ;;  %2092 = vmatpush.msra.mxu3 %v1997_v23 }
 0x2a5   : > { %4604 = vmatmul.msk.f32.gmra.mxu2 %vm1694_vm10, %v1615_v32  ;;  %4611 = vmatmul.msk.f32.gmra.mxu0 %vm1694_vm10, %v1614_v22  ;;  %v1988_v25 = vsel %vm597_vm4, %v4874_v52, %v4875_v59 }
 0x2a6   : > { %3150 = vperm.xlu2 %4783, %v3132_v7   ;;  %2064 = vmatpush.msra.mxu2 %v1993_v26  ;;  %v6524_v7 = vld [vmem:[%s7725_s3 + $0x60] sm:$0xff] }
 0x2a7   : > { %2093 = vmatpush.msra.mxu3 %v1994_v13  ;;  %v6450_v56 = vpop.permute.xlu1 %4922  ;;  %v6452_v16 = vpop.permute.xlu2 %4957 }
 0x2a8   : > { %v4918_v50 = vpop.permute.xlu0 %4917  ;;  %2065 = vmatpush.msra.mxu2 %v1990_v29  ;;  %v4924_v58 = vunpack.i.l.bf16 %v6450_v56 }
 0x2a9   : > { %2094 = vmatpush.msra.mxu3 %v1991_v8  ;;  %v4920_v21 = vunpack.i.h.bf16 %v4918_v50  ;;  %v4919_v41 = vunpack.i.l.bf16 %v4918_v50 }
 0x2aa   : > { %4619 = vmatmul.msk.f32.gmra.mxu1 %vm1694_vm10, %v6458_v0  ;;  %2066 = vmatpush.msra.mxu2 %v1987_v30 }
 0x2ab   : > { %2095 = vmatpush.msra.mxu3 %v1988_v25  ;;  %v2162_v39 = vsel %vm731_vm5, %v4920_v21, %v4924_v58  ;;  %v4960_v25 = vunpack.i.h.bf16 %v6452_v16 }
 0x2ac   : > { %2264 = vmatpush.msrb.mxu2 %v2169_v45  ;;  %4608 = vmatmul.msk.f32.gmra.mxu3 %vm1694_vm10, %v1615_v32 }
 0x2ad   : > { %4605 = vmatmul.msk.f32.gmra.mxu2 %vm1694_vm10, %v1616_v48  ;;  %4612 = vmatmul.msk.f32.gmra.mxu0 %vm1694_vm10, %v1615_v32  ;;  %v2160_v32 = vsel %vm731_vm5, %v4909_v9, %v4910_v11 }
 0x2ae   : > { %2322 = vmatpush.msrb.mxu3 %v6151_v34  ;;  %v4925_v34 = vunpack.i.h.bf16 %v6450_v56  ;;  %v6566_v56 = vld [vmem:[%s7725_s3 + $0x70] sm:$0xff] }
 0x2af   : > { %v4938_v4 = vpop.permute.xlu1 %4937  ;;  %v6473_v6 = vpop.permute.xlu2 %4972 }
 0x2b0   : > { %2323 = vmatpush.msrb.mxu3 %v6128_v49  ;;  %v4940_v63 = vunpack.i.h.bf16 %v4938_v4  ;;  %v4939_v24 = vunpack.i.l.bf16 %v4938_v4  ;;  %v4933_v33 = vpop.permute.xlu0 %4932  ;;  %v2163_v10 = vsel %vm731_vm5, %v4924_v58, %v4925_v34 }
 0x2b1   : > { %v4935_v22 = vunpack.i.h.bf16 %v4933_v33  ;;  %v4934_v12 = vunpack.i.l.bf16 %v4933_v33 }
 0x2b2   : > { %2324 = vmatpush.msrb.mxu3 %v6082_v17  ;;  %4620 = vmatmul.msk.f32.gmra.mxu1 %vm1694_vm10, %v6478_v35  ;;  %v2167_v49 = vsel %vm731_vm5, %v4939_v24, %v4940_v63  ;;  %v2168_v57 = vsel %vm731_vm5, %v4940_v63, %v4944_v31  ;;  %v4905_v17 = vunpack.i.h.bf16 %v6417_v14  ;;  %v2161_v14 = vsel %vm731_vm5, %v4919_v41, %v4920_v21  ;;  %v6606_v41 = vld [vmem:[%s7725_s3 + $0x78] sm:$0xff] }
 0x2b3   : > { %2206 = vmatpush.msrb.mxu0 %v2167_v49  ;;  %2235 = vmatpush.msrb.mxu1 %v2168_v57  ;;  %v2166_v55 = vsel %vm731_vm5, %v4934_v12, %v4935_v22  ;;  %v2165_v44 = vsel %vm731_vm5, %v4930_v2, %v4934_v12  ;;  %v4974_v31 = vunpack.i.l.bf16 %v6473_v6 }
 0x2b4   : > { %2325 = vmatpush.msrb.mxu3 %v6042_v53  ;;  %2265 = vmatpush.msrb.mxu2 %v2166_v55  ;;  %v2158_v1 = vsel %vm731_vm5, %v4904_v37, %v4905_v17  ;;  %v2159_v23 = vsel %vm731_vm5, %v4905_v17, %v4909_v9 }
 0x2b5   : > { %4609 = vmatmul.msk.f32.gmra.mxu3 %vm1694_vm10, %v1616_v48  ;;  %4613 = vmatmul.msk.f32.gmra.mxu0 %vm1694_vm10, %v1616_v48  ;;  %v4959_v48 = vunpack.i.l.bf16 %v6452_v16 }
 0x2b6   : > { %4622 = vmatmul.msk.f32.vlgmr.msra.gmra.mxu2 %vm1694_vm10, %v6424_v5  ;;  %2207 = vmatpush.msrb.mxu0 %v2164_v3 }
 0x2b7   : > { %2236 = vmatpush.msrb.mxu1 %v2165_v44  ;;  %2266 = vmatpush.msrb.mxu2 %v2163_v10  ;;  %v6503_v53 = vpop.permute.xlu1 %4952  ;;  %v6505_v18 = vpop.permute.xlu2 %4987  ;;  %v2481_v12 = vsel %vm995_vm6, %v4959_v48, %v4960_v25  ;;  %v4646_v44 = vld [vmem:[%s7725_s3 + $0x80] sm:$0xff] }
 0x2b8   : > { %v6513_v27 = vpop.permute.xlu0 %4947  ;;  %2208 = vmatpush.msrb.mxu0 %v2161_v14  ;;  %v4954_v4 = vunpack.i.l.bf16 %v6503_v53  ;;  %v4955_v24 = vunpack.i.h.bf16 %v6503_v53  ;;  %v4990_v10 = vunpack.i.h.bf16 %v6505_v18  ;;  %v4989_v53 = vunpack.i.l.bf16 %v6505_v18 }
 0x2b9   : > { %2237 = vmatpush.msrb.mxu1 %v2162_v39  ;;  %2267 = vmatpush.msrb.mxu2 %v2160_v32  ;;  %v4949_v33 = vunpack.i.l.bf16 %v6513_v27 }
 0x2ba   : > { %4621 = vmatmul.msk.f32.gmra.mxu1 %vm1694_vm10, %v6511_v47  ;;  %2209 = vmatpush.msrb.mxu0 %v2158_v1  ;;  %v2480_v21 = vsel %vm995_vm6, %v4954_v4, %v4955_v24  ;;  %v2650_v32 = vsel %vm1129_vm7, %v4989_v53, %v4990_v10 }
 0x2bb   : > { %2238 = vmatpush.msrb.mxu1 %v2159_v23 }
 0x2bc   : > { %2351 = vmatpush.msra.mxu0 %v6166_v28 }
 0x2bd   : > { %2380 = vmatpush.msra.mxu1 %v6169_v54  ;;  %4626 = vmatmul.msk.f32.vlgmr.msra.gmra.mxu3 %vm1694_vm10, %v6424_v5  ;;  %v6546_v54 = vld [vmem:[%s7725_s3 + $0x68] sm:$0xff] }
 0x2be   : > { %4634 = vmatmul.msk.f32.vlgmr.msrb.gmra.mxu0 %vm1694_vm10, %v6524_v7  ;;  %4623 = vmatmul.msk.f32.gmra.mxu2 %vm1694_vm10, %v6458_v0 }
 0x2bf   : > { %2352 = vmatpush.msra.mxu0 %v6154_v62  ;;  %2381 = vmatpush.msra.mxu1 %v6157_v20  ;;  %v4968_v61 = vpop.permute.xlu1 %4967  ;;  %v6536_v36 = vpop.permute.xlu2 %5002 }
 0x2c0   : > { %v4963_v28 = vpop.permute.xlu0 %4962  ;;  %v4970_v26 = vunpack.i.h.bf16 %v4968_v61  ;;  %v4969_v13 = vunpack.i.l.bf16 %v4968_v61 }
 0x2c1   : > { %2353 = vmatpush.msra.mxu0 %v6133_v60  ;;  %2382 = vmatpush.msra.mxu1 %v6136_v51  ;;  %v4964_v50 = vunpack.i.l.bf16 %v4963_v28  ;;  %v4965_v45 = vunpack.i.h.bf16 %v4963_v28  ;;  %v4647_v28 = vld [vmem:[%s7725_s3 + $0x88] sm:$0xff] }
 0x2c2   : > { %4638 = vmatmul.msk.f32.vlgmr.msrb.gmra.mxu1 %vm1694_vm10, %v6524_v7  ;;  %v2485_v63 = vsel %vm995_vm6, %v4970_v26, %v4974_v31  ;;  %v2484_v16 = vsel %vm995_vm6, %v4969_v13, %v4970_v26 }
 0x2c3   : > { %2354 = vmatpush.msra.mxu0 %v6102_v42  ;;  %2383 = vmatpush.msra.mxu1 %v6106_v43  ;;  %v4975_v43 = vunpack.i.h.bf16 %v6473_v6  ;;  %v4950_v6 = vunpack.i.h.bf16 %v6513_v27  ;;  %v2482_v40 = vsel %vm995_vm6, %v4960_v25, %v4964_v50  ;;  %v2483_v34 = vsel %vm995_vm6, %v4964_v50, %v4965_v45 }
 0x2c5   : > { %4627 = vmatmul.msk.f32.gmra.mxu3 %vm1694_vm10, %v6458_v0  ;;  %v2486_v2 = vsel %vm995_vm6, %v4974_v31, %v4975_v43  ;;  %v2479_v49 = vsel %vm995_vm6, %v4950_v6, %v4954_v4  ;;  %v2478_v57 = vsel %vm995_vm6, %v4949_v33, %v4950_v6 }
 0x2c6   : > { %4635 = vmatmul.msk.f32.gmra.mxu0 %vm1694_vm10, %v6546_v54  ;;  %4624 = vmatmul.msk.f32.gmra.mxu2 %vm1694_vm10, %v6478_v35 }
 0x2c7   : > { %v4983_v60 = vpop.permute.xlu1 %4982  ;;  %v6555_v51 = vpop.permute.xlu2 %5017 }
 0x2c8   : > { %v4985_v42 = vunpack.i.h.bf16 %v4983_v60  ;;  %v4984_v62 = vunpack.i.l.bf16 %v4983_v60  ;;  %v5020_v20 = vunpack.i.h.bf16 %v6555_v51  ;;  %v5019_v5 = vunpack.i.l.bf16 %v6555_v51  ;;  %v4978_v52 = vpop.permute.xlu0 %4977 }
 0x2c9   : > { %v4980_v59 = vunpack.i.h.bf16 %v4978_v52  ;;  %v4979_v15 = vunpack.i.l.bf16 %v4978_v52  ;;  %v5005_v60 = vunpack.i.h.bf16 %v6536_v36 }
 0x2ca   : > { %4639 = vmatmul.msk.f32.gmra.mxu1 %vm1694_vm10, %v6546_v54  ;;  %v2489_v29 = vsel %vm995_vm6, %v4984_v62, %v4985_v42  ;;  %v2659_v0 = vsel %vm1129_vm7, %v5019_v5, %v5020_v20 }
 0x2cb   : > { %v2487_v8 = vsel %vm995_vm6, %v4979_v15, %v4980_v59  ;;  %v2488_v30 = vsel %vm995_vm6, %v4980_v59, %v4984_v62  ;;  %2584 = vmatpush.msrb.mxu0 %v2489_v29  ;;  %2698 = vmatpush.msrb.mxu1 %v2659_v0  ;;  %v4648_v0 = vld [vmem:[%s7725_s3 + $0x90] sm:$0xff] }
 0x2cc   : > { %2526 = vmatpush.msra.mxu2 %v2487_v8  ;;  %2555 = vmatpush.msra.mxu3 %v2488_v30 }
 0x2cd   : > { %4628 = vmatmul.msk.f32.gmra.mxu3 %vm1694_vm10, %v6478_v35  ;;  %2585 = vmatpush.msrb.mxu0 %v2486_v2 }
 0x2ce   : > { %4636 = vmatmul.msk.f32.gmra.mxu0 %vm1694_vm10, %v6566_v56  ;;  %4625 = vmatmul.msk.f32.gmra.mxu2 %vm1694_vm10, %v6511_v47 }
 0x2cf   : > { %2556 = vmatpush.msra.mxu3 %v2485_v63  ;;  %2527 = vmatpush.msra.mxu2 %v2484_v16  ;;  %v6589_v35 = vpop.permute.xlu1 %4997  ;;  %v4649_v16 = vld [vmem:[%s7725_s3 + $0x98] sm:$0xff] }
 0x2d0   : > { %v6592_v22 = vpop.permute.xlu0 %4992  ;;  %v6596_v58 = vpop.permute.xlu2 %5027  ;;  %2586 = vmatpush.msrb.mxu0 %v2483_v34  ;;  %v5000_v9 = vunpack.i.h.bf16 %v6589_v35  ;;  %v4999_v17 = vunpack.i.l.bf16 %v6589_v35 }
 0x2d1   : > { %2557 = vmatpush.msra.mxu3 %v2482_v40  ;;  %2528 = vmatpush.msra.mxu2 %v2481_v12  ;;  %v4995_v5 = vunpack.i.h.bf16 %v6592_v22  ;;  %v4994_v52 = vunpack.i.l.bf16 %v6592_v22  ;;  %v4662_v40 = vld [vmem:[%s7725_s3 + $0xa0] sm:$0xff] }
 0x2d2   : > { %4640 = vmatmul.msk.f32.gmra.mxu1 %vm1694_vm10, %v6566_v56  ;;  %2587 = vmatpush.msrb.mxu0 %v2480_v21  ;;  %v2653_v27 = vsel %vm1129_vm7, %v4999_v17, %v5000_v9 }
 0x2d3   : > { %2558 = vmatpush.msra.mxu3 %v2479_v49  ;;  %2529 = vmatpush.msra.mxu2 %v2478_v57  ;;  %v2652_v29 = vsel %vm1129_vm7, %v4994_v52, %v4995_v5 }
 0x2d5   : > { %4629 = vmatmul.msk.f32.gmra.mxu3 %vm1694_vm10, %v6511_v47 }
 0x2d6   : > { %4637 = vmatmul.msk.f32.gmra.mxu0 %vm1694_vm10, %v6606_v41  ;;  %4642 = vmatmul.msk.f32.vlgmr.msrb.gmra.mxu2 %vm1694_vm10, %v6524_v7 }
 0x2d7   : > { %v5013_v55 = vpop.permute.xlu1 %5012 }
 0x2d8   : > { %v5008_v11 = vpop.permute.xlu0 %5007  ;;  %v6623_v14 = vpop.permute.xlu2 %5047  ;;  %v5015_v1 = vunpack.i.h.bf16 %v5013_v55  ;;  %v5014_v23 = vunpack.i.l.bf16 %v5013_v55 }
 0x2d9   : > { %v5010_v37 = vunpack.i.h.bf16 %v5008_v11  ;;  %v5009_v3 = vunpack.i.l.bf16 %v5008_v11  ;;  %v5049_v59 = vunpack.i.l.bf16 %v6623_v14  ;;  %v5050_v25 = vunpack.i.h.bf16 %v6623_v14 }
 0x2da   : > { %4641 = vmatmul.msk.f32.gmra.mxu1 %vm1694_vm10, %v6606_v41 }
 0x2db   : > { %v2656_v47 = vsel %vm1129_vm7, %v5009_v3, %v5010_v37  ;;  %v2657_v51 = vsel %vm1129_vm7, %v5010_v37, %v5014_v23  ;;  %v5030_v37 = vunpack.i.h.bf16 %v6596_v58  ;;  %v5029_v3 = vunpack.i.l.bf16 %v6596_v58 }
 0x2dc   : > { %2699 = vmatpush.msrb.mxu1 %v2656_v47 }
 0x2dd   : > { %4650 = vmatmul.msk.f32.vlgmr.msrb.gmra.mxu3 %vm1694_vm10, %v4646_v44 }
 0x2de   : > { %4654 = vmatmul.msk.f32.vlgmr.msra.gmra.mxu0 %vm1694_vm10, %v4646_v44  ;;  %4643 = vmatmul.msk.f32.gmra.mxu2 %vm1694_vm10, %v6546_v54  ;;  %v5004_v54 = vunpack.i.l.bf16 %v6536_v36  ;;  %v2658_v36 = vsel %vm1129_vm7, %v5014_v23, %v5015_v1  ;;  %v4663_v1 = vld [vmem:[%s7725_s3 + $0xa8] sm:$0xff]  ;;  %v2824_v23 = vsel %vm1263_vm8, %v5029_v3, %v5030_v37 }
 0x2df   : > { %2700 = vmatpush.msrb.mxu1 %v2653_v27  ;;  %v6631_v39 = vpop.permute.xlu1 %5022 }
 0x2e0   : > { %v5033_v18 = vpop.permute.xlu0 %5032  ;;  %v6646_v43 = vpop.permute.xlu2 %5062  ;;  %v2655_v26 = vsel %vm1129_vm7, %v5004_v54, %v5005_v60  ;;  %v2654_v13 = vsel %vm1129_vm7, %v5000_v9, %v5004_v54  ;;  %v5025_v2 = vunpack.i.h.bf16 %v6631_v39  ;;  %v5024_v35 = vunpack.i.l.bf16 %v6631_v39 }
 0x2e1   : > { %2701 = vmatpush.msrb.mxu1 %v2650_v32  ;;  %v5035_v7 = vunpack.i.h.bf16 %v5033_v18  ;;  %v5034_v61 = vunpack.i.l.bf16 %v5033_v18  ;;  %v5065_v14 = vunpack.i.h.bf16 %v6646_v43  ;;  %v5064_v47 = vunpack.i.l.bf16 %v6646_v43 }
 0x2e2   : > { %4658 = vmatmul.msk.f32.vlgmr.msra.gmra.mxu1 %vm1694_vm10, %v4646_v44  ;;  %v2822_v9 = vsel %vm1263_vm8, %v5024_v35, %v5025_v2  ;;  %v2823_v58 = vsel %vm1263_vm8, %v5025_v2, %v5029_v3  ;;  %v4694_v3 = vld [vmem:[%s7725_s3 + $0xe0] sm:$0xff] }
 0x2e3   : > { %v2660_v42 = vsel %vm1129_vm7, %v5020_v20, %v5034_v61  ;;  %v2661_v62 = vsel %vm1129_vm7, %v5034_v61, %v5035_v7  ;;  %v3003_v60 = vsel %vm1397_vm9, %v5064_v47, %v5065_v14  ;;  %v4695_v47 = vld [vmem:[%s7725_s3 + $0xe8] sm:$0xff] }
 0x2e4   : > { %2727 = vmatpush.msrb.mxu2 %v2660_v42  ;;  %2756 = vmatpush.msrb.mxu3 %v2661_v62  ;;  %v6722_v62 = vld [vmem:[%s7725_s3 + $0xc0] sm:$0xff] }
 0x2e5   : > { %4651 = vmatmul.msk.f32.gmra.mxu3 %vm1694_vm10, %v4647_v28 }
 0x2e6   : > { %4655 = vmatmul.msk.f32.gmra.mxu0 %vm1694_vm10, %v4647_v28  ;;  %4644 = vmatmul.msk.f32.gmra.mxu2 %vm1694_vm10, %v6566_v56  ;;  %v2651_v56 = vsel %vm1129_vm7, %v4990_v10, %v4994_v52 }
 0x2e7   : > { %2757 = vmatpush.msrb.mxu3 %v2658_v36  ;;  %2728 = vmatpush.msrb.mxu2 %v2657_v51  ;;  %v6654_v20 = vpop.permute.xlu1 %5042 }
 0x2e8   : > { %v5045_v15 = vunpack.i.h.bf16 %v6654_v20  ;;  %v5038_v31 = vpop.permute.xlu0 %5037  ;;  %v5078_v8 = vpop.permute.xlu2 %5077  ;;  %v5044_v34 = vunpack.i.l.bf16 %v6654_v20 }
 0x2e9   : > { %2758 = vmatpush.msrb.mxu3 %v2655_v26  ;;  %2729 = vmatpush.msrb.mxu2 %v2654_v13  ;;  %v5079_v48 = vunpack.i.l.bf16 %v5078_v8  ;;  %v5040_v4 = vunpack.i.h.bf16 %v5038_v31  ;;  %v5039_v6 = vunpack.i.l.bf16 %v5038_v31  ;;  %v5080_v49 = vunpack.i.h.bf16 %v5078_v8  ;;  %v4664_v13 = vld [vmem:[%s7725_s3 + $0xb0] sm:$0xff] }
 0x2ea   : > { %4659 = vmatmul.msk.f32.gmra.mxu1 %vm1694_vm10, %v4647_v28  ;;  %v2831_v50 = vsel %vm1263_vm8, %v5045_v15, %v5049_v59 }
 0x2eb   : > { %2759 = vmatpush.msrb.mxu3 %v2652_v29  ;;  %2730 = vmatpush.msrb.mxu2 %v2651_v56  ;;  %v2825_v21 = vsel %vm1263_vm8, %v5039_v6, %v5040_v4  ;;  %v2826_v53 = vsel %vm1263_vm8, %v5040_v4, %v5044_v34 }
 0x2ec   : > { %2870 = vmatpush.msra.mxu0 %v2831_v50 }
 0x2ed   : > { %4652 = vmatmul.msk.f32.gmra.mxu3 %vm1694_vm10, %v4648_v0 }
 0x2ee   : > { %4656 = vmatmul.msk.f32.gmra.mxu0 %vm1694_vm10, %v4648_v0  ;;  %4645 = vmatmul.msk.f32.gmra.mxu2 %vm1694_vm10, %v6606_v41 }
 0x2ef   : > { %v5058_v30 = vpop.permute.xlu1 %5057 }
 0x2f0   : > { %v5053_v45 = vpop.permute.xlu0 %5052  ;;  %v5059_v33 = vunpack.i.l.bf16 %v5058_v30  ;;  %v5060_v41 = vunpack.i.h.bf16 %v5058_v30  ;;  %v5088_v7 = vpop.permute.xlu2 %5087 }
 0x2f1   : > { %v5055_v63 = vunpack.i.h.bf16 %v5053_v45  ;;  %v5054_v24 = vunpack.i.l.bf16 %v5053_v45  ;;  %v5089_v43 = vunpack.i.l.bf16 %v5088_v7  ;;  %v5090_v50 = vunpack.i.h.bf16 %v5088_v7 }
 0x2f2   : > { %4660 = vmatmul.msk.f32.gmra.mxu1 %vm1694_vm10, %v4648_v0  ;;  %v2830_v44 = vsel %vm1263_vm8, %v5059_v33, %v5080_v49  ;;  %v2827_v18 = vsel %vm1263_vm8, %v5044_v34, %v5060_v41  ;;  %v4680_v34 = vld [vmem:[%s7725_s3 + $0xd0] sm:$0xff] }
 0x2f3   : > { %v2828_v22 = vsel %vm1263_vm8, %v5050_v25, %v5054_v24  ;;  %v2832_v12 = vsel %vm1263_vm8, %v5049_v59, %v5055_v63  ;;  %v2833_v57 = vsel %vm1263_vm8, %v5055_v63, %v5079_v48  ;;  %v2829_v55 = vsel %vm1263_vm8, %v5054_v24, %v5059_v33  ;;  %v4679_v25 = vld [vmem:[%s7725_s3 + $0xc8] sm:$0xff]  ;;  %v4665_v33 = vld [vmem:[%s7725_s3 + $0xb8] sm:$0xff] }
 0x2f4   : > { %2871 = vmatpush.msra.mxu0 %v2828_v22  ;;  %2899 = vmatpush.msra.mxu1 %v2832_v12 }
 0x2f5   : > { %4653 = vmatmul.msk.f32.gmra.mxu3 %vm1694_vm10, %v4649_v16 }
 0x2f6   : > { %4657 = vmatmul.msk.f32.gmra.mxu0 %vm1694_vm10, %v4649_v16  ;;  %4666 = vmatmul.msk.f32.vlgmr.msra.gmra.mxu2 %vm1694_vm10, %v4662_v40 }
 0x2f7   : > { %2872 = vmatpush.msra.mxu0 %v2825_v21  ;;  %2928 = vmatpush.msra.mxu2 %v2833_v57  ;;  %v6690_v11 = vpop.permute.xlu1 %5072  ;;  %v6693_v17 = vpop.f32.mrf.mxu1 }
 0x2f8   : > { %2900 = vmatpush.msra.mxu1 %v2829_v55  ;;  %v5068_v10 = vpop.permute.xlu0 %5067  ;;  %v5075_v61 = vunpack.i.h.bf16 %v6690_v11  ;;  %v5074_v28 = vunpack.i.l.bf16 %v6690_v11  ;;  %v4681_v11 = vld [vmem:[%s7725_s3 + $0xd8] sm:$0xff] }
 0x2f9   : > { %2873 = vmatpush.msra.mxu0 %v2822_v9  ;;  %2929 = vmatpush.msra.mxu2 %v2830_v44  ;;  %v6701_v27 = vpop.f32.mrf.mxu0  ;;  %v5070_v39 = vunpack.i.h.bf16 %v5068_v10  ;;  %v5069_v32 = vunpack.i.l.bf16 %v5068_v10 }
 0x2fa   : > { %2901 = vmatpush.msra.mxu1 %v2826_v53  ;;  %v2997_v26 = vsel %vm1397_vm9, %v5074_v28, %v5075_v61  ;;  %v2998_v45 = vsel %vm1397_vm9, %v5075_v61, %v5090_v50 }
 0x2fb   : > { %4661 = vmatmul.msk.f32.gmra.mxu1 %vm1694_vm10, %v4649_v16  ;;  %2930 = vmatpush.msra.mxu2 %v2827_v18  ;;  %v3000_v54 = vsel %vm1397_vm9, %v5069_v32, %v5070_v39 }
 0x2fc   : > { %2902 = vmatpush.msra.mxu1 %v2823_v58 }
 0x2fd   : > { %2931 = vmatpush.msra.mxu2 %v2824_v23  ;;  %4670 = vmatmul.msk.f32.vlgmr.msra.gmra.mxu3 %vm1694_vm10, %v4662_v40 }
 0x2fe   : > { %4667 = vmatmul.msk.f32.gmra.mxu2 %vm1694_vm10, %v4663_v1  ;;  %4674 = vmatmul.msk.f32.vlgmr.msrb.gmra.mxu0 %vm1694_vm10, %v4662_v40  ;;  %v6717_v42 = vpop.f32.mrf.mxu3 }
 0x2ff   : > { %3042 = vmatpush.msra.mxu3 %v3003_v60  ;;  %v6724_v52 = vpop.f32.mrf.mxu1  ;;  %v4697_v60 = vld [vmem:[%s7725_s3 + $0xf8] sm:$0xff] }
 0x300   : > { %v5098_v5 = vpop.permute.xlu1 %5097 }
 0x301   : > { %3043 = vmatpush.msra.mxu3 %v3000_v54  ;;  %v5099_v36 = vunpack.i.l.bf16 %v5098_v5  ;;  %v5083_v51 = vpop.permute.xlu0 %5082  ;;  %v6726_v20 = vpop.f32.mrf.mxu0  ;;  %v5100_v59 = vunpack.i.h.bf16 %v5098_v5 }
 0x302   : > { %v5085_v15 = vunpack.i.h.bf16 %v5083_v51  ;;  %v5084_v31 = vunpack.i.l.bf16 %v5083_v51 }
 0x303   : > { %4682 = vmatmul.msk.f32.vlgmr.msrb.gmra.mxu1 %vm1694_vm10, %v6722_v62  ;;  %3044 = vmatpush.msra.mxu3 %v2997_v26  ;;  %v3004_v29 = vsel %vm1397_vm9, %v5065_v14, %v5099_v36  ;;  %v3005_v56 = vsel %vm1397_vm9, %v5099_v36, %v5089_v43  ;;  %v3001_v30 = vsel %vm1397_vm9, %v5070_v39, %v5100_v59  ;;  %v4710_v36 = vld [vmem:[%s7725_s3 + $0x100] sm:$0xff] }
 0x304   : > { %v2994_v0 = vsel %vm1397_vm9, %v5084_v31, %v5085_v15  ;;  %3071 = vmatpush.msrb.mxu0 %v3004_v29  ;;  %3100 = vmatpush.msrb.mxu1 %v3005_v56  ;;  %v4711_v29 = vld [vmem:[%s7725_s3 + $0x108] sm:$0xff] }
 0x305   : > { %4671 = vmatmul.msk.f32.gmra.mxu3 %vm1694_vm10, %v4663_v1 }
 0x306   : > { %4668 = vmatmul.msk.f32.gmra.mxu2 %vm1694_vm10, %v4664_v13  ;;  %4675 = vmatmul.msk.f32.gmra.mxu0 %vm1694_vm10, %v4663_v1  ;;  %v6740_v8 = vpop.f32.mrf.mxu3  ;;  %v4696_v1 = vld [vmem:[%s7725_s3 + $0xf0] sm:$0xff] }
 0x307   : > { %3045 = vmatpush.msra.mxu3 %v2994_v0  ;;  %3072 = vmatpush.msrb.mxu0 %v3001_v30  ;;  %v6753_v16 = vpop.f32.mrf.mxu1 }
 0x308   : > { %v5103_v48 = vpop.permute.xlu1 %5102 }
 0x309   : > { %v5093_v4 = vpop.permute.xlu0 %5092  ;;  %v6747_v6 = vpop.f32.mrf.mxu0  ;;  %3073 = vmatpush.msrb.mxu0 %v2998_v45  ;;  %v5104_v2 = vunpack.i.l.bf16 %v5103_v48  ;;  %v5105_v22 = vunpack.i.h.bf16 %v5103_v48 }
 0x30a   : > { %v5095_v63 = vunpack.i.h.bf16 %v5093_v4  ;;  %v5094_v24 = vunpack.i.l.bf16 %v5093_v4 }
 0x30b   : > { %4683 = vmatmul.msk.f32.gmra.mxu1 %vm1694_vm10, %v4679_v25  ;;  %v2999_v49 = vsel %vm1397_vm9, %v5090_v50, %v5104_v2 }
 0x30c   : > { %v2995_v35 = vsel %vm1397_vm9, %v5085_v15, %v5095_v63  ;;  %v3002_v40 = vsel %vm1397_vm9, %v5100_v59, %v5094_v24  ;;  %v2996_v21 = vsel %vm1397_vm9, %v5095_v63, %v5105_v22 }
 0x30d   : > { %4672 = vmatmul.msk.f32.gmra.mxu3 %vm1694_vm10, %v4664_v13  ;;  %3074 = vmatpush.msrb.mxu0 %v2995_v35 }
 0x30e   : > { %4669 = vmatmul.msk.f32.gmra.mxu2 %vm1694_vm10, %v4665_v33  ;;  %4676 = vmatmul.msk.f32.gmra.mxu0 %vm1694_vm10, %v4664_v13  ;;  %v6760_v12 = vpop.f32.mrf.mxu3 }
 0x30f   : > { %3101 = vmatpush.msrb.mxu1 %v3002_v40 }
 0x311   : > { %3102 = vmatpush.msrb.mxu1 %v2999_v49 }
 0x312   : > { %v6766_v57 = vpop.f32.mrf.mxu0 }
 0x313   : > { %4684 = vmatmul.msk.f32.gmra.mxu1 %vm1694_vm10, %v4680_v34 }
 0x314   : > { %3103 = vmatpush.msrb.mxu1 %v2996_v21  ;;  %v6771_v41 = vpop.f32.mrf.mxu1 }
 0x315   : > { %4673 = vmatmul.msk.f32.gmra.mxu3 %vm1694_vm10, %v4665_v33 }
 0x316   : > { %4677 = vmatmul.msk.f32.gmra.mxu0 %vm1694_vm10, %v4665_v33  ;;  %4686 = vmatmul.msk.f32.vlgmr.msrb.gmra.mxu2 %vm1694_vm10, %v6722_v62  ;;  %v6776_v55 = vpop.f32.mrf.mxu3 }
 0x318   : > { %v6781_v9 = vpop.f32.mrf.mxu2 }
 0x31a   : > { %v6783_v37 = vpop.f32.mrf.mxu0 }
 0x31b   : > { %4685 = vmatmul.msk.f32.gmra.mxu1 %vm1694_vm10, %v4681_v11 }
 0x31d   : > { %4690 = vmatmul.msk.f32.vlgmr.msrb.gmra.mxu3 %vm1694_vm10, %v6722_v62 }
 0x31e   : > { %4687 = vmatmul.msk.f32.gmra.mxu2 %vm1694_vm10, %v4679_v25  ;;  %4698 = vmatmul.msk.f32.vlgmr.msra.gmra.mxu0 %vm1694_vm10, %v4694_v3  ;;  %v6793_v44 = vpop.f32.mrf.mxu3 }
 0x31f   : > { %v6795_v10 = vpop.f32.mrf.mxu1 }
 0x320   : > { %v1882_v53 = vpop.f32.mrf.mxu2 }
 0x321   : > { %v1883_v51 = vadd.f32 %v1882_v53, %v6740_v8  ;;  %v1909_v53 = vadd.f32 %v6793_v44, %v6701_v27 }
 0x322   : > { %v6797_v14 = vpop.f32.mrf.mxu0 }
 0x323   : > { %4702 = vmatmul.msk.f32.vlgmr.msra.gmra.mxu1 %vm1694_vm10, %v4694_v3 }
 0x325   : > { %4691 = vmatmul.msk.f32.gmra.mxu3 %vm1694_vm10, %v4679_v25 }
 0x326   : > { %4688 = vmatmul.msk.f32.gmra.mxu2 %vm1694_vm10, %v4680_v34  ;;  %4699 = vmatmul.msk.f32.gmra.mxu0 %vm1694_vm10, %v4695_v47  ;;  %v1911_v39 = vpop.f32.mrf.mxu3 }
 0x327   : > { %v2042_v32 = vpop.f32.mrf.mxu1  ;;  %v1912_v0 = vadd.f32 %v1911_v39, %v6726_v20  ;;  %v4712_v20 = vld [vmem:[%s7725_s3 + $0x110] sm:$0xff] }
 0x328   : > { %v1885_v18 = vpop.f32.mrf.mxu2  ;;  %v2112_v15 = vadd.f32 %v2042_v32, %v1883_v51 }
 0x329   : > { %v1886_v8 = vadd.f32 %v1885_v18, %v6760_v12 }
 0x32a   : > { %v6806_v58 = vpop.f32.mrf.mxu0 }
 0x32b   : > { %4703 = vmatmul.msk.f32.gmra.mxu1 %vm1694_vm10, %v4695_v47 }
 0x32d   : > { %4692 = vmatmul.msk.f32.gmra.mxu3 %vm1694_vm10, %v4680_v34 }
 0x32e   : > { %4689 = vmatmul.msk.f32.gmra.mxu2 %vm1694_vm10, %v4681_v11  ;;  %4700 = vmatmul.msk.f32.gmra.mxu0 %vm1694_vm10, %v4696_v1 }
 0x32f   : > { %v1914_v23 = vpop.f32.mrf.mxu3  ;;  %v2045_v7 = vpop.f32.mrf.mxu1 }
 0x330   : > { %v1888_v61 = vpop.f32.mrf.mxu2  ;;  %v2115_v45 = vadd.f32 %v2045_v7, %v1886_v8  ;;  %v1915_v33 = vadd.f32 %v1914_v23, %v6747_v6  ;;  %v4713_v6 = vld [vmem:[%s7725_s3 + $0x118] sm:$0xff] }
 0x331   : > { %v1889_v35 = vadd.f32 %v1888_v61, %v6776_v55 }
 0x332   : > { %v6815_v28 = vpop.f32.mrf.mxu0 }
 0x333   : > { %4704 = vmatmul.msk.f32.gmra.mxu1 %vm1694_vm10, %v4696_v1 }
 0x335   : > { %4693 = vmatmul.msk.f32.gmra.mxu3 %vm1694_vm10, %v4681_v11 }
 0x336   : > { %4701 = vmatmul.msk.f32.gmra.mxu0 %vm1694_vm10, %v4697_v60  ;;  %4706 = vmatmul.msk.f32.vlgmr.msra.gmra.mxu2 %vm1694_vm10, %v4694_v3 }
 0x337   : > { %v2048_v54 = vpop.f32.mrf.mxu1 }
 0x338   : > { %v1917_v62 = vpop.f32.mrf.mxu3  ;;  %v2118_v34 = vadd.f32 %v2048_v54, %v1889_v35 }
 0x339   : > { %v2068_v5 = vpop.f32.mrf.mxu2  ;;  %v1918_v3 = vadd.f32 %v1917_v62, %v6766_v57  ;;  %v1880_v57 = vadd.f32 %v6781_v9, %v6717_v42  ;;  %v1944_v42 = vadd.f32 %v6806_v58, %v6753_v16 }
 0x33b   : > { %v2211_v43 = vpop.f32.mrf.mxu0  ;;  %4705 = vmatmul.msk.f32.gmra.mxu1 %vm1694_vm10, %v4697_v60  ;;  %v2109_v27 = vadd.f32 %v6795_v10, %v1880_v57 }
 0x33d   : > { %4714 = vmatmul.msk.f32.vlgmr.msra.gmra.mxu3 %vm1694_vm10, %v4710_v36  ;;  %v2281_v44 = vadd.f32 %v2211_v43, %v2109_v27 }
 0x33e   : > { %4707 = vmatmul.msk.f32.gmra.mxu2 %vm1694_vm10, %v4695_v47  ;;  %4718 = vmatmul.msk.f32.vlgmr.msrb.gmra.mxu0 %vm1694_vm10, %v4710_v36  ;;  %v2110_v47 = vadd.f32 %v2068_v5, %v1909_v53 }
 0x33f   : > { %v2240_v26 = vpop.f32.mrf.mxu1 }
 0x340   : > { %v6832_v59 = vpop.f32.mrf.mxu3 }
 0x341   : > { %v2071_v31 = vpop.f32.mrf.mxu2 }
 0x342   : > { %v2113_v50 = vadd.f32 %v2071_v31, %v1912_v0 }
 0x343   : > { %v2214_v13 = vpop.f32.mrf.mxu0  ;;  %4722 = vmatmul.msk.f32.vlgmr.msrb.gmra.mxu1 %vm1694_vm10, %v4710_v36  ;;  %v1941_v36 = vadd.f32 %v6797_v14, %v6724_v52  ;;  %v1947_v14 = vadd.f32 %v6815_v28, %v6771_v41 }
 0x344   : > { %v6838_v56 = vadd.f32 %v2214_v13, %v2112_v15 }
 0x345   : > { %4715 = vmatmul.msk.f32.gmra.mxu3 %vm1694_vm10, %v4711_v29 }
 0x346   : > { %4708 = vmatmul.msk.f32.gmra.mxu2 %vm1694_vm10, %v4696_v1  ;;  %4719 = vmatmul.msk.f32.gmra.mxu0 %vm1694_vm10, %v4711_v29  ;;  %v2282_v1 = vadd.f32 %v2240_v26, %v2110_v47 }
 0x347   : > { %v2243_v30 = vpop.f32.mrf.mxu1 }
 0x348   : > { %v2100_v25 = vpop.f32.mrf.mxu3  ;;  %v2285_v48 = vadd.f32 %v2243_v30, %v2113_v50 }
 0x349   : > { %v2074_v4 = vpop.f32.mrf.mxu2  ;;  %v2114_v15 = vadd.f32 %v2100_v25, %v1941_v36 }
 0x34a   : > { %v2116_v2 = vadd.f32 %v2074_v4, %v1915_v33 }
 0x34b   : > { %v2217_v63 = vpop.f32.mrf.mxu0  ;;  %4723 = vmatmul.msk.f32.gmra.mxu1 %vm1694_vm10, %v4711_v29 }
 0x34c   : > { %v2287_v24 = vadd.f32 %v2217_v63, %v2115_v45 }
 0x34d   : > { %4716 = vmatmul.msk.f32.gmra.mxu3 %vm1694_vm10, %v4712_v20 }
 0x34e   : > { %4709 = vmatmul.msk.f32.gmra.mxu2 %vm1694_vm10, %v4697_v60  ;;  %4720 = vmatmul.msk.f32.gmra.mxu0 %vm1694_vm10, %v4712_v20 }
 0x34f   : > { %v2246_v40 = vpop.f32.mrf.mxu1 }
 0x350   : > { %v2103_v22 = vpop.f32.mrf.mxu3  ;;  %v2288_v12 = vadd.f32 %v2246_v40, %v2116_v2 }
 0x351   : > { %v2077_v49 = vpop.f32.mrf.mxu2  ;;  %v2117_v10 = vadd.f32 %v2103_v22, %v1944_v42 }
 0x352   : > { %v2119_v55 = vadd.f32 %v2077_v49, %v1918_v3 }
 0x353   : > { %v2220_v21 = vpop.f32.mrf.mxu0  ;;  %4724 = vmatmul.msk.f32.gmra.mxu1 %vm1694_vm10, %v4712_v20 }
 0x354   : > { %v2290_v11 = vadd.f32 %v2220_v21, %v2118_v34 }
 0x355   : > { %4717 = vmatmul.msk.f32.gmra.mxu3 %vm1694_vm10, %v4713_v6 }
 0x356   : > { %4721 = vmatmul.msk.f32.gmra.mxu0 %vm1694_vm10, %v4713_v6 }
 0x357   : > { %v2249_v39 = vpop.f32.mrf.mxu1 }
 0x358   : > { %v2106_v32 = vpop.f32.mrf.mxu3  ;;  %v2291_v18 = vadd.f32 %v2249_v39, %v2119_v55 }
 0x359   : > { %v6863_v23 = vpop.f32.mrf.mxu2  ;;  %v2120_v25 = vadd.f32 %v2106_v32, %v1947_v14 }
 0x35b   : > { %v2356_v7 = vpop.f32.mrf.mxu0  ;;  %4725 = vmatmul.msk.f32.gmra.mxu1 %vm1694_vm10, %v4713_v6 }
 0x35c   : > { %v6868_v61 = vadd.f32 %v2356_v7, %v2282_v1 }
 0x35f   : > { %v6871_v60 = vpop.f32.mrf.mxu1 }
 0x360   : > { %v2327_v54 = vpop.f32.mrf.mxu3 }
 0x361   : > { %v2272_v62 = vpop.f32.mrf.mxu2  ;;  %v6873_v5 = vadd.f32 %v2327_v54, %v2281_v44 }
 0x362   : > { %v2286_v9 = vadd.f32 %v2272_v62, %v2114_v15 }
 0x363   : > { %v2359_v51 = vpop.f32.mrf.mxu0 }
 0x364   : > { %v6877_v26 = vadd.f32 %v2359_v51, %v2285_v48 }
 0x367   : > { %v2388_v31 = vpop.f32.mrf.mxu1 }
 0x368   : > { %v2330_v43 = vpop.f32.mrf.mxu3  ;;  %v6881_v13 = vadd.f32 %v2388_v31, %v2286_v9  ;;  %v1938_v9 = vadd.f32 %v6783_v37, %v6693_v17 }
 0x369   : > { %v2275_v29 = vpop.f32.mrf.mxu2  ;;  %v6884_v0 = vadd.f32 %v2330_v43, %v6838_v56 }
 0x36a   : > { %v2289_v50 = vadd.f32 %v2275_v29, %v2117_v10  ;;  %v2111_v10 = vadd.f32 %v6832_v59, %v1938_v9  ;;  %v3136_v59 = vpop.permute.xlu2 %3135 }
 0x36b   : > { %v2362_v8 = vpop.f32.mrf.mxu0 }
 0x36c   : > { %v6886_v52 = vadd.f32 %v2362_v8, %v2288_v12  ;;  %v2283_v43 = vadd.f32 %v6863_v23, %v2111_v10 }
 0x36e   : > { %v2399_v8 = vadd.f32 %v6871_v60, %v2283_v43 }
 0x36f   : > { %v2391_v30 = vpop.f32.mrf.mxu1 }
 0x370   : > { %v2333_v16 = vpop.f32.mrf.mxu3  ;;  %v6890_v58 = vadd.f32 %v2391_v30, %v2289_v50 }
 0x371   : > { %v2278_v48 = vpop.f32.mrf.mxu2  ;;  %v6892_v45 = vadd.f32 %v2333_v16, %v2287_v24 }
 0x372   : > { %v2292_v4 = vadd.f32 %v2278_v48, %v2120_v25 }
 0x373   : > { %v2365_v63 = vpop.f32.mrf.mxu0 }
 0x374   : > { %v6894_v20 = vadd.f32 %v2365_v63, %v2291_v18 }
 0x378   : > { %v2394_v56 = vpop.f32.mrf.mxu1  ;;  %v2336_v33 = vpop.f32.mrf.mxu3 }
 0x379   : > { %v6896_v2 = vadd.f32 %v2394_v56, %v2292_v4  ;;  %v6898_v35 = vadd.f32 %v2336_v33, %v2290_v11  ;;  %v2531_v40 = vpop.f32.mrf.mxu2 }
 0x37a   : > { %v2601_v17 = vadd.f32 %v2531_v40, %v6873_v5 }
 0x37b   : > { %v2589_v41 = vpop.f32.mrf.mxu0 }
 0x37c   : > { %v2603_v16 = vadd.f32 %v2589_v41, %v2399_v8 }
 0x380   : > { %v2703_v28 = vpop.f32.mrf.mxu1  ;;  %v2560_v22 = vpop.f32.mrf.mxu3 }
 0x381   : > { %v2534_v12 = vpop.f32.mrf.mxu2  ;;  %v2602_v29 = vadd.f32 %v2560_v22, %v6868_v61  ;;  %v2773_v56 = vadd.f32 %v2703_v28, %v2601_v17 }
 0x382   : > { %v2604_v28 = vadd.f32 %v2534_v12, %v6884_v0 }
 0x383   : > { %v2592_v34 = vpop.f32.mrf.mxu0 }
 0x388   : > { %v6900_v49 = vpop.f32.mrf.mxu1  ;;  %v2563_v24 = vpop.f32.mrf.mxu3 }
 0x389   : > { %v6902_v21 = vpop.f32.mrf.mxu2  ;;  %v2605_v23 = vadd.f32 %v2563_v24, %v6877_v26 }
 0x38b   : > { %v6904_v6 = vpop.f32.mrf.mxu0 }
 0x390   : > { %v6906_v3 = vpop.f32.mrf.mxu1  ;;  %v2566_v53 = vpop.f32.mrf.mxu3 }
 0x391   : > { %v6908_v55 = vpop.f32.mrf.mxu2 }
 0x393   : > { %v6910_v11 = vpop.f32.mrf.mxu0 }
 0x398   : > { %v6912_v47 = vpop.f32.mrf.mxu1  ;;  %v6914_v39 = vpop.f32.mrf.mxu3 }
 0x399   : > { %v2732_v32 = vpop.f32.mrf.mxu2 }
 0x39a   : > { %v2774_v14 = vadd.f32 %v2732_v32, %v2602_v29 }
 0x39b   : > { %v2875_v18 = vpop.f32.mrf.mxu0 }
 0x39c   : > { %v2945_v22 = vadd.f32 %v2875_v18, %v2773_v56 }
 0x3a0   : > { %v2904_v1 = vpop.f32.mrf.mxu1  ;;  %v2761_v7 = vpop.f32.mrf.mxu3 }
 0x3a1   : > { %v2735_v57 = vpop.f32.mrf.mxu2  ;;  %v2946_v48 = vadd.f32 %v2904_v1, %v2774_v14  ;;  %v2775_v4 = vadd.f32 %v2761_v7, %v2603_v16  ;;  %v2606_v1 = vadd.f32 %v2592_v34, %v6881_v13  ;;  %v3141_v14 = vpop.permute.xlu0 %3140  ;;  %v2608_v13 = vadd.f32 %v2566_v53, %v6886_v52 }
 0x3a2   : > { %v2777_v60 = vadd.f32 %v2735_v57, %v2605_v23 }
 0x3a3   : > { %v2878_v27 = vpop.f32.mrf.mxu0 }
 0x3a8   : > { %v2907_v44 = vpop.f32.mrf.mxu1  ;;  %v2764_v54 = vpop.f32.mrf.mxu3 }
 0x3a9   : > { %v2738_v62 = vpop.f32.mrf.mxu2  ;;  %v2949_v5 = vadd.f32 %v2907_v44, %v2777_v60  ;;  %v2778_v8 = vadd.f32 %v2764_v54, %v2606_v1  ;;  %v3146_v60 = vpop.permute.xlu1 %3145 }
 0x3aa   : > { %v2780_v54 = vadd.f32 %v2738_v62, %v2608_v13  ;;  %v2609_v62 = vadd.f32 %v6904_v6, %v6890_v58 }
 0x3ab   : > { %v6916_v36 = vpop.f32.mrf.mxu0 }
 0x3b0   : > { %v6918_v51 = vpop.f32.mrf.mxu1  ;;  %v6920_v15 = vpop.f32.mrf.mxu3 }
 0x3b1   : > { %v6922_v42 = vpop.f32.mrf.mxu2  ;;  %v2952_v56 = vadd.f32 %v6918_v51, %v2780_v54  ;;  %v2781_v58 = vadd.f32 %v6920_v15, %v2609_v62 }
 0x3b3   : > { %v6926_v31 = vpop.f32.mrf.mxu0 }
 0x3b8   : > { %v6931_v50 = vpop.f32.mrf.mxu1  ;;  %v6934_v30 = vpop.f32.mrf.mxu3 }
 0x3b9   : > { %v2933_v25 = vpop.f32.mrf.mxu2 }
 0x3ba   : > { %v2947_v61 = vadd.f32 %v2933_v25, %v2775_v4  ;;  %v2776_v25 = vadd.f32 %v6900_v49, %v2604_v28 }
 0x3bb   : > { %v3076_v37 = vpop.f32.mrf.mxu0 }
 0x3bc   : > { %v3118_v63 = vadd.f32 %v3076_v37, %v2946_v48  ;;  %v2948_v17 = vadd.f32 %v2878_v27, %v2776_v25 }
 0x3be   : > { %v3154_v33 = vadd.f32 %v3136_v59, %v3118_v63 }
 0x3c0   : > { %v3105_v9 = vpop.f32.mrf.mxu1  ;;  %v3166_v32 = vmax.f32 %v3154_v33, 0.0  ;;  %v3047_v10 = vpop.f32.mrf.mxu3  ;;  %v2607_v33 = vadd.f32 %v6902_v21, %v6892_v45 }
 0x3c1   : > { %v3119_v43 = vadd.f32 %v3105_v9, %v2947_v61  ;;  %v2936_v29 = vpop.f32.mrf.mxu2  ;;  %v3117_v41 = vadd.f32 %v3047_v10, %v2945_v22 }
 0x3c2   : > { %v6940_v40 = vmul.f32 %v3166_v32, %v6079_v19  ;;  %v2950_v34 = vadd.f32 %v2936_v29, %v2778_v8  ;;  %v2779_v32 = vadd.f32 %v6906_v3, %v2607_v33 }
 0x3c3   : > { %v3155_v7 = vadd.f32 %v3136_v59, %v3119_v43  ;;  %v3153_v26 = vadd.f32 %v3136_v59, %v3117_v41  ;;  %v3079_v24 = vpop.f32.mrf.mxu0  ;;  %v6958_v59 = vld [vmem:[#allocation2] sm:$0xff]  ;;  %v2611_v43 = vadd.f32 %v6914_v39, %v6894_v20  ;;  %v2612_v20 = vadd.f32 %v6910_v11, %v6896_v2 }
 0x3c4   : > { %3190 = vst [vmem:[#allocation2 + $0x80] sm:$0xff] %v6940_v40  ;;  %v3121_v57 = vadd.f32 %v3079_v24, %v2949_v5  ;;  %v2951_v41 = vadd.f32 %v6916_v36, %v2779_v32  ;;  %v2610_v36 = vadd.f32 %v6908_v55, %v6898_v35 }
 0x3c5   : > { %v3167_v18 = vmax.f32 %v3155_v7, 0.0  ;;  %v3165_v16 = vmax.f32 %v3153_v26, 0.0  ;;  %v2783_v5 = vadd.f32 %v6922_v42, %v2611_v43  ;;  %v2784_v2 = vadd.f32 %v6934_v30, %v2612_v20 }
 0x3c6   : > { %v3157_v48 = vadd.f32 %v3141_v14, %v3121_v57  ;;  %v2782_v25 = vadd.f32 %v6912_v47, %v2610_v36 }
 0x3c7   : > { %v6947_v44 = vmul.f32 %v3167_v18, %v6086_v38  ;;  %v6950_v0 = vmul.f32 %v3165_v16, %v6024_v46  ;;  %v2955_v39 = vadd.f32 %v6931_v50, %v2783_v5 }
 0x3c8   : > { %v3108_v12 = vpop.f32.mrf.mxu1  ;;  %v3169_v37 = vmax.f32 %v3157_v48, 0.0  ;;  %v3050_v4 = vpop.f32.mrf.mxu3 }
 0x3c9   : > { %7831 = vst [vmem:[#allocation29_spill] sm:$0xff] %v6947_v44  ;;  %v3122_v63 = vadd.f32 %v3108_v12, %v2950_v34  ;;  %v6955_v49 = vpack.i.bf16 %v6947_v44, %v6940_v40  ;;  %v2939_v52 = vpop.f32.mrf.mxu2  ;;  %v3120_v53 = vadd.f32 %v3050_v4, %v2948_v17  ;;  %v5116_v27 = vpack.i.bf16 %v6950_v0, %v6958_v59 }
 0x3ca   : > { %3191 = vst [vmem:[#allocation2 + $0x48] sm:$0xff] %v6947_v44  ;;  %v6966_v23 = vmul.f32 %v3169_v37, %v6079_v19  ;;  %v2953_v29 = vadd.f32 %v2939_v52, %v2781_v58  ;;  %v2954_v34 = vadd.f32 %v6926_v31, %v2782_v25  ;;  %v5296_v43 = vpack.i.bf16 %v6958_v59, %v6947_v44 }
 0x3cb   : > { %3189 = vst [vmem:[#allocation2 + $0x28] sm:$0xff] %v6950_v0  ;;  %v3158_v61 = vadd.f32 %v3141_v14, %v3122_v63  ;;  %5112 = vrot.lane.b32.xlu1 %v6955_v49, %s5437_s11  ;;  %v3156_v22 = vadd.f32 %v3141_v14, %v3120_v53  ;;  %v3082_v9 = vpop.f32.mrf.mxu0  ;;  %5117 = vrot.lane.b32.xlu2 %v5116_v27, %s5438_s12  ;;  %v3151_v14 = vpop.permute.xlu2 %3150 }
 0x3cc   : > { %5107 = vrot.lane.b32.xlu0 %v5116_v27, %s5437_s11  ;;  %v3124_v51 = vadd.f32 %v3082_v9, %v2952_v56 }
 0x3cd   : > { %v3170_v6 = vmax.f32 %v3158_v61, 0.0  ;;  %v3168_v10 = vmax.f32 %v3156_v22, 0.0 }
 0x3ce   : > { %v3160_v21 = vadd.f32 %v3146_v60, %v3124_v51  ;;  %v5306_v51 = vpack.i.bf16 %v6958_v59, %v6958_v59 }
 0x3cf   : > { %v6979_v45 = vmul.f32 %v3170_v6, %v6086_v38  ;;  %v6983_v1 = vmul.f32 %v3168_v10, %v6024_v46 }
 0x3d0   : > { %v3111_v15 = vpop.f32.mrf.mxu1  ;;  %v3172_v7 = vmax.f32 %v3160_v21, 0.0  ;;  %v3053_v28 = vpop.f32.mrf.mxu3 }
 0x3d1   : > { %7832 = vst [vmem:[#allocation5_spill] sm:$0xff] %v6979_v45  ;;  %v3125_v3 = vadd.f32 %v3111_v15, %v2953_v29  ;;  %v3123_v26 = vadd.f32 %v3053_v28, %v2951_v41  ;;  %v2942_v18 = vpop.f32.mrf.mxu2  ;;  %v5156_v4 = vpack.i.bf16 %v6983_v1, %v6958_v59  ;;  %v5171_v61 = vpack.i.bf16 %v6979_v45, %v6966_v23 }
 0x3d2   : > { %v6990_v24 = vmul.f32 %v3172_v7, %v6079_v19  ;;  %v2956_v13 = vadd.f32 %v2942_v18, %v2784_v2  ;;  %v7078_v6 = vpack.i.bf16 %v6958_v59, %v6979_v45  ;;  %v5286_v15 = vpack.i.bf16 %v6947_v44, %v6979_v45 }
 0x3d3   : > { %v3161_v8 = vadd.f32 %v3146_v60, %v3125_v3  ;;  %5127 = vrot.lane.b32.xlu1 %v5116_v27, %s5439_s13  ;;  %v3159_v42 = vadd.f32 %v3146_v60, %v3123_v26  ;;  %v3085_v57 = vpop.f32.mrf.mxu0  ;;  %5132 = vrot.lane.b32.xlu2 %v6955_v49, %s5439_s13 }
 0x3d4   : > { %5122 = vrot.lane.b32.xlu0 %v6955_v49, %s5438_s12  ;;  %v3127_v50 = vadd.f32 %v3085_v57, %v2955_v39 }
 0x3d5   : > { %v3173_v11 = vmax.f32 %v3161_v8, 0.0  ;;  %v3171_v16 = vmax.f32 %v3159_v42, 0.0 }
 0x3d6   : > { %v3163_v55 = vadd.f32 %v3151_v14, %v3127_v50  ;;  %v5346_v50 = vpack.i.bf16 %v6958_v59, %v6983_v1 }
 0x3d7   : > { %v7002_v35 = vmul.f32 %v3173_v11, %v6086_v38  ;;  %v7006_v48 = vmul.f32 %v3171_v16, %v6024_v46 }
 0x3d8   : > { %v3114_v17 = vpop.f32.mrf.mxu1  ;;  %v3175_v12 = vmax.f32 %v3163_v55, 0.0  ;;  %v3056_v54 = vpop.f32.mrf.mxu3 }
 0x3d9   : > { %v3128_v30 = vadd.f32 %v3114_v17, %v2956_v13  ;;  %v3126_v37 = vadd.f32 %v3056_v54, %v2954_v34  ;;  %v5216_v33 = vpack.i.bf16 %v7002_v35, %v6990_v24  ;;  %v7069_v58 = vpack.i.bf16 %v6990_v24, %v7006_v48 }
 0x3da   : > { %v7011_v47 = vmul.f32 %v3175_v12, %v6079_v19  ;;  %v7025_v19 = vpack.i.bf16 %v6940_v40, %v6950_v0  ;;  %v5316_v10 = vpack.i.bf16 %v6958_v59, %v7006_v48  ;;  %v5261_v29 = vpack.i.bf16 %v6958_v59, %v7002_v35 }
 0x3db   : > { %v3164_v63 = vadd.f32 %v3151_v14, %v3128_v30  ;;  %5142 = vrot.lane.b32.xlu1 %v6955_v49, %s5440_s14  ;;  %v3162_v52 = vadd.f32 %v3151_v14, %v3126_v37  ;;  %5157 = vrot.lane.b32.xlu2 %v5156_v4, %s5437_s11  ;;  %v5356_v54 = vpack.i.bf16 %v6958_v59, %v6950_v0 }
 0x3dc   : > { %5137 = vrot.lane.b32.xlu0 %v5116_v27, %s5440_s14  ;;  %v5221_v27 = vpack.i.bf16 %v7006_v48, %v6958_v59  ;;  %v5251_v9 = vpack.i.bf16 %v7006_v48, %v7011_v47 }
 0x3dd   : > { %v3176_v31 = vmax.f32 %v3164_v63, 0.0  ;;  %v3174_v53 = vmax.f32 %v3162_v52, 0.0 }
 0x3df   : > { %v7018_v62 = vmul.f32 %v3176_v31, %v6086_v38  ;;  %v7021_v56 = vmul.f32 %v3174_v53, %v6024_v46  ;;  %v7039_v46 = vpack.i.bf16 %v6966_v23, %v6983_v1  ;;  %v5206_v38 = vpack.i.bf16 %v6958_v59, %v6990_v24 }
 0x3e1   : > { %v7063_v22 = vpack.i.bf16 %v7018_v62, %v7011_v47  ;;  %v5276_v60 = vpack.i.bf16 %v7021_v56, %v6958_v59  ;;  %v5341_v26 = vpack.i.bf16 %v7002_v35, %v7018_v62  ;;  %v5361_v25 = vpack.i.bf16 %v7011_v47, %v7021_v56 }
 0x3e2   : > { %v5396_v53 = vpack.i.bf16 %v6958_v59, %v7018_v62 }
 0x3e3   : > { %5147 = vrot.lane.b32.xlu1 %v7025_v19, %s5441_s15  ;;  %5172 = vrot.lane.b32.xlu2 %v5171_v61, %s5438_s12 }
 0x3e4   : > { %5162 = vrot.lane.b32.xlu0 %v5171_v61, %s5437_s11 }
 0x3eb   : > { %5152 = vrot.lane.b32.xlu1 %v7025_v19, %s5442_s16  ;;  %5187 = vrot.lane.b32.xlu2 %v5156_v4, %s5440_s14 }
 0x3ec   : > { %5177 = vrot.lane.b32.xlu0 %v5156_v4, %s5439_s13 }
 0x3f3   : > { %5167 = vrot.lane.b32.xlu1 %v5156_v4, %s5438_s12  ;;  %5197 = vrot.lane.b32.xlu2 %v7039_v46, %s5441_s15 }
 0x3f4   : > { %5192 = vrot.lane.b32.xlu0 %v5171_v61, %s5440_s14 }
 0x3fb   : > { %5182 = vrot.lane.b32.xlu1 %v5171_v61, %s5439_s13  ;;  %5202 = vrot.lane.b32.xlu2 %v7039_v46, %s5442_s16 }
 0x3fc   : > { %5207 = vrot.lane.b32.xlu0 %v5206_v38, %s5440_s14 }
 0x403   : > { %5212 = vrot.lane.b32.xlu1 %v5221_v27, %s5437_s11  ;;  %5217 = vrot.lane.b32.xlu2 %v5216_v33, %s5437_s11 }
 0x404   : > { %5222 = vrot.lane.b32.xlu0 %v5221_v27, %s5438_s12 }
 0x40b   : > { %5227 = vrot.lane.b32.xlu1 %v5216_v33, %s5438_s12  ;;  %5232 = vrot.lane.b32.xlu2 %v5221_v27, %s5439_s13 }
 0x40c   : > { %5237 = vrot.lane.b32.xlu0 %v5216_v33, %s5439_s13 }
 0x413   : > { %5272 = vrot.lane.b32.xlu1 %v7063_v22, %s5437_s11  ;;  %5252 = vrot.lane.b32.xlu2 %v5251_v9, %s5440_s14 }
 0x414   : > { %5242 = vrot.lane.b32.xlu0 %v7069_v58, %s5441_s15 }
 0x41b   : > { %5292 = vrot.lane.b32.xlu1 %v5216_v33, %s5443_s17  ;;  %5267 = vrot.lane.b32.xlu2 %v7078_v6, %s5441_s15  ;;  %v5391_v33 = vpack.i.bf16 %v6958_v59, %v7021_v56 }
 0x41c   : > { %5247 = vrot.lane.b32.xlu0 %v7069_v58, %s5442_s16 }
 0x423   : > { %5307 = vrot.lane.b32.xlu1 %v5306_v51, %s5442_s16  ;;  %5277 = vrot.lane.b32.xlu2 %v5276_v60, %s5438_s12 }
 0x424   : > { %5257 = vrot.lane.b32.xlu0 %v5276_v60, %s5437_s11  ;;  %s4764_s11 = smul.u32 48, %s7879_s28 }
 0x425   : > { %v7092_v32 = vpop.permute.xlu2 %5117 }
 0x426   : > { %v7743_v57 = vunpack.i.h.bf16 %v7092_v32 }
 0x42b   : > { %5317 = vrot.lane.b32.xlu1 %v5316_v10, %s5443_s17  ;;  %5297 = vrot.lane.b32.xlu2 %v5296_v43, %s5441_s15 }
 0x42c   : > { %5262 = vrot.lane.b32.xlu0 %v5261_v29, %s5441_s15 }
 0x42d   : > { %v7103_v21 = vpop.permute.xlu2 %5132 }
 0x42e   : > { %v7746_v8 = vunpack.i.l.bf16 %v7103_v21 }
 0x433   : > { %5327 = vrot.lane.b32.xlu1 %v5276_v60, %s5439_s13  ;;  %5312 = vrot.lane.b32.xlu2 %v6955_v49, %s5443_s17 }
 0x434   : > { %5282 = vrot.lane.b32.xlu0 %v7063_v22, %s5438_s12 }
 0x435   : > { %v7110_v41 = vpop.permute.xlu2 %5157 }
 0x436   : > { %v7748_v63 = vunpack.i.h.bf16 %v7110_v41 }
 0x43b   : > { %5337 = vrot.lane.b32.xlu1 %v5276_v60, %s5440_s14  ;;  %5332 = vrot.lane.b32.xlu2 %v7063_v22, %s5439_s13 }
 0x43c   : > { %5287 = vrot.lane.b32.xlu0 %v5286_v15, %s5442_s16 }
 0x43d   : > { %v7118_v5 = vpop.permute.xlu1 %5112  ;;  %v7122_v49 = vpop.permute.xlu2 %5172 }
 0x43e   : > { %v7120_v7 = vpop.permute.xlu0 %5107  ;;  %v7744_v28 = vunpack.i.l.bf16 %v7118_v5 }
 0x43f   : > { %v7747_v3 = vunpack.i.h.bf16 %v7120_v7 }
 0x441   : > { %v7133_v20 = vsel %vm356_vm0, %v7747_v3, %v7744_v28 }
 0x443   : > { %5342 = vrot.lane.b32.xlu1 %v5341_v26, %s5440_s14  ;;  %5352 = vrot.lane.b32.xlu2 %v5261_v29, %s5444_s18  ;;  %s7708_s14 = scalar_lea.vmem %s7730_s8, %s4764_s11 }
 0x444   : > { %5302 = vrot.lane.b32.xlu0 %v5171_v61, %s5443_s17 }
 0x445   : > { %v7138_v39 = vpop.permute.xlu1 %5127  ;;  %v7141_v36 = vpop.permute.xlu2 %5187 }
 0x446   : > { %v7143_v18 = vpop.permute.xlu0 %5122  ;;  %v7737_v42 = vunpack.i.h.bf16 %v7138_v39  ;;  %v7738_v60 = vunpack.i.h.bf16 %v7141_v36 }
 0x447   : > { %v7742_v2 = vunpack.i.l.bf16 %v7143_v18 }
 0x448   : > { %v7153_v11 = vsel %vm597_vm4, %v7737_v42, %v7746_v8 }
 0x449   : > { %v7162_v14 = vsel %vm475_vm3, %v7743_v57, %v7742_v2 }
 0x44b   : > { %5347 = vrot.lane.b32.xlu1 %v5346_v50, %s5443_s17  ;;  %5362 = vrot.lane.b32.xlu2 %v5361_v25, %s5441_s15  ;;  %v4318_v50 = vld [vmem:[%s7728_s6] sm:$0xff] }
 0x44c   : > { %5322 = vrot.lane.b32.xlu0 %v5306_v51, %s5442_s16 }
 0x44d   : > { %v7169_v16 = vpop.permute.xlu1 %5142  ;;  %v7171_v13 = vpop.permute.xlu2 %5197 }
 0x44e   : > { %v7173_v55 = vpop.permute.xlu0 %5137  ;;  %v7733_v34 = vunpack.i.l.bf16 %v7169_v16 }
 0x44f   : > { %v7736_v17 = vunpack.i.h.bf16 %v7173_v55 }
 0x451   : > { %v7182_v12 = vsel %vm731_vm5, %v7736_v17, %v7733_v34 }
 0x453   : > { %5367 = vrot.lane.b32.xlu1 %v5361_v25, %s5442_s16  ;;  %5377 = vrot.lane.b32.xlu2 %v5341_v26, %s5442_s16 }
 0x454   : > { %5357 = vrot.lane.b32.xlu0 %v5356_v54, %s5443_s17 }
 0x455   : > { %v7189_v30 = vpop.permute.xlu1 %5147  ;;  %v7191_v37 = vpop.permute.xlu2 %5202 }
 0x456   : > { %7833 = vst [vmem:[#allocation8_spill] sm:$0xff] %v7191_v37  ;;  %v7193_v4 = vpop.permute.xlu0 %5162 }
 0x457   : > { %v7745_v52 = vunpack.i.l.bf16 %v7193_v4 }
 0x459   : > { %v7202_v31 = vsel %vm356_vm0, %v7748_v63, %v7745_v52 }
 0x45b   : > { %5382 = vrot.lane.b32.xlu1 %v7063_v22, %s5443_s17  ;;  %5397 = vrot.lane.b32.xlu2 %v5396_v53, %s5444_s18 }
 0x45c   : > { %5372 = vrot.lane.b32.xlu0 %v5396_v53, %s5441_s15  ;;  %v7741_v53 = vunpack.i.h.bf16 %v7171_v13 }
 0x45d   : > { %v7210_v61 = vpop.permute.xlu1 %5152  ;;  %v7212_v38 = vpop.permute.xlu2 %5217 }
 0x45e   : > { %7834 = vst [vmem:[#allocation21_spill] sm:$0xff] %v7210_v61  ;;  %v7214_v27 = vpop.permute.xlu0 %5177 }
 0x463   : > { %5387 = vrot.lane.b32.xlu1 %v7078_v6, %s5444_s18  ;;  %5402 = vrot.lane.b32.xlu2 %v5296_v43, %s5444_s18 }
 0x464   : > { %5392 = vrot.lane.b32.xlu0 %v5391_v33, %s5443_s17 }
 0x465   : > { %v7222_v22 = vpop.permute.xlu1 %5167  ;;  %v7224_v9 = vpop.permute.xlu2 %5232 }
 0x466   : > { %v7226_v51 = vpop.permute.xlu0 %5192 }
 0x467   : > { %v7734_v10 = vunpack.i.l.bf16 %v7226_v51 }
 0x469   : > { %v7235_v59 = vsel %vm731_vm5, %v7738_v60, %v7734_v10  ;;  %v7754_v60 = vunpack.i.h.bf16 %v7189_v30 }
 0x46b   : > { %5407 = vrot.lane.b32.xlu1 %v7069_v58, %s5444_s18  ;;  %5417 = vrot.lane.b32.xlu2 %v7039_v46, %s5444_s18 }
 0x46c   : > { %5412 = vrot.lane.b32.xlu0 %v5361_v25, %s5444_s18 }
 0x46d   : > { %v7242_v6 = vpop.permute.xlu1 %5182  ;;  %v7244_v43 = vpop.permute.xlu2 %5252 }
 0x46e   : > { %v7246_v29 = vpop.permute.xlu0 %5207  ;;  %v7739_v15 = vunpack.i.h.bf16 %v7244_v43  ;;  %v5185_v44 = vunpack.i.h.bf16 %v7242_v6 }
 0x46f   : > { %v7735_v26 = vunpack.i.l.bf16 %v7246_v29 }
 0x471   : > { %v7258_v46 = vsel %vm731_vm5, %v7739_v15, %v7735_v26 }
 0x473   : > { %4321 = vperm.xlu1 %4785, %v4318_v50  }
 0x474   : > { %5422 = vrot.lane.b32.xlu0 %v7025_v19, %s5444_s18 }
 0x475   : > { %v5213_v58 = vpop.permute.xlu1 %5212  ;;  %v7262_v25 = vpop.permute.xlu2 %5267 }
 0x476   : > { %7835 = vst [vmem:[#allocation11_spill] sm:$0xff] %v7262_v25  ;;  %v7264_v54 = vpop.permute.xlu0 %5222  ;;  %v7740_v33 = vunpack.i.l.bf16 %v7262_v25  ;;  %v5215_v52 = vunpack.i.h.bf16 %v5213_v58  ;;  %v5214_v8 = vunpack.i.l.bf16 %v5213_v58 }
 0x478   : > { %v7273_v34 = vsel %vm995_vm6, %v7741_v53, %v7740_v33 }
 0x479   : > { %7836 = vst [vmem:[#allocation30_spill] sm:$0xff] %v7273_v34 }
 0x47d   : > { %v7275_v50 = vpop.permute.xlu1 %5227  ;;  %v7279_v19 = vpop.permute.xlu2 %5277 }
 0x47e   : > { %v7277_v10 = vpop.permute.xlu0 %5237 }
 0x485   : > { %v5273_v26 = vpop.permute.xlu1 %5272  ;;  %v7283_v42 = vpop.permute.xlu2 %5297 }
 0x486   : > { %v7281_v17 = vpop.permute.xlu0 %5242  ;;  %7837 = vst [vmem:[#allocation7_spill] sm:$0xff] %v7283_v42  ;;  %v7753_v15 = vunpack.i.l.bf16 %v7283_v42  ;;  %v5274_v3 = vunpack.i.l.bf16 %v5273_v26 }
 0x488   : > { %v7292_v33 = vsel %vm995_vm6, %v7754_v60, %v7753_v15 }
 0x489   : > { %7838 = vst [vmem:[#allocation16_spill] sm:$0xff] %v7292_v33  ;;  %v5159_v33 = vunpack.i.l.bf16 %v7110_v41 }
 0x48d   : > { %v7294_v53 = vpop.permute.xlu1 %5292  ;;  %v7298_v57 = vpop.permute.xlu2 %5312 }
 0x48e   : > { %7839 = vst [vmem:[#allocation28_spill] sm:$0xff] %v7294_v53  ;;  %v7296_v2 = vpop.permute.xlu0 %5247  ;;  %v5240_v53 = vunpack.i.h.bf16 %v7277_v10 }
 0x48f   : > { %7840 = vst [vmem:[#allocation10_spill] sm:$0xff] %v7296_v2  ;;  %v5109_v2 = vunpack.i.l.bf16 %v7120_v7 }
 0x490   : > { %7841 = vst [vmem:[#allocation15_spill] sm:$0xff] %v7298_v57  ;;  %v3274_v57 = vsel %vm356_vm0, %v5214_v8, %v5215_v52  ;;  %v5280_v8 = vunpack.i.h.bf16 %v7279_v19 }
 0x495   : > { %v7300_v28 = vpop.permute.xlu1 %5307  ;;  %v7302_v63 = vpop.permute.xlu2 %5332 }
 0x496   : > { %7842 = vst [vmem:[#allocation22_spill] sm:$0xff] %v7300_v28  ;;  %v5258_v34 = vpop.permute.xlu0 %5257  ;;  %v5335_v42 = vunpack.i.h.bf16 %v7302_v63  ;;  %v7763_v25 = vunpack.i.l.bf16 %v7302_v63  ;;  %v5219_v28 = vunpack.i.l.bf16 %v7212_v38 }
 0x497   : > { %v5260_v15 = vunpack.i.h.bf16 %v5258_v34  ;;  %v5259_v60 = vunpack.i.l.bf16 %v5258_v34 }
 0x498   : > { %v3519_v37 = vsel %vm597_vm4, %v7763_v25, %v5335_v42  ;;  %v3275_v45 = vsel %vm356_vm0, %v5215_v52, %v5219_v28  ;;  %v5275_v25 = vunpack.i.h.bf16 %v5273_v26  ;;  %v5279_v52 = vunpack.i.l.bf16 %v7279_v19  ;;  %v4726_v26 = vld [vmem:[%s7727_s5 + $0x8] sm:$0xff] }
 0x499   : > { %v3277_v58 = vsel %vm356_vm0, %v5259_v60, %v5260_v15  ;;  %v3278_v61 = vsel %vm356_vm0, %v5260_v15, %v5274_v3  ;;  %3587 = vmatpush.msra.mxu0 %v3519_v37  ;;  %v5135_v60 = vunpack.i.h.bf16 %v7103_v21  ;;  %v7843_v15 = vunpack.i.l.bf16 %v7277_v10 }
 0x49a   : > { %3307 = vmatpush.msrb.mxu2 %v3277_v58  ;;  %3327 = vmatpush.msrb.mxu3 %v3278_v61  ;;  %v7844_v61 = vunpack.i.h.bf16 %v7110_v41  ;;  %v7845_v58 = vunpack.i.l.bf16 %v7242_v6  ;;  %v5220_v41 = vunpack.i.h.bf16 %v7212_v38  ;;  %v5225_v19 = vunpack.i.h.bf16 %v7264_v54 }
 0x49b   : > { %v3516_v42 = vsel %vm597_vm4, %v7843_v15, %v5240_v53  ;;  %v7846_v53 = vunpack.i.h.bf16 %v7120_v7  ;;  %v3279_v7 = vsel %vm356_vm0, %v5274_v3, %v5275_v25  ;;  %v5170_v38 = vunpack.i.h.bf16 %v7222_v22 }
 0x49c   : > { %3308 = vmatpush.msrb.mxu2 %v3274_v57  ;;  %3328 = vmatpush.msrb.mxu3 %v3275_v45  ;;  %v3271_v37 = vsel %vm356_vm0, %v5159_v33, %v7844_v61  ;;  %v3513_v45 = vsel %vm597_vm4, %v7845_v58, %v5185_v44  ;;  %v5224_v44 = vunpack.i.l.bf16 %v7264_v54  ;;  %v5115_v54 = vunpack.i.h.bf16 %v7118_v5 }
 0x49d   : > { %3588 = vmatpush.msra.mxu0 %v3516_v42  ;;  %v7324_v34 = vpop.permute.xlu1 %5317  ;;  %v3268_v33 = vsel %vm356_vm0, %v5109_v2, %v7846_v53  ;;  %v5165_v42 = vunpack.i.h.bf16 %v7193_v4  ;;  %v7356_v2 = vld [vmem:[%s7727_s5 + $0x10] sm:$0xff]  ;;  %v3276_v3 = vsel %vm356_vm0, %v5219_v28, %v5220_v41  ;;  %v5119_v25 = vunpack.i.l.bf16 %v7092_v32 }
 0x49e   : > { %v7334_v57 = vpop.permute.xlu0 %5262  ;;  %3309 = vmatpush.msrb.mxu2 %v3271_v37  ;;  %3329 = vmatpush.msrb.mxu3 %v7202_v31  ;;  %v7847_v31 = vunpack.i.l.bf16 %v7103_v21  ;;  %v3396_v21 = vsel %vm475_vm3, %v5279_v52, %v5280_v8  ;;  %v5229_v53 = vunpack.i.l.bf16 %v7275_v50 }
 0x49f   : > { %3589 = vmatpush.msra.mxu0 %v3513_v45  ;;  %v7849_v45 = vunpack.i.l.bf16 %v7118_v5 }
 0x4a0   : > { %3310 = vmatpush.msrb.mxu2 %v3268_v33  ;;  %3330 = vmatpush.msrb.mxu3 %v7133_v20  ;;  %v3510_v15 = vsel %vm597_vm4, %v7847_v31, %v5135_v60  ;;  %v5169_v20 = vunpack.i.l.bf16 %v7222_v22  ;;  %v3393_v60 = vsel %vm475_vm3, %v5224_v44, %v5225_v19  ;;  %v7848_v22 = vunpack.i.l.bf16 %v7193_v4 }
 0x4a1   : > { %3590 = vmatpush.msra.mxu0 %v3510_v15  ;;  %4727 = vmatmul.msk.f32.vlgmr.msrb.gmra.mxu2 %vm1694_vm10, %v4726_v26  ;;  %v3270_v41 = vsel %vm356_vm0, %v7849_v45, %v5115_v54  ;;  %v5230_v4 = vunpack.i.h.bf16 %v7275_v50  ;;  %v7850_v33 = vunpack.i.h.bf16 %v7092_v32  ;;  %v5174_v31 = vunpack.i.l.bf16 %v7122_v49  ;;  %v7394_v50 = vld [vmem:[%s7727_s5 + $0x20] sm:$0xff] }
 0x4a2   : > { %4728 = vmatmul.msk.f32.vlgmr.msrb.gmra.mxu3 %vm1694_vm10, %v4726_v26  ;;  %3347 = vmatpush.msra.mxu2 %v3279_v7  ;;  %v3273_v61 = vsel %vm356_vm0, %v7848_v22, %v5165_v42  ;;  %v5125_v32 = vunpack.i.h.bf16 %v7143_v18  ;;  %v7404_v7 = vpop.permute.xlu2 %5352  ;;  %v7851_v22 = vunpack.i.l.bf16 %v7143_v18  ;;  %v7852_v18 = vunpack.i.l.bf16 %v7302_v63 }
 0x4a3   : > { %3426 = vmatpush.msra.mxu3 %v3396_v21  ;;  %3739 = vmatpush.msrb.mxu0 %v7021_v56  ;;  %v3390_v56 = vsel %vm475_vm3, %v5169_v20, %v5170_v38  ;;  %v3387_v44 = vsel %vm475_vm3, %v5119_v25, %v7850_v33  ;;  %v5235_v25 = vunpack.i.h.bf16 %v7224_v9  ;;  %v7854_v63 = vunpack.i.h.bf16 %v7244_v43 }
 0x4a4   : > { %3348 = vmatpush.msra.mxu2 %v3276_v3  ;;  %4736 = vmatmul.msk.f32.vlgmr.msra.gmra.mxu0 %vm1694_vm10, %v7356_v2  ;;  %v3391_v3 = vsel %vm475_vm3, %v5170_v38, %v5174_v31  ;;  %v5180_v38 = vunpack.i.h.bf16 %v7214_v27 }
 0x4a5   : > { %3427 = vmatpush.msra.mxu3 %v3393_v60  ;;  %3740 = vmatpush.msrb.mxu0 %v7006_v48  ;;  %v5328_v37 = vpop.permute.xlu1 %5327  ;;  %v3217_v48 = vld [vmem:[%s7727_s5] sm:$0xff]  ;;  %v5234_v60 = vunpack.i.l.bf16 %v7224_v9 }
 0x4a6   : > { %3349 = vmatpush.msra.mxu2 %v3273_v61  ;;  %v5283_v28 = vpop.permute.xlu0 %5282  ;;  %v5329_v20 = vunpack.i.l.bf16 %v5328_v37  ;;  %v3389_v61 = vsel %vm475_vm3, %v7851_v22, %v5125_v32 }
 0x4a7   : > { %3428 = vmatpush.msra.mxu3 %v3390_v56  ;;  %3741 = vmatpush.msrb.mxu0 %v6983_v1  ;;  %v5285_v52 = vunpack.i.h.bf16 %v5283_v28  ;;  %v5284_v58 = vunpack.i.l.bf16 %v5283_v28  ;;  %v5175_v1 = vunpack.i.h.bf16 %v7122_v49  ;;  %v3394_v49 = vsel %vm475_vm3, %v5225_v19, %v5229_v53 }
 0x4a8   : > { %3350 = vmatpush.msra.mxu2 %v3270_v41  ;;  %v5210_v19 = vunpack.i.h.bf16 %v7246_v29  ;;  %v5179_v28 = vunpack.i.l.bf16 %v7214_v27  ;;  %v3514_v45 = vsel %vm597_vm4, %v5234_v60, %v5235_v25  ;;  %v7853_v27 = vunpack.i.l.bf16 %v7277_v10 }
 0x4a9   : > { %3429 = vmatpush.msra.mxu3 %v3387_v44  ;;  %3742 = vmatpush.msrb.mxu0 %v6950_v0  ;;  %v3397_v5 = vsel %vm475_vm3, %v5280_v8, %v5284_v58  ;;  %v3398_v15 = vsel %vm475_vm3, %v5284_v58, %v5285_v52  ;;  %v3395_v0 = vsel %vm475_vm3, %v5229_v53, %v5230_v4  ;;  %v5189_v58 = vunpack.i.l.bf16 %v7141_v36 }
 0x4aa   : > { %4729 = vmatmul.msk.f32.vlgmr.msra.gmra.mxu2 %vm1694_vm10, %v4726_v26  ;;  %4730 = vmatmul.msk.f32.vlgmr.msra.gmra.mxu3 %vm1694_vm10, %v3217_v48  ;;  %v3392_v42 = vsel %vm475_vm3, %v5174_v31, %v5175_v1  ;;  %v5330_v26 = vunpack.i.h.bf16 %v5328_v37  ;;  %v3515_v41 = vsel %vm597_vm4, %v5235_v25, %v7853_v27  ;;  %v3511_v33 = vsel %vm597_vm4, %v5179_v28, %v5180_v38 }
 0x4ab   : > { %3446 = vmatpush.msrb.mxu2 %v3397_v5  ;;  %3466 = vmatpush.msrb.mxu3 %v3398_v15  ;;  %v7855_v44 = vunpack.i.l.bf16 %v7242_v6  ;;  %v5254_v5 = vunpack.i.l.bf16 %v7244_v43  ;;  %v7856_v15 = vunpack.i.h.bf16 %v7141_v36  ;;  %v7861_v60 = vunpack.i.l.bf16 %v7169_v16 }
 0x4ac   : > { %4742 = vmatmul.msk.f32.vlgmr.msrb.gmra.mxu0 %vm1694_vm10, %v7394_v50  ;;  %v3517_v9 = vsel %vm597_vm4, %v5329_v20, %v5330_v26  ;;  %v3518_v52 = vsel %vm597_vm4, %v5330_v26, %v7852_v18  ;;  %v5145_v20 = vunpack.i.h.bf16 %v7169_v16  ;;  %v7862_v16 = vld [vmem:[#allocation5_spill] sm:$0xff] }
 0x4ad   : > { %3447 = vmatpush.msrb.mxu2 %v3394_v49  ;;  %3467 = vmatpush.msrb.mxu3 %v3395_v0  ;;  %v5338_v8 = vpop.permute.xlu1 %5337  ;;  %v3512_v1 = vsel %vm597_vm4, %v5180_v38, %v7855_v44  ;;  %v3635_v32 = vsel %vm731_vm5, %v5189_v58, %v7856_v15  ;;  %v7445_v49 = vpop.permute.xlu2 %5362  ;;  %v7857_v0 = vunpack.i.h.bf16 %v7138_v39  ;;  %v7864_v18 = vld [vmem:[#allocation29_spill] sm:$0xff] }
 0x4ae   : > { %v5340_v21 = vunpack.i.h.bf16 %v5338_v8  ;;  %v7406_v54 = vpop.permute.xlu0 %5287  ;;  %v5339_v56 = vunpack.i.l.bf16 %v5338_v8  ;;  %v7858_v8 = vunpack.i.h.bf16 %v7173_v55 }
 0x4af   : > { %3448 = vmatpush.msrb.mxu2 %v3391_v3  ;;  %3468 = vmatpush.msrb.mxu3 %v3392_v42 }
 0x4b0   : > { %v3641_v37 = vsel %vm731_vm5, %v5210_v19, %v5340_v21  ;;  %v3638_v4 = vsel %vm731_vm5, %v5339_v56, %v7854_v63  ;;  %v3642_v42 = vsel %vm731_vm5, %v5340_v21, %v5254_v5  ;;  %v7859_v21 = vunpack.i.l.bf16 %v7246_v29 }
 0x4b1   : > { %3449 = vmatpush.msrb.mxu2 %v7162_v14  ;;  %3469 = vmatpush.msrb.mxu3 %v3389_v61  ;;  %v5129_v14 = vunpack.i.l.bf16 %v7138_v39  ;;  %v4737_v39 = vld [vmem:[%s7727_s5 + $0x18] sm:$0xff]  ;;  %v7860_v19 = vunpack.i.l.bf16 %v7226_v51  ;;  %v5244_v29 = vunpack.i.l.bf16 %v7281_v17 }
 0x4b2   : > { %4731 = vmatmul.msk.f32.vlgmr.msrb.gmra.mxu2 %vm1694_vm10, %v3217_v48  ;;  %4732 = vmatmul.msk.f32.vlgmr.msrb.gmra.mxu3 %vm1694_vm10, %v3217_v48  ;;  %v5139_v48 = vunpack.i.l.bf16 %v7173_v55 }
 0x4b3   : > { %3547 = vmatpush.msra.mxu2 %v3517_v9  ;;  %3567 = vmatpush.msra.mxu3 %v3518_v52  ;;  %v3508_v6 = vsel %vm597_vm4, %v5129_v14, %v7857_v0  ;;  %v7865_v52 = vunpack.i.h.bf16 %v7171_v13 }
 0x4b4   : > { %3671 = vmatpush.msra.mxu1 %v3641_v37  ;;  %v3632_v43 = vsel %vm731_vm5, %v5139_v48, %v7858_v8  ;;  %v7863_v37 = vld [vmem:[#allocation10_spill] sm:$0xff]  ;;  %v7867_v48 = vld [vmem:[#allocation21_spill] sm:$0xff] }
 0x4b5   : > { %3548 = vmatpush.msra.mxu2 %v3514_v45  ;;  %3568 = vmatpush.msra.mxu3 %v3515_v41  ;;  %v5343_v53 = vpop.permute.xlu1 %5342  ;;  %v7487_v25 = vpop.permute.xlu2 %5377  ;;  %v5250_v38 = vunpack.i.h.bf16 %v7863_v37  ;;  %v5249_v28 = vunpack.i.l.bf16 %v7863_v37  ;;  %v7866_v45 = vld [vmem:[#allocation8_spill] sm:$0xff]  ;;  %v5155_v63 = vunpack.i.h.bf16 %v7867_v48 }
 0x4b6   : > { %3672 = vmatpush.msra.mxu1 %v3638_v4  ;;  %v5344_v31 = vunpack.i.l.bf16 %v5343_v53  ;;  %v7439_v10 = vpop.permute.xlu0 %5302  ;;  %v5345_v26 = vunpack.i.h.bf16 %v5343_v53  ;;  %v5379_v9 = vunpack.i.l.bf16 %v7487_v25  ;;  %v5205_v27 = vunpack.i.h.bf16 %v7866_v45  ;;  %v7524_v53 = vld [vmem:[%s7727_s5 + $0x28] sm:$0xff] }
 0x4b7   : > { %3549 = vmatpush.msra.mxu2 %v3511_v33  ;;  %3569 = vmatpush.msra.mxu3 %v3512_v1  ;;  %v5204_v41 = vunpack.i.l.bf16 %v7866_v45  ;;  %v5154_v4 = vunpack.i.l.bf16 %v7867_v48  ;;  %v7868_v33 = vunpack.i.h.bf16 %v7189_v30  ;;  %v7875_v45 = vld [vmem:[#allocation30_spill] sm:$0xff] }
 0x4b8   : > { %3673 = vmatpush.msra.mxu1 %v3635_v32  ;;  %v3643_v36 = vsel %vm731_vm5, %v5254_v5, %v5344_v31  ;;  %v3986_v31 = vsel %vm1129_vm7, %v5249_v28, %v5250_v38  ;;  %v5289_v5 = vunpack.i.l.bf16 %v7406_v54  ;;  %v7874_v28 = vld [vmem:[#allocation22_spill] sm:$0xff] }
 0x4b9   : > { %3550 = vmatpush.msra.mxu2 %v3508_v6  ;;  %3570 = vmatpush.msra.mxu3 %v7153_v11  ;;  %v5195_v11 = vunpack.i.h.bf16 %v7226_v51  ;;  %v3983_v32 = vsel %vm1129_vm7, %v5204_v41, %v5205_v27  ;;  %v3980_v0 = vsel %vm1129_vm7, %v5154_v4, %v5155_v63  ;;  %v5290_v6 = vunpack.i.h.bf16 %v7406_v54 }
 0x4ba   : > { %3674 = vmatpush.msra.mxu1 %v3632_v43  ;;  %4734 = vmatmul.msk.f32.vlgmr.msra.gmra.mxu2 %vm1694_vm10, %v7356_v2 }
 0x4bb   : > { %3691 = vmatpush.msrb.mxu2 %v3642_v42  ;;  %4735 = vmatmul.msk.f32.vlgmr.msra.gmra.mxu3 %vm1694_vm10, %v7356_v2  ;;  %v3640_v2 = vsel %vm731_vm5, %v7859_v21, %v5345_v26  ;;  %v5265_v26 = vunpack.i.h.bf16 %v7334_v57 }
 0x4bc   : > { %3759 = vmatpush.msrb.mxu1 %v7011_v47  ;;  %3711 = vmatpush.msrb.mxu3 %v3643_v36  ;;  %v5365_v47 = vunpack.i.h.bf16 %v7445_v49  ;;  %v5264_v36 = vunpack.i.l.bf16 %v7334_v57 }
 0x4bd   : > { %3692 = vmatpush.msrb.mxu2 %v7258_v46  ;;  %v7466_v55 = vpop.permute.xlu1 %5347  ;;  %4738 = vmatmul.msk.f32.vlgmr.msra.gmra.mxu1 %vm1694_vm10, %v4737_v39  ;;  %v5364_v46 = vunpack.i.l.bf16 %v7445_v49  ;;  %v7537_v15 = vpop.permute.xlu2 %5397 }
 0x4be   : > { %3760 = vmatpush.msrb.mxu1 %v6990_v24  ;;  %v7475_v3 = vpop.permute.xlu0 %5322  ;;  %3712 = vmatpush.msrb.mxu3 %v3640_v2  ;;  %v3637_v24 = vsel %vm731_vm5, %v7860_v19, %v5195_v11  ;;  %v7561_v19 = vld [vmem:[%s7727_s5 + $0x30] sm:$0xff]  ;;  %v5399_v4 = vunpack.i.l.bf16 %v7537_v15 }
 0x4bf   : > { %3693 = vmatpush.msrb.mxu2 %v7235_v59  ;;  %v5245_v59 = vunpack.i.h.bf16 %v7281_v17 }
 0x4c0   : > { %3761 = vmatpush.msrb.mxu1 %v6966_v23  ;;  %3713 = vmatpush.msrb.mxu3 %v3637_v24  ;;  %v3634_v23 = vsel %vm731_vm5, %v7861_v60, %v5145_v20  ;;  %v7869_v20 = vld [vmem:[#allocation28_spill] sm:$0xff]  ;;  %v7870_v24 = vld [vmem:[#allocation11_spill] sm:$0xff] }
 0x4c1   : > { %3694 = vmatpush.msrb.mxu2 %v7182_v12  ;;  %v5199_v12 = vunpack.i.l.bf16 %v7171_v13  ;;  %v3862_v22 = vsel %vm995_vm6, %v5244_v29, %v5245_v59  ;;  %v5380_v13 = vunpack.i.h.bf16 %v7487_v25  ;;  %v5295_v21 = vunpack.i.h.bf16 %v7869_v20 }
 0x4c2   : > { %3762 = vmatpush.msrb.mxu1 %v6940_v40  ;;  %3714 = vmatpush.msrb.mxu3 %v3634_v23  ;;  %v5149_v40 = vunpack.i.l.bf16 %v7189_v30  ;;  %v5294_v2 = vunpack.i.l.bf16 %v7869_v20  ;;  %v5270_v29 = vunpack.i.h.bf16 %v7870_v24  ;;  %v3863_v49 = vsel %vm995_vm6, %v5245_v59, %v5264_v36 }
 0x4c3   : > { %3779 = vmatpush.msra.mxu2 %v7018_v62  ;;  %4740 = vmatmul.msk.f32.vlgmr.msrb.gmra.mxu3 %vm1694_vm10, %v4737_v39  ;;  %v3865_v62 = vsel %vm995_vm6, %v5364_v46, %v5365_v47  ;;  %v3859_v58 = vsel %vm995_vm6, %v5199_v12, %v7865_v52  ;;  %v3984_v46 = vsel %vm1129_vm7, %v5205_v27, %v5289_v5  ;;  %v7871_v12 = vld [vmem:[#allocation7_spill] sm:$0xff]  ;;  %v7873_v17 = vunpack.i.l.bf16 %v7870_v24 }
 0x4c4   : > { %4739 = vmatmul.msk.f32.vlgmr.msrb.gmra.mxu2 %vm1694_vm10, %v4737_v39  ;;  %3895 = vmatpush.msra.mxu3 %v3865_v62  ;;  %v3856_v44 = vsel %vm995_vm6, %v5149_v40, %v7868_v33  ;;  %v5300_v62 = vunpack.i.h.bf16 %v7871_v12  ;;  %v5304_v40 = vunpack.i.l.bf16 %v7439_v10  ;;  %v4111_v37 = vsel %vm1263_vm8, %v5294_v2, %v5295_v21 }
 0x4c5   : > { %3780 = vmatpush.msra.mxu2 %v7002_v35  ;;  %v5368_v51 = vpop.permute.xlu1 %5367  ;;  %4743 = vmatmul.msk.f32.vlgmr.msrb.gmra.mxu1 %vm1694_vm10, %v7394_v50  ;;  %v3861_v59 = vsel %vm995_vm6, %v7873_v17, %v5270_v29  ;;  %v5319_v52 = vunpack.i.l.bf16 %v7324_v34  ;;  %v7876_v41 = vunpack.i.l.bf16 %v7871_v12 }
 0x4c6   : > { %v5370_v61 = vunpack.i.h.bf16 %v5368_v51  ;;  %v5369_v56 = vunpack.i.l.bf16 %v5368_v51  ;;  %v7507_v35 = vpop.permute.xlu0 %5357  ;;  %3896 = vmatpush.msra.mxu3 %v3862_v22  ;;  %v5305_v51 = vunpack.i.h.bf16 %v7439_v10  ;;  %v7872_v22 = vld [vmem:[#allocation15_spill] sm:$0xff] }
 0x4c7   : > { %3781 = vmatpush.msra.mxu2 %v7862_v16  ;;  %v3981_v16 = vsel %vm1129_vm7, %v5155_v63, %v5290_v6  ;;  %v3858_v48 = vsel %vm995_vm6, %v7876_v41, %v5300_v62  ;;  %v5400_v63 = vunpack.i.h.bf16 %v7537_v15 }
 0x4c8   : > { %v3989_v14 = vsel %vm1129_vm7, %v5369_v56, %v5370_v61  ;;  %3897 = vmatpush.msra.mxu3 %v3859_v58  ;;  %v3990_v1 = vsel %vm1129_vm7, %v5370_v61, %v5379_v9  ;;  %v5315_v61 = vunpack.i.h.bf16 %v7872_v22  ;;  %v5314_v56 = vunpack.i.l.bf16 %v7872_v22  ;;  %v7599_v58 = vpop.permute.xlu2 %5402 }
 0x4c9   : > { %3782 = vmatpush.msra.mxu2 %v7864_v18  ;;  %v5309_v18 = vunpack.i.l.bf16 %v7874_v28  ;;  %v4108_v27 = vsel %vm1263_vm8, %v5304_v40, %v5305_v51  ;;  %v4239_v24 = vsel %vm1397_vm9, %v5399_v4, %v5400_v63  ;;  %v5404_v25 = vunpack.i.l.bf16 %v7599_v58 }
 0x4ca   : > { %3898 = vmatpush.msra.mxu3 %v3856_v44 }
 0x4cb   : > { %4019 = vmatpush.msrb.mxu2 %v3989_v14  ;;  %4746 = vmatmul.msk.f32.vlgmr.msra.gmra.mxu3 %vm1694_vm10, %v7524_v53 }
 0x4cc   : > { %4744 = vmatmul.msk.f32.vlgmr.msra.gmra.mxu2 %vm1694_vm10, %v7394_v50  ;;  %4039 = vmatpush.msrb.mxu3 %v3990_v1  ;;  %v3987_v50 = vsel %vm1129_vm7, %v5250_v38, %v5380_v13  ;;  %v5310_v1 = vunpack.i.h.bf16 %v7874_v28 }
 0x4cd   : > { %4020 = vmatpush.msrb.mxu2 %v3986_v31  ;;  %v7541_v30 = vpop.permute.xlu1 %5382  ;;  %v5320_v31 = vunpack.i.h.bf16 %v7324_v34  ;;  %v3991_v34 = vsel %vm1129_vm7, %v5379_v9, %v5309_v18 }
 0x4ce   : > { %v5385_v8 = vunpack.i.h.bf16 %v7541_v30  ;;  %v5384_v43 = vunpack.i.l.bf16 %v7541_v30  ;;  %v5373_v42 = vpop.permute.xlu0 %5372  ;;  %4040 = vmatpush.msrb.mxu3 %v3987_v50  ;;  %v4105_v50 = vsel %vm1263_vm8, %v5314_v56, %v5315_v61  ;;  %v3988_v9 = vsel %vm1129_vm7, %v5380_v13, %v5310_v1 }
 0x4cf   : > { %4021 = vmatpush.msrb.mxu2 %v3983_v32  ;;  %v5375_v39 = vunpack.i.h.bf16 %v5373_v42  ;;  %v5374_v11 = vunpack.i.l.bf16 %v5373_v42  ;;  %v5355_v32 = vunpack.i.h.bf16 %v7404_v7  ;;  %v4753_v42 = vld [vmem:[%s7727_s5 + $0x38] sm:$0xff]  ;;  %v5325_v13 = vunpack.i.h.bf16 %v7475_v3 }
 0x4d0   : > { %v4114_v57 = vsel %vm1263_vm8, %v5384_v43, %v5385_v8  ;;  %4041 = vmatpush.msrb.mxu3 %v3984_v46  ;;  %v5324_v46 = vunpack.i.l.bf16 %v7475_v3 }
 0x4d1   : > { %4022 = vmatpush.msrb.mxu2 %v3980_v0  ;;  %v3866_v60 = vsel %vm995_vm6, %v5365_v47, %v5374_v11  ;;  %v3867_v23 = vsel %vm995_vm6, %v5374_v11, %v5375_v39  ;;  %v3864_v47 = vsel %vm995_vm6, %v5264_v36, %v5265_v26  ;;  %v7877_v0 = vld [vmem:[#allocation16_spill] sm:$0xff]  ;;  %v5354_v26 = vunpack.i.l.bf16 %v7404_v7 }
 0x4d2   : > { %3915 = vmatpush.msra.mxu0 %v3866_v60  ;;  %3935 = vmatpush.msra.mxu1 %v3867_v23  ;;  %v5349_v11 = vunpack.i.l.bf16 %v7466_v55  ;;  %v4112_v60 = vsel %vm1263_vm8, %v5295_v21, %v5320_v31  ;;  %v3985_v3 = vsel %vm1129_vm7, %v5289_v5, %v5324_v46  ;;  %v5418_v21 = vpop.permute.xlu2 %5417  ;;  %v3982_v5 = vsel %vm1129_vm7, %v5290_v6, %v5325_v13  ;;  %v4757_v6 = vld [vmem:[%s7727_s5 + $0x40] sm:$0xff] }
 0x4d3   : > { %4163 = vmatpush.msra.mxu2 %v4114_v57  ;;  %4042 = vmatpush.msrb.mxu3 %v3981_v16  ;;  %v4110_v57 = vsel %vm1263_vm8, %v5319_v52, %v5294_v2  ;;  %v5359_v2 = vunpack.i.l.bf16 %v7507_v35  ;;  %v4236_v29 = vsel %vm1397_vm9, %v5354_v26, %v5355_v32  ;;  %v5419_v17 = vunpack.i.l.bf16 %v5418_v21 }
 0x4d4   : > { %4750 = vmatmul.msk.f32.vlgmr.msrb.gmra.mxu2 %vm1694_vm10, %v7561_v19  ;;  %3916 = vmatpush.msra.mxu0 %v3863_v49 }
 0x4d5   : > { %3936 = vmatpush.msra.mxu1 %v3864_v47  ;;  %4164 = vmatpush.msra.mxu2 %v4111_v37  ;;  %v7592_v38 = vpop.permute.xlu1 %5387 }
 0x4d6   : > { %4751 = vmatmul.msk.f32.vlgmr.msrb.gmra.mxu3 %vm1694_vm10, %v7561_v19  ;;  %v5393_v14 = vpop.permute.xlu0 %5392  ;;  %3917 = vmatpush.msra.mxu0 %v7875_v45  ;;  %v5390_v30 = vunpack.i.h.bf16 %v7592_v38 }
 0x4d7   : > { %3937 = vmatpush.msra.mxu1 %v3861_v59  ;;  %v5395_v33 = vunpack.i.h.bf16 %v5393_v14  ;;  %v5394_v44 = vunpack.i.l.bf16 %v5393_v14  ;;  %4165 = vmatpush.msra.mxu2 %v4108_v27 }
 0x4d8   : > { %3918 = vmatpush.msra.mxu0 %v7877_v0 }
 0x4d9   : > { %3938 = vmatpush.msra.mxu1 %v3858_v48  ;;  %4166 = vmatpush.msra.mxu2 %v4105_v50  ;;  %v4113_v36 = vsel %vm1263_vm8, %v5394_v44, %v5384_v43  ;;  %v4115_v39 = vsel %vm1263_vm8, %v5385_v8, %v5395_v33  ;;  %v5350_v43 = vunpack.i.h.bf16 %v7466_v55  ;;  %v5389_v8 = vunpack.i.l.bf16 %v7592_v38  ;;  %v4333_v50 = vld.sshfl [vmem:[#allocation1] sm:$0xff pattern:$0x75316420] }
 0x4da   : > { %4747 = vmatmul.msk.f32.vlgmr.msra.gmra.mxu0 %vm1694_vm10, %v7524_v53  ;;  %4748 = vmatmul.msk.f32.vlgmr.msra.gmra.mxu1 %vm1694_vm10, %v7524_v53  ;;  %v5405_v53 = vunpack.i.h.bf16 %v7599_v58  ;;  %v5360_v55 = vunpack.i.h.bf16 %v7507_v35  ;;  %v4107_v35 = vsel %vm1263_vm8, %v5349_v11, %v5304_v40  ;;  %v4104_v40 = vsel %vm1263_vm8, %v5359_v2, %v5314_v56  ;;  %4339 = vst [vmem:[%s7708_s14] sm:$0xf] %v4333_v50 }
 0x4db   : > { %4059 = vmatpush.msrb.mxu0 %v3991_v34  ;;  %4143 = vmatpush.msrb.mxu1 %v4113_v36  ;;  %v4233_v62 = vsel %vm1397_vm9, %v5389_v8, %v5390_v30  ;;  %v4109_v20 = vsel %vm1263_vm8, %v5305_v51, %v5350_v43  ;;  %v5420_v56 = vunpack.i.h.bf16 %v5418_v21  ;;  %v4335_v34 = vld.sshfl [vmem:[#allocation1 + $0x10] sm:$0xff pattern:$0x75316420] }
 0x4dc   : > { %4755 = vmatmul.msk.f32.vlgmr.msra.gmra.mxu2 %vm1694_vm10, %v4753_v42  ;;  %4183 = vmatpush.msra.mxu3 %v4115_v39  ;;  %v4230_v47 = vsel %vm1397_vm9, %v5404_v25, %v5405_v53  ;;  %v4106_v10 = vsel %vm1263_vm8, %v5315_v61, %v5360_v55  ;;  %4341 = vst [vmem:[%s7708_s14 + $0x10] sm:$0xf] %v4335_v34 }
 0x4dd   : > { %4307 = vmatpush.msrb.mxu2 %v4239_v24  ;;  %4060 = vmatpush.msrb.mxu0 %v3988_v9  ;;  %v5408_v23 = vpop.permute.xlu1 %5407  ;;  %v4232_v18 = vsel %vm1397_vm9, %v5420_v56, %v5389_v8 }
 0x4de   : > { %4144 = vmatpush.msrb.mxu1 %v4110_v57  ;;  %4184 = vmatpush.msra.mxu3 %v4112_v60  ;;  %v5413_v12 = vpop.permute.xlu0 %5412  ;;  %v5410_v37 = vunpack.i.h.bf16 %v5408_v23  ;;  %v5409_v38 = vunpack.i.l.bf16 %v5408_v23 }
 0x4df   : > { %4308 = vmatpush.msrb.mxu2 %v4236_v29  ;;  %4061 = vmatpush.msrb.mxu0 %v3985_v3  ;;  %v5415_v16 = vunpack.i.h.bf16 %v5413_v12  ;;  %v5414_v49 = vunpack.i.l.bf16 %v5413_v12 }
 0x4e0   : > { %4145 = vmatpush.msrb.mxu1 %v4107_v35  ;;  %4185 = vmatpush.msra.mxu3 %v4109_v20  ;;  %v4234_v15 = vsel %vm1397_vm9, %v5409_v38, %v5410_v37  ;;  %v4235_v22 = vsel %vm1397_vm9, %v5410_v37, %v5354_v26 }
 0x4e1   : > { %4309 = vmatpush.msrb.mxu2 %v4233_v62  ;;  %4062 = vmatpush.msrb.mxu0 %v3982_v5  ;;  %v4237_v51 = vsel %vm1397_vm9, %v5414_v49, %v5415_v16  ;;  %v4238_v54 = vsel %vm1397_vm9, %v5415_v16, %v5399_v4 }
 0x4e2   : > { %4146 = vmatpush.msrb.mxu1 %v4104_v40  ;;  %4186 = vmatpush.msra.mxu3 %v4106_v10 }
 0x4e3   : > { %4310 = vmatpush.msrb.mxu2 %v4230_v47  ;;  %4752 = vmatmul.msk.f32.vlgmr.msrb.gmra.mxu0 %vm1694_vm10, %v7561_v19  ;;  %v4231_v19 = vsel %vm1397_vm9, %v5419_v17, %v5420_v56 }
 0x4e4   : > { %4754 = vmatmul.msk.f32.vlgmr.msrb.gmra.mxu1 %vm1694_vm10, %v4753_v42  ;;  %4756 = vmatmul.msk.f32.vlgmr.msra.gmra.mxu3 %vm1694_vm10, %v4753_v42  ;;  %v4334_v42 = vld.sshfl [vmem:[#allocation1 + $0x8] sm:$0xff pattern:$0x75316420] }
 0x4e5   : > { %4267 = vmatpush.msra.mxu0 %v4237_v51  ;;  %4287 = vmatpush.msra.mxu1 %v4238_v54  ;;  %4340 = vst [vmem:[%s7708_s14 + $0x8] sm:$0xf] %v4334_v42 }
 0x4e6   : > { %4760 = vmatmul.msk.f32.vlgmr.msrb.gmra.mxu2 %vm1694_vm10, %v4757_v6  ;;  %v5423_v61 = vpop.permute.xlu0 %5422 }
 0x4e7   : > { %4268 = vmatpush.msra.mxu0 %v4234_v15  ;;  %4288 = vmatpush.msra.mxu1 %v4235_v22  ;;  %v5425_v59 = vunpack.i.h.bf16 %v5423_v61  ;;  %v5424_v28 = vunpack.i.l.bf16 %v5423_v61 }
 0x4e9   : > { %4269 = vmatpush.msra.mxu0 %v4231_v19  ;;  %4289 = vmatpush.msra.mxu1 %v4232_v18  ;;  %v4228_v52 = vsel %vm1397_vm9, %v5424_v28, %v5425_v59  ;;  %v4229_v58 = vsel %vm1397_vm9, %v5425_v59, %v5404_v25 }
 0x4eb   : > { %4270 = vmatpush.msra.mxu0 %v4228_v52  ;;  %4290 = vmatpush.msra.mxu1 %v4229_v58 }
 0x4ec   : > { %4758 = vmatmul.msk.f32.vlgmr.msra.gmra.mxu0 %vm1694_vm10, %v4757_v6  ;;  %4759 = vmatmul.msk.f32.vlgmr.msra.gmra.mxu1 %vm1694_vm10, %v4757_v6  ;;  %v4322_v6 = vpop.permute.xlu1 %4321 }
 0x521   : > { %v3592_v44 = vpop.f32.mrf.mxu0 }
 0x524   : > { %v3312_v7 = vpop.f32.mrf.mxu2 }
 0x525   : > { %v3332_v14 = vpop.f32.mrf.mxu3 }
 0x529   : > { %v3744_v32 = vpop.f32.mrf.mxu0 }
 0x52d   : > { %v3352_v45 = vpop.f32.mrf.mxu2  ;;  %v3431_v27 = vpop.f32.mrf.mxu3 }
 0x52e   : > { %v3432_v11 = vadd.f32 %v3431_v27, %v3312_v7 }
 0x535   : > { %v3451_v41 = vpop.f32.mrf.mxu2  ;;  %v3471_v48 = vpop.f32.mrf.mxu3 }
 0x536   : > { %v3452_v57 = vadd.f32 %v3451_v41, %v3332_v14  ;;  %v3472_v30 = vadd.f32 %v3471_v48, %v3352_v45 }
 0x538   : > { %v3597_v25 = vadd.f32 %v3592_v44, %v3472_v30 }
 0x53a   : > { %v3676_v33 = vpop.f32.mrf.mxu1 }
 0x53d   : > { %v3552_v63 = vpop.f32.mrf.mxu2 }
 0x53e   : > { %v3572_v4 = vpop.f32.mrf.mxu3  ;;  %v3595_v43 = vadd.f32 %v3552_v63, %v3432_v11 }
 0x53f   : > { %v3596_v8 = vadd.f32 %v3572_v4, %v3452_v57 }
 0x540   : > { %v3719_v53 = vadd.f32 %v3676_v33, %v3595_v43 }
 0x542   : > { %v3764_v26 = vpop.f32.mrf.mxu1  ;;  %v3787_v3 = vadd.f32 %v3744_v32, %v3719_v53 }
 0x546   : > { %v3716_v31 = vpop.f32.mrf.mxu3 }
 0x547   : > { %v3696_v1 = vpop.f32.mrf.mxu2  ;;  %v3721_v2 = vadd.f32 %v3716_v31, %v3597_v25 }
 0x548   : > { %v3720_v24 = vadd.f32 %v3696_v1, %v3596_v8 }
 0x54a   : > { %v3788_v55 = vadd.f32 %v3764_v26, %v3720_v24 }
 0x54e   : > { %v3900_v46 = vpop.f32.mrf.mxu3 }
 0x54f   : > { %v3784_v0 = vpop.f32.mrf.mxu2  ;;  %v3943_v62 = vadd.f32 %v3900_v46, %v3787_v3 }
 0x550   : > { %v3789_v12 = vadd.f32 %v3784_v0, %v3721_v2 }
 0x557   : > { %v4024_v36 = vpop.f32.mrf.mxu2  ;;  %v3920_v39 = vpop.f32.mrf.mxu0 }
 0x558   : > { %v3940_v9 = vpop.f32.mrf.mxu1  ;;  %v3944_v35 = vadd.f32 %v3920_v39, %v3788_v55  ;;  %v4067_v49 = vadd.f32 %v4024_v36, %v3943_v62 }
 0x559   : > { %v4044_v13 = vpop.f32.mrf.mxu3  ;;  %v3945_v16 = vadd.f32 %v3940_v9, %v3789_v12 }
 0x55a   : > { %v4068_v20 = vadd.f32 %v4044_v13, %v3944_v35 }
 0x55f   : > { %v4168_v29 = vpop.f32.mrf.mxu2 }
 0x560   : > { %v4064_v60 = vpop.f32.mrf.mxu0  ;;  %v4192_v40 = vadd.f32 %v4168_v29, %v4068_v20 }
 0x561   : > { %v4148_v23 = vpop.f32.mrf.mxu1  ;;  %v4069_v21 = vadd.f32 %v4064_v60, %v3945_v16 }
 0x562   : > { %v4191_v5 = vadd.f32 %v4148_v23, %v4067_v49 }
 0x567   : > { %v4188_v47 = vpop.f32.mrf.mxu3 }
 0x568   : > { %v4193_v37 = vadd.f32 %v4188_v47, %v4069_v21 }
 0x569   : > { %v4312_v38 = vpop.f32.mrf.mxu2  ;;  %v4272_v10 = vpop.f32.mrf.mxu0 }
 0x56a   : > { %v4315_v51 = vadd.f32 %v4272_v10, %v4191_v5  ;;  %v4292_v54 = vpop.f32.mrf.mxu1  ;;  %v4317_v56 = vadd.f32 %v4312_v38, %v4193_v37 }
 0x56b   : > { %v4316_v17 = vadd.f32 %v4292_v54, %v4192_v40 }
 0x56c   : > { %v4324_v15 = vadd.f32 %v4322_v6, %v4315_v51  ;;  %v4326_v22 = vadd.f32 %v4322_v6, %v4317_v56 }
 0x56d   : > { %v4325_v61 = vadd.f32 %v4322_v6, %v4316_v17 }
 0x56e   : > { %v4327_v59 = vmax.f32 %v4324_v15, 0.0  ;;  %v4329_v28 = vmax.f32 %v4326_v22, 0.0 }
 0x56f   : > { %v4328_v19 = vmax.f32 %v4325_v61, 0.0 }
 0x570   : > { %v4345_v18 = vrot.slane %v4327_v59, 4  ;;  %v4347_v52 = vrot.slane %v4329_v28, 4 }
 0x571   : > { %v4346_v58 = vrot.slane %v4328_v19, 4 }
 0x572   : > { %4351 = vst [vmem:[%s7708_s14] sm:$0xf0] %v4345_v18 }
 0x573   : > { %4353 = vst [vmem:[%s7708_s14 + $0x10] sm:$0xf0] %v4347_v52 }
 0x574   : > { %4356 = vst [vmem:[%s7708_s14 + $0x28] sm:$0xf] %v4347_v52 }
 0x575   : > { %4354 = vst [vmem:[%s7708_s14 + $0x18] sm:$0xf] %v4345_v18 }
 0x576   : > { %4352 = vst [vmem:[%s7708_s14 + $0x8] sm:$0xf0] %v4346_v58 }
 0x577   : > { %4355 = vst [vmem:[%s7708_s14 + $0x20] sm:$0xf] %v4346_v58 }
 0x578 PF: > { %s18_s27 = sadd.s32 1, %s5434_s27  }
 0x579   : > { %p15_p4 = scmp.ge.s32.totalorder %s18_s27, 4  }
 0x57b   :  { %17 = sbr.rel (!%p15_p4) target bundleno = 1 (0x1), region = 108 }

</bundles_post_ra>
